<compile_context>
chip_gen: v5e
topology: v5e:2x2
jax: 0.10.0
libtpu: 0.0.40
codegen_flags: <defaults>
</compile_context>

<pallas_src>
import jax
import jax.numpy as jnp
from jax.experimental import pallas as pl
from jax.experimental.pallas import tpu as pltpu


# ---------------------------------------------------------------------------
# Fused kernel: per-point MLP (conv1/conv2/conv3, BN folded, ReLU) + max pool
# over points + classifier head (fc1/fc2, BN folded, ReLU; fc3; log_softmax).
# Grid = (batch, point-tiles); batch is parallel (megacore), point-tiles are
# the reduction axis with a running max in VMEM scratch.
# ---------------------------------------------------------------------------
def point_model_kernel(x_ref, w1_ref, w2_ref, w3_ref, w4_ref, w5_ref, w6_ref,
                       b_ref, out_ref, maxacc):
    t = pl.program_id(1)

    @pl.when(t == 0)
    def _():
        # -inf init is safe: ReLU guarantees h >= 0 and tile_n always divides N
        # (enforced by the wrapper), so every tile contributes only real points.
        maxacc[...] = jnp.full(maxacc.shape, -jnp.inf, maxacc.dtype)

    x = x_ref[0]                                     # (TN, 3) f32

    # ---- layer 1 (3 -> 64) on the VPU in f32: three broadcast FMAs.
    w1 = w1_ref[...]                                 # (3, 64) f32
    h = (x[:, 0:1] * w1[0:1, :]
         + x[:, 1:2] * w1[1:2, :]
         + x[:, 2:3] * w1[2:3, :]
         + b_ref[0:1, 0:64])
    h = jnp.maximum(h, 0.0)                          # (TN, 64) f32

    # ---- layer 2 (64 -> 128) and layer 3 (128 -> 512): bf16 MXU, f32 accum.
    h = jnp.dot(h.astype(jnp.bfloat16), w2_ref[...],
                preferred_element_type=jnp.float32) + b_ref[1:2, 0:128]
    h = jnp.maximum(h, 0.0)                          # (TN, 128) f32
    h = jnp.dot(h.astype(jnp.bfloat16), w3_ref[...],
                preferred_element_type=jnp.float32) + b_ref[2:3, 0:512]
    h = jnp.maximum(h, 0.0)                          # (TN, 512) f32

    # ---- running max over the point axis (sublane reduce, lane-dense result).
    maxacc[...] = jnp.maximum(maxacc[...], jnp.max(h, axis=0, keepdims=True))

    # ---- classifier head on the final point tile of this batch row only.
    @pl.when(t == pl.num_programs(1) - 1)
    def _():
        nk = out_ref.shape[-1]
        p = maxacc[...]                                               # (1, 512) f32
        g = jnp.dot(p.astype(jnp.bfloat16), w4_ref[...],
                    preferred_element_type=jnp.float32) + b_ref[3:4, 0:256]
        g = jnp.maximum(g, 0.0)                                       # (1, 256)
        g = jnp.dot(g.astype(jnp.bfloat16), w5_ref[...],
                    preferred_element_type=jnp.float32) + b_ref[4:5, 0:128]
        g = jnp.maximum(g, 0.0)                                       # (1, 128)
        logits = (jnp.dot(g.astype(jnp.bfloat16), w6_ref[...],
                          preferred_element_type=jnp.float32)
                  + b_ref[5:6, 0:nk])                                 # (1, k)
        m = jnp.max(logits, axis=-1, keepdims=True)
        lse = jnp.log(jnp.sum(jnp.exp(logits - m), axis=-1, keepdims=True)) + m
        out_ref[...] = (logits - lse).reshape(out_ref.shape)          # log_softmax


# ---------------------------------------------------------------------------
# Wrapper
# ---------------------------------------------------------------------------
def _pick_tile_n(n, cap=1024):
    """Largest point tile <= cap (multiple of 8) dividing n; n itself if small.

    cap=1024 keeps the live f32 h3 tile (tile_n*512*4 B = 2 MiB) plus bf16
    copies and ~1 MB of double-buffered weights comfortably under the default
    scoped-VMEM limits on every generation (v5e 16 MiB, v6e/v7x 32 MiB).
    """
    if n <= cap:
        return n
    for t in range(cap, 7, -1):
        if n % t == 0 and t % 8 == 0:
            return t
    return n  # no suitable divisor: fall back to a single (possibly large) tile


def point_model_forward(x_ncw, params, *, tile_n=None):
    """x_ncw: (B, 3, N) float32 (PyTorch NCW).  Returns (B, k) log-probs."""
    (w1, b1), (w2, b2), (w3, b3), (w4, b4), (w5, b5), (w6, b6) = params
    B, C_in, N = x_ncw.shape
    assert C_in == 3
    if tile_n is None:
        tile_n = _pick_tile_n(N)
    assert N % tile_n == 0
    k = w6.shape[1]

    # x is tiny (B*3*N*4 bytes); this single transpose is cheaper than the
    # in-kernel lane->sublane relayout a direct-NCW formulation would need.
    x = jnp.transpose(x_ncw, (0, 2, 1)).astype(jnp.float32)       # (B, N, 3)

    # bf16 weights for the MXU layers (f32 accumulation happens in-kernel).
    w2b = w2.astype(jnp.bfloat16)
    w3b = w3.astype(jnp.bfloat16)
    w4b = w4.astype(jnp.bfloat16)
    w5b = w5.astype(jnp.bfloat16)
    w6b = w6.astype(jnp.bfloat16)

    # Pack all six biases into one (6, 512) f32 array (zero-padded rows) to cut
    # the number of input DMAs / double-buffered blocks.
    bpack = jnp.zeros((6, 512), jnp.float32)
    bpack = bpack.at[0, :64].set(jnp.reshape(b1, (-1,)))
    bpack = bpack.at[1, :128].set(jnp.reshape(b2, (-1,)))
    bpack = bpack.at[2, :512].set(jnp.reshape(b3, (-1,)))
    bpack = bpack.at[3, :256].set(jnp.reshape(b4, (-1,)))
    bpack = bpack.at[4, :128].set(jnp.reshape(b5, (-1,)))
    bpack = bpack.at[5, :k].set(jnp.reshape(b6, (-1,)))

    const = lambda b, t: (0, 0)

    out = pl.pallas_call(
        point_model_kernel,
        out_shape=jax.ShapeDtypeStruct((B, 1, k), jnp.float32),
        grid_spec=pltpu.PrefetchScalarGridSpec(
            num_scalar_prefetch=0,
            grid=(B, N // tile_n),              # batch parallel, point-tiles last
            in_specs=[
                pl.BlockSpec((1, tile_n, 3), lambda b, t: (b, t, 0)),
                pl.BlockSpec((3, 64), const),       # w1 (f32, VPU layer)
                pl.BlockSpec((64, 128), const),     # w2 (bf16)
                pl.BlockSpec((128, 512), const),    # w3 (bf16)
                pl.BlockSpec((512, 256), const),    # w4 (bf16)
                pl.BlockSpec((256, 128), const),    # w5 (bf16)
                pl.BlockSpec((128, k), const),      # w6 (bf16)
                pl.BlockSpec((6, 512), const),      # packed biases (f32)
            ],
            out_specs=pl.BlockSpec((1, 1, k), lambda b, t: (b, 0, 0)),
            scratch_shapes=[pltpu.VMEM((1, 512), jnp.float32)],
        ),
        compiler_params=pltpu.CompilerParams(
            dimension_semantics=("parallel", "arbitrary")),
    )(x, w1, w2b, w3b, w4b, w5b, w6b, bpack)
    return out.reshape(B, k)


# ---------------------------------------------------------------------------
# Deterministic parameter construction (synthetic, not a checkpoint load),
# with eval-mode BatchNorm folded into the preceding affine layer.
# ---------------------------------------------------------------------------
def _fold_bn(wT, b, gamma, beta, mean, var, eps=1e-5):
    """wT: (Cin, Cout) used as x @ wT; fold y = gamma*(x@wT+b - mean)/sqrt(var+eps)+beta."""
    scale = gamma / jnp.sqrt(var + eps)                       # (Cout,)
    return wT * scale[None, :], ((b - mean) * scale + beta)[None, :]


def make_params(key, k=2):
    # 6 linear layers x 2 keys + 5 batchnorms x 4 keys = 32 keys.
    keys = jax.random.split(key, 32)
    ki = iter(keys)

    def lin(cin, cout, scale=0.1):
        w = scale * jax.random.normal(next(ki), (cin, cout), jnp.float32)
        b = scale * jax.random.normal(next(ki), (cout,), jnp.float32)
        return w, b

    def bn(c):
        gamma = 0.5 + jax.random.uniform(next(ki), (c,), jnp.float32)
        beta = 0.1 * jax.random.normal(next(ki), (c,), jnp.float32)
        mean = 0.1 * jax.random.normal(next(ki), (c,), jnp.float32)
        var = 0.5 + jax.random.uniform(next(ki), (c,), jnp.float32)
        return gamma, beta, mean, var

    w1, b1 = lin(3, 64);    w1, b1 = _fold_bn(w1, b1, *bn(64))
    w2, b2 = lin(64, 128);  w2, b2 = _fold_bn(w2, b2, *bn(128))
    w3, b3 = lin(128, 512); w3, b3 = _fold_bn(w3, b3, *bn(512))
    w4, b4 = lin(512, 256); w4, b4 = _fold_bn(w4, b4, *bn(256))
    w5, b5 = lin(256, 128); w5, b5 = _fold_bn(w5, b5, *bn(128))
    w6, b6 = lin(128, k);   b6 = b6[None, :]
    return ((w1, b1), (w2, b2), (w3, b3), (w4, b4), (w5, b5), (w6, b6))


def reference_forward(x_ncw, params):
    hp = jax.lax.Precision.HIGHEST
    (w1, b1), (w2, b2), (w3, b3), (w4, b4), (w5, b5), (w6, b6) = params
    x = jnp.transpose(x_ncw, (0, 2, 1))                       # (B, N, 3)
    h = jax.nn.relu(jnp.dot(x, w1, precision=hp) + b1)
    h = jax.nn.relu(jnp.dot(h, w2, precision=hp) + b2)
    h = jax.nn.relu(jnp.dot(h, w3, precision=hp) + b3)
    p = jnp.max(h, axis=1)                                    # (B, 512)
    h = jax.nn.relu(jnp.dot(p, w4, precision=hp) + b4)
    h = jax.nn.relu(jnp.dot(h, w5, precision=hp) + b5)
    logits = jnp.dot(h, w6, precision=hp) + b6
    return jax.nn.log_softmax(logits, axis=1)


if __name__ == "__main__":
    key = jax.random.PRNGKey(0)
    k_x, k_p = jax.random.split(key)

    B, N, k = 2, 512, 2
    x = jax.random.normal(k_x, (B, 3, N), jnp.float32)        # PyTorch NCW input
    params = make_params(k_p, k=k)

    out = jax.block_until_ready(point_model_forward(x, params))
    ref = jax.block_until_ready(reference_forward(x, params))

    assert out.shape == (B, k)
    # Tolerance loosened vs the f32 HIGHEST reference because the MXU layers
    # now run with bf16 operands (f32 accumulation).
    max_err = float(jnp.max(jnp.abs(out - ref)))
    assert jnp.allclose(out, ref, rtol=2e-2, atol=2e-2), (max_err, out, ref)
    print("KERNEL_OK")
</pallas_src>

<mosaic_0001>
module attributes {stable_mosaic.version = 11 : i64} {
  func.func @point_model_kernel(%arg0: i32, %arg1: i32, %arg2: memref<1x512x3xf32, #tpu.memory_space<vmem>>, %arg3: memref<3x64xf32, #tpu.memory_space<vmem>>, %arg4: memref<64x128xbf16, #tpu.memory_space<vmem>>, %arg5: memref<128x512xbf16, #tpu.memory_space<vmem>>, %arg6: memref<512x256xbf16, #tpu.memory_space<vmem>>, %arg7: memref<256x128xbf16, #tpu.memory_space<vmem>>, %arg8: memref<128x2xbf16, #tpu.memory_space<vmem>>, %arg9: memref<6x512xf32, #tpu.memory_space<vmem>>, %arg10: memref<1x1x2xf32, #tpu.memory_space<vmem>>, %arg11: memref<1x512xf32, #tpu.memory_space<vmem>>) attributes {dimension_semantics = [#tpu.dimension_semantics<parallel>, #tpu.dimension_semantics<arbitrary>], iteration_bounds = array<i64: 2, 1>, scalar_prefetch = 0 : i64, scratch_operands = 1 : i64, tpu.core_type = #tpu.core_type<tc>, window_params = [{transform_indices = @transform_0, window_bounds = array<i64: 1, 512, 3>}, {pipeline_mode = #tpu.pipeline_mode<synchronous>, transform_indices = @transform_1, window_bounds = array<i64: 3, 64>}, {pipeline_mode = #tpu.pipeline_mode<synchronous>, transform_indices = @transform_2, window_bounds = array<i64: 64, 128>}, {pipeline_mode = #tpu.pipeline_mode<synchronous>, transform_indices = @transform_3, window_bounds = array<i64: 128, 512>}, {pipeline_mode = #tpu.pipeline_mode<synchronous>, transform_indices = @transform_4, window_bounds = array<i64: 512, 256>}, {pipeline_mode = #tpu.pipeline_mode<synchronous>, transform_indices = @transform_5, window_bounds = array<i64: 256, 128>}, {pipeline_mode = #tpu.pipeline_mode<synchronous>, transform_indices = @transform_6, window_bounds = array<i64: 128, 2>}, {pipeline_mode = #tpu.pipeline_mode<synchronous>, transform_indices = @transform_7, window_bounds = array<i64: 6, 512>}, {transform_indices = @transform_8, window_bounds = array<i64: 1, 1, 2>}]} {
    %c0_i32 = arith.constant 0 : i32
    %0 = arith.cmpi eq, %arg1, %c0_i32 : i32
    %1 = arith.extui %0 : i1 to i32
    %c0_i32_0 = arith.constant 0 : i32
    %2 = arith.cmpi ne, %1, %c0_i32_0 : i32
    scf.if %2 {
      %cst_24 = arith.constant 0xFF800000 : f32
      %52 = vector.broadcast %cst_24 : f32 to vector<1x512xf32>
      %c0_25 = arith.constant 0 : index
      %c0_26 = arith.constant 0 : index
      %53 = vector.load %arg11[%c0_25, %c0_26] : memref<1x512xf32, #tpu.memory_space<vmem>>, vector<1x512xf32>
      tpu.vector_store %arg11[%c0_25, %c0_26], %52 {strides = array<i32>} : memref<1x512xf32, #tpu.memory_space<vmem>>, vector<1x512xf32>,
    } else {
    }
    %c0 = arith.constant 0 : index
    %c0_1 = arith.constant 0 : index
    %c0_2 = arith.constant 0 : index
    %3 = vector.load %arg2[%c0, %c0_1, %c0_2] : memref<1x512x3xf32, #tpu.memory_space<vmem>>, vector<1x512x3xf32>
    %4 = vector.shape_cast %3 : vector<1x512x3xf32> to vector<512x3xf32>
    %c0_3 = arith.constant 0 : index
    %c0_4 = arith.constant 0 : index
    %5 = vector.load %arg3[%c0_3, %c0_4] : memref<3x64xf32, #tpu.memory_space<vmem>>, vector<3x64xf32>
    %6 = vector.extract_strided_slice %4 {offsets = [0, 0], sizes = [512, 1], strides = [1, 1]} : vector<512x3xf32> to vector<512x1xf32>
    %7 = vector.extract_strided_slice %5 {offsets = [0, 0], sizes = [1, 64], strides = [1, 1]} : vector<3x64xf32> to vector<1x64xf32>
    %8 = vector.broadcast %6 : vector<512x1xf32> to vector<512x64xf32>
    %9 = vector.broadcast %7 : vector<1x64xf32> to vector<512x64xf32>
    %10 = arith.mulf %8, %9 : vector<512x64xf32>
    %11 = vector.extract_strided_slice %4 {offsets = [0, 1], sizes = [512, 1], strides = [1, 1]} : vector<512x3xf32> to vector<512x1xf32>
    %12 = vector.extract_strided_slice %5 {offsets = [1, 0], sizes = [1, 64], strides = [1, 1]} : vector<3x64xf32> to vector<1x64xf32>
    %13 = vector.broadcast %11 : vector<512x1xf32> to vector<512x64xf32>
    %14 = vector.broadcast %12 : vector<1x64xf32> to vector<512x64xf32>
    %15 = arith.mulf %13, %14 : vector<512x64xf32>
    %16 = arith.addf %10, %15 : vector<512x64xf32>
    %17 = vector.extract_strided_slice %4 {offsets = [0, 2], sizes = [512, 1], strides = [1, 1]} : vector<512x3xf32> to vector<512x1xf32>
    %18 = vector.extract_strided_slice %5 {offsets = [2, 0], sizes = [1, 64], strides = [1, 1]} : vector<3x64xf32> to vector<1x64xf32>
    %19 = vector.broadcast %17 : vector<512x1xf32> to vector<512x64xf32>
    %20 = vector.broadcast %18 : vector<1x64xf32> to vector<512x64xf32>
    %21 = arith.mulf %19, %20 : vector<512x64xf32>
    %22 = arith.addf %16, %21 : vector<512x64xf32>
    %c0_5 = arith.constant 0 : index
    %c0_6 = arith.constant 0 : index
    %23 = vector.load %arg9[%c0_5, %c0_6] : memref<6x512xf32, #tpu.memory_space<vmem>>, vector<1x64xf32>
    %24 = vector.broadcast %23 : vector<1x64xf32> to vector<512x64xf32>
    %25 = arith.addf %22, %24 : vector<512x64xf32>
    %cst = arith.constant 0.000000e+00 : f32
    %26 = vector.broadcast %cst : f32 to vector<512x64xf32>
    %27 = arith.maximumf %25, %26 : vector<512x64xf32>
    %28 = arith.truncf %27 : vector<512x64xf32> to vector<512x64xbf16>
    %c0_7 = arith.constant 0 : index
    %c0_8 = arith.constant 0 : index
    %29 = vector.load %arg4[%c0_7, %c0_8] : memref<64x128xbf16, #tpu.memory_space<vmem>>, vector<64x128xbf16>
    %cst_9 = arith.constant dense<0.000000e+00> : vector<512x128xf32>
    %30 = tpu.matmul %28, %29, %cst_9 {dimension_numbers = #tpu.dot_dimension_numbers<[1], [0], [0], [1], [0, 0, 1, 1], [], []>} : vector<512x64xbf16>, vector<64x128xbf16>, vector<512x128xf32> -> vector<512x128xf32>
    %c1 = arith.constant 1 : index
    %c0_10 = arith.constant 0 : index
    %31 = vector.load %arg9[%c1, %c0_10] : memref<6x512xf32, #tpu.memory_space<vmem>>, vector<1x128xf32>
    %32 = vector.broadcast %31 : vector<1x128xf32> to vector<512x128xf32>
    %33 = arith.addf %30, %32 : vector<512x128xf32>
    %cst_11 = arith.constant 0.000000e+00 : f32
    %34 = vector.broadcast %cst_11 : f32 to vector<512x128xf32>
    %35 = arith.maximumf %33, %34 : vector<512x128xf32>
    %36 = arith.truncf %35 : vector<512x128xf32> to vector<512x128xbf16>
    %c0_12 = arith.constant 0 : index
    %c0_13 = arith.constant 0 : index
    %37 = vector.load %arg5[%c0_12, %c0_13] : memref<128x512xbf16, #tpu.memory_space<vmem>>, vector<128x512xbf16>
    %cst_14 = arith.constant dense<0.000000e+00> : vector<512x512xf32>
    %38 = tpu.matmul %36, %37, %cst_14 {dimension_numbers = #tpu.dot_dimension_numbers<[1], [0], [0], [1], [0, 0, 1, 1], [], []>} : vector<512x128xbf16>, vector<128x512xbf16>, vector<512x512xf32> -> vector<512x512xf32>
    %c2 = arith.constant 2 : index
    %c0_15 = arith.constant 0 : index
    %39 = vector.load %arg9[%c2, %c0_15] : memref<6x512xf32, #tpu.memory_space<vmem>>, vector<1x512xf32>
    %40 = vector.broadcast %39 : vector<1x512xf32> to vector<512x512xf32>
    %41 = arith.addf %38, %40 : vector<512x512xf32>
    %cst_16 = arith.constant 0.000000e+00 : f32
    %42 = vector.broadcast %cst_16 : f32 to vector<512x512xf32>
    %43 = arith.maximumf %41, %42 : vector<512x512xf32>
    %c0_17 = arith.constant 0 : index
    %c0_18 = arith.constant 0 : index
    %44 = vector.load %arg11[%c0_17, %c0_18] : memref<1x512xf32, #tpu.memory_space<vmem>>, vector<1x512xf32>
    %cst_19 = arith.constant dense<0xFF800000> : vector<512xf32>
    %45 = vector.multi_reduction <maximumf>, %43, %cst_19 [0] : vector<512x512xf32> to vector<512xf32>
    %46 = vector.shape_cast %45 : vector<512xf32> to vector<1x512xf32>
    %47 = arith.maximumf %44, %46 : vector<1x512xf32>
    %c0_20 = arith.constant 0 : index
    %c0_21 = arith.constant 0 : index
    %48 = vector.load %arg11[%c0_20, %c0_21] : memref<1x512xf32, #tpu.memory_space<vmem>>, vector<1x512xf32>
    tpu.vector_store %arg11[%c0_20, %c0_21], %47 {strides = array<i32>} : memref<1x512xf32, #tpu.memory_space<vmem>>, vector<1x512xf32>,
    %c0_i32_22 = arith.constant 0 : i32
    %49 = arith.cmpi eq, %arg1, %c0_i32_22 : i32
    %50 = arith.extui %49 : i1 to i32
    %c0_i32_23 = arith.constant 0 : i32
    %51 = arith.cmpi ne, %50, %c0_i32_23 : i32
    scf.if %51 {
      %c0_24 = arith.constant 0 : index
      %c0_25 = arith.constant 0 : index
      %52 = vector.load %arg11[%c0_24, %c0_25] : memref<1x512xf32, #tpu.memory_space<vmem>>, vector<1x512xf32>
      %53 = arith.truncf %52 : vector<1x512xf32> to vector<1x512xbf16>
      %c0_26 = arith.constant 0 : index
      %c0_27 = arith.constant 0 : index
      %54 = vector.load %arg6[%c0_26, %c0_27] : memref<512x256xbf16, #tpu.memory_space<vmem>>, vector<512x256xbf16>
      %cst_28 = arith.constant dense<0.000000e+00> : vector<1x256xf32>
      %55 = tpu.matmul %53, %54, %cst_28 {dimension_numbers = #tpu.dot_dimension_numbers<[1], [0], [0], [1], [0, 0, 1, 1], [], []>} : vector<1x512xbf16>, vector<512x256xbf16>, vector<1x256xf32> -> vector<1x256xf32>
      %c3 = arith.constant 3 : index
      %c0_29 = arith.constant 0 : index
      %56 = vector.load %arg9[%c3, %c0_29] : memref<6x512xf32, #tpu.memory_space<vmem>>, vector<1x256xf32>
      %57 = arith.addf %55, %56 : vector<1x256xf32>
      %cst_30 = arith.constant 0.000000e+00 : f32
      %58 = vector.broadcast %cst_30 : f32 to vector<1x256xf32>
      %59 = arith.maximumf %57, %58 : vector<1x256xf32>
      %60 = arith.truncf %59 : vector<1x256xf32> to vector<1x256xbf16>
      %c0_31 = arith.constant 0 : index
      %c0_32 = arith.constant 0 : index
      %61 = vector.load %arg7[%c0_31, %c0_32] : memref<256x128xbf16, #tpu.memory_space<vmem>>, vector<256x128xbf16>
      %cst_33 = arith.constant dense<0.000000e+00> : vector<1x128xf32>
      %62 = tpu.matmul %60, %61, %cst_33 {dimension_numbers = #tpu.dot_dimension_numbers<[1], [0], [0], [1], [0, 0, 1, 1], [], []>} : vector<1x256xbf16>, vector<256x128xbf16>, vector<1x128xf32> -> vector<1x128xf32>
      %c4 = arith.constant 4 : index
      %c0_34 = arith.constant 0 : index
      %63 = vector.load %arg9[%c4, %c0_34] : memref<6x512xf32, #tpu.memory_space<vmem>>, vector<1x128xf32>
      %64 = arith.addf %62, %63 : vector<1x128xf32>
      %cst_35 = arith.constant 0.000000e+00 : f32
      %65 = vector.broadcast %cst_35 : f32 to vector<1x128xf32>
      %66 = arith.maximumf %64, %65 : vector<1x128xf32>
      %67 = arith.truncf %66 : vector<1x128xf32> to vector<1x128xbf16>
      %c0_36 = arith.constant 0 : index
      %c0_37 = arith.constant 0 : index
      %68 = vector.load %arg8[%c0_36, %c0_37] : memref<128x2xbf16, #tpu.memory_space<vmem>>, vector<128x2xbf16>
      %cst_38 = arith.constant dense<0.000000e+00> : vector<1x2xf32>
      %69 = tpu.matmul %67, %68, %cst_38 {dimension_numbers = #tpu.dot_dimension_numbers<[1], [0], [0], [1], [0, 0, 1, 1], [], []>} : vector<1x128xbf16>, vector<128x2xbf16>, vector<1x2xf32> -> vector<1x2xf32>
      %c5 = arith.constant 5 : index
      %c0_39 = arith.constant 0 : index
      %70 = vector.load %arg9[%c5, %c0_39] : memref<6x512xf32, #tpu.memory_space<vmem>>, vector<1x2xf32>
      %71 = arith.addf %69, %70 : vector<1x2xf32>
      %cst_40 = arith.constant dense<0xFF800000> : vector<1xf32>
      %72 = vector.multi_reduction <maximumf>, %71, %cst_40 [1] : vector<1x2xf32> to vector<1xf32>
      %73 = vector.shape_cast %72 : vector<1xf32> to vector<1x1xf32>
      %74 = vector.broadcast %73 : vector<1x1xf32> to vector<1x2xf32>
      %75 = arith.subf %71, %74 : vector<1x2xf32>
      %76 = math.exp %75 : vector<1x2xf32>
      %cst_41 = arith.constant dense<0.000000e+00> : vector<1xf32>
      %77 = vector.multi_reduction <add>, %76, %cst_41 [1] : vector<1x2xf32> to vector<1xf32>
      %78 = vector.shape_cast %77 : vector<1xf32> to vector<1x1xf32>
      %79 = math.log %78 : vector<1x1xf32>
      %80 = arith.addf %79, %73 : vector<1x1xf32>
      %81 = vector.broadcast %80 : vector<1x1xf32> to vector<1x2xf32>
      %82 = arith.subf %71, %81 : vector<1x2xf32>
      %83 = vector.shape_cast %82 : vector<1x2xf32> to vector<1x1x2xf32>
      %c0_42 = arith.constant 0 : index
      %c0_43 = arith.constant 0 : index
      %c0_44 = arith.constant 0 : index
      %84 = vector.load %arg10[%c0_42, %c0_43, %c0_44] : memref<1x1x2xf32, #tpu.memory_space<vmem>>, vector<1x1x2xf32>
      tpu.vector_store %arg10[%c0_42, %c0_43, %c0_44], %83 {strides = array<i32>} : memref<1x1x2xf32, #tpu.memory_space<vmem>>, vector<1x1x2xf32>,
    } else {
    }
    return
  }
  func.func @transform_0(%arg0: i32, %arg1: i32) -> (i32, i32, i32) {
    %c0_i32 = arith.constant 0 : i32
    %c0_i32_0 = arith.constant 0 : i32
    return %arg0, %arg1, %c0_i32 : i32, i32, i32
  }
  func.func @transform_1(%arg0: i32, %arg1: i32) -> (i32, i32) {
    %c0_i32 = arith.constant 0 : i32
    %c0_i32_0 = arith.constant 0 : i32
    %c0_i32_1 = arith.constant 0 : i32
    return %c0_i32, %c0_i32_0 : i32, i32
  }
  func.func @transform_2(%arg0: i32, %arg1: i32) -> (i32, i32) {
    %c0_i32 = arith.constant 0 : i32
    %c0_i32_0 = arith.constant 0 : i32
    %c0_i32_1 = arith.constant 0 : i32
    return %c0_i32, %c0_i32_0 : i32, i32
  }
  func.func @transform_3(%arg0: i32, %arg1: i32) -> (i32, i32) {
    %c0_i32 = arith.constant 0 : i32
    %c0_i32_0 = arith.constant 0 : i32
    %c0_i32_1 = arith.constant 0 : i32
    return %c0_i32, %c0_i32_0 : i32, i32
  }
  func.func @transform_4(%arg0: i32, %arg1: i32) -> (i32, i32) {
    %c0_i32 = arith.constant 0 : i32
    %c0_i32_0 = arith.constant 0 : i32
    %c0_i32_1 = arith.constant 0 : i32
    return %c0_i32, %c0_i32_0 : i32, i32
  }
  func.func @transform_5(%arg0: i32, %arg1: i32) -> (i32, i32) {
    %c0_i32 = arith.constant 0 : i32
    %c0_i32_0 = arith.constant 0 : i32
    %c0_i32_1 = arith.constant 0 : i32
    return %c0_i32, %c0_i32_0 : i32, i32
  }
  func.func @transform_6(%arg0: i32, %arg1: i32) -> (i32, i32) {
    %c0_i32 = arith.constant 0 : i32
    %c0_i32_0 = arith.constant 0 : i32
    %c0_i32_1 = arith.constant 0 : i32
    return %c0_i32, %c0_i32_0 : i32, i32
  }
  func.func @transform_7(%arg0: i32, %arg1: i32) -> (i32, i32) {
    %c0_i32 = arith.constant 0 : i32
    %c0_i32_0 = arith.constant 0 : i32
    %c0_i32_1 = arith.constant 0 : i32
    return %c0_i32, %c0_i32_0 : i32, i32
  }
  func.func @transform_8(%arg0: i32, %arg1: i32) -> (i32, i32, i32) {
    %c0_i32 = arith.constant 0 : i32
    %c0_i32_0 = arith.constant 0 : i32
    %c0_i32_1 = arith.constant 0 : i32
    return %arg0, %c0_i32, %c0_i32_0 : i32, i32, i32
  }
}

</mosaic_0001>

<bundles_post_ra>
// kernel: tpu_custom_call.1
= control target key start
LH: loop header
LB: loop body
LE: loop exit
PB: predicated region body
PF: predicated region fallthrough
CT: control target
= control target key end

     0   :  { %13 = vsyncpa [#allocation4], 0  ;;  %s7886_s0 = inlined_call_operand.vmem [shape: f32[2,512,3], index: 0, kind: input, shape index: {}]   ;;  %s7887_s1 = inlined_call_operand.vmem [shape: f32[3,64], index: 1, kind: input, shape index: {}]   ;;  %s7888_s2 = inlined_call_operand.vmem [shape: bf16[64,128], index: 2, kind: input, shape index: {}]   ;;  %s7889_s3 = inlined_call_operand.vmem [shape: bf16[128,512], index: 3, kind: input, shape index: {}]   ;;  %s7890_s4 = inlined_call_operand.vmem [shape: bf16[512,256], index: 4, kind: input, shape index: {}]   ;;  %s7891_s5 = inlined_call_operand.vmem [shape: bf16[256,128], index: 5, kind: input, shape index: {}]   ;;  %s7892_s6 = inlined_call_operand.vmem [shape: bf16[128,2], index: 6, kind: input, shape index: {}]   ;;  %s7893_s7 = inlined_call_operand.vmem [shape: f32[6,512], index: 7, kind: input, shape index: {}]   ;;  %s7894_s8 = inlined_call_operand.hbm [shape: f32[2,1,2], index: 8, kind: output, shape index: {}]  }
   0x1   :  { %15 = vsyncpa [#allocation4 + $0x1], 0  ;;  %s5401_s27 = smov 0   ;;  %s5403_s28 = smov 0  }
   0x2   :  { %s5405_s29 = smov 0   ;;  %s5407_s30 = smov 0  }
   0x3   :  { %s5409_s9 = smov 0   ;;  %s5411_s10 = smov 0  }
   0x4 LB: > { %s4397_s11 = sadd.s32 4294967295, %s5350_s10   ;;  %s4398_s12 = sadd.s32 4294967294, %s5350_s10   ;;  %s5350_s10 = sphi %s5411_s10, %s21_s10   ;;  %s5346_s9 = sphi %s5409_s9, %s7953_s9   ;;  %s5342_s30 = sphi %s5407_s30, %s7952_s30   ;;  %s5338_s29 = sphi %s5405_s29, %s7951_s29   ;;  %s5334_s28 = sphi %s5403_s28, %s7950_s28   ;;  %s5330_s27 = sphi %s5401_s27, %s7949_s27  }
   0x5   : > { %s33_s13 = sadd.s32 1, %s5346_s9  ;;  %s215_s14 = sadd.s32 1, %s5338_s29 }
   0x6   : > { %p35_p0 = scmp.ge.s32.totalorder %s33_s13, 2  ;;  %p225_p1 = scmp.ne.s32.totalorder %s5338_s29, %s5334_s28 }
   0x7   : > { %p226_p2 = scmp.eq.s32.totalorder %s4397_s11, 1  ;;  %p231_p3 = scmp.ne.s32.totalorder %s5334_s28, %s5330_s27 }
   0x8   : > { %s7955_s13 = smov (%p35_p0, %s33_s13), 0  ;;  %p232_p5 = scmp.eq.s32.totalorder %s4398_s12, 1 }
   0x9   : > { %p5441_p4 = por %p226_p2, %p225_p1  ;;  %s212_s16 = ssub.s32 %s5346_s9, %s7955_s13 }
   0xa   : > { %p4401_p6 = scmp.ge.s32.totalorder %s5350_s10, 1  ;;  %p213_p7 = scmp.eq.s32.totalorder %s212_s16, 0 }
   0xb   : > { %p5448_p8 = por %p232_p5, %p231_p3  ;;  %p284_p9 = scmp.lt.s32.totalorder %s5350_s10, 3 }
   0xc   : > { %s5454_s18 = scalar_select %p213_p7, %s5338_s29, %s215_s14  }
   0xd   : > { %p285_p10 = pnand %p4401_p6, %p284_p9 }
   0xf   : > { %288 = sbr.rel (%p285_p10) target bundleno = 2180 (0x884), region = 52 }
  0x14   : > { %p322_p11 = scmp.lt.s32.totalorder %s5342_s30, 1  ;;  %v7901_v0 = vmov 2   ;;  %v7895_v1 = vmov 1   ;;  %v7897_v9 = vmov 0   ;;  %v4940_v40 = vld [vmem:[%s7888_s2 + $0x18] sm:$0xff]  ;;  %v4939_v43 = vld [vmem:[%s7888_s2 + $0x10] sm:$0xff]  ;;  %s4324_s24 = scalar_lea.hbm %s7894_s8, %s5342_s30 }
  0x15   : > { %5142 = vset.pattern.permute.xlu0 %v7901_v0  ;;  %5133 = vset.pattern.permute.xlu2 %v7901_v0  ;;  %v4938_v46 = vld [vmem:[%s7888_s2 + $0x8] sm:$0xff]  ;;  %v4937_v50 = vld [vmem:[%s7888_s2] sm:$0xff]  ;;  %vm1755_vm0 = vcmask 523264   ;;  %vm3536_vm2 = vcmask 1040384   ;;  %vm3538_vm3 = vcmask 1042434   ;;  %vm3540_vm4 = vcmask 1041408  }
  0x16   : > { %5132 = vset.pattern.permute.xlu1 %v7895_v1  ;;  %s323_s19 = scalar_select %p322_p11, %s5342_s30, 1  ;;  %1856 = vmatpush.bf16.msra.mxu0 %v4940_v40  ;;  %v405_v53 = vld [vmem:[%s7887_s1] sm:$0x7]  ;;  %vm4300_vm5 = vcmask 8192  }
  0x17   : > { %5063 = vmatpush.bf16.msra.mxu3 %v4940_v40  ;;  %5061 = vmatpush.bf16.msra.mxu1 %v4940_v40  ;;  %v5631_v56 = vperm.slane %v405_v53, 1  ;;  %v5633_v57 = vperm.slane %v405_v53, 0  ;;  %v5638_v60 = vperm.slane %v405_v53, 2  ;;  %s4328_s26 = sshll.u32 %s4324_s24, 4  ;;  %s4329_s26 = int_to_ptr.hbm [resolvable:$true] %s4328_s26 }
  0x18   : > { %s4936_s20 = sshll.u32 %s323_s19, 9  ;;  %5062 = vmatpush.bf16.msra.mxu2 %v4940_v40  ;;  %s5286_s12 = sshra.s32 %s4329_s26, 4  ;;  %s5287_s12 = int_to_ptr.hbm [resolvable:$true] %s5286_s12 }
  0x19   : > { %s5464_s23 = scalar_lea.vmem %s7886_s0, %s4936_s20  ;;  %s319_s20 = sand.u32 1, %s5334_s28  }
  0x1a   : > { %v346_v2 = vld [vmem:[%s5464_s23 + $0x28] sm:$0xff]  ;;  %v341_v3 = vld [vmem:[%s5464_s23] sm:$0xff]  ;;  %v347_v4 = vld [vmem:[%s5464_s23 + $0x30] sm:$0xff]  ;;  %1857 = vmatpush.bf16.msra.mxu0 %v4939_v43  ;;  %s4316_s11 = scalar_lea.sflag [#allocation4], %s319_s20  ;;  %s5288_s14 = scalar_lea.hbm %s5287_s12, 1 }
  0x1b   : > { %1197 = vperm.xlu0 %5142, %v346_v2   ;;  %1177 = vperm.xlu2 %5133, %v341_v3   ;;  %v342_v5 = vld [vmem:[%s5464_s23 + $0x8] sm:$0xff]  ;;  %v343_v7 = vld [vmem:[%s5464_s23 + $0x10] sm:$0xff]  ;;  %v5475_v8 = vld [vmem:[%s5464_s23 + $0x18] sm:$0xff]  ;;  %p5289_p12 = scmp.ne.s32.totalorder %s5287_s12, %s5288_s14  ;;  %s5292_s19 = scalar_lea.hbm %s7894_s8, 2 }
  0x1c   : > { %792 = vperm.xlu1 %5132, %v341_v3   ;;  %v5471_v6 = vld [vmem:[%s5464_s23 + $0x188] sm:$0xff]  ;;  %v5482_v10 = vld [vmem:[%s5464_s23 + $0x60] sm:$0xff]  ;;  %v348_v14 = vld [vmem:[%s5464_s23 + $0x38] sm:$0xff]  ;;  %5066 = vmatpush.bf16.msra.mxu3 %v4939_v43  ;;  %p5293_p1 = scmp.lt.s32.totalorder %s5287_s12, %s7894_s8  ;;  %p5294_p2 = scmp.lt.s32.totalorder %s5292_s19, %s5288_s14 }
  0x1d   : > { %v5489_v11 = vld [vmem:[%s5464_s23 + $0x1a8] sm:$0xff]  ;;  %v5493_v12 = vld [vmem:[%s5464_s23 + $0x20] sm:$0xff]  ;;  %v351_v17 = vld [vmem:[%s5464_s23 + $0x50] sm:$0xff]  ;;  %5064 = vmatpush.bf16.msra.mxu1 %v4939_v43  ;;  %5065 = vmatpush.bf16.msra.mxu2 %v4939_v43  ;;  %p5290_p13 = pnand %p5289_p12, %p5441_p4 }
  0x1e   : > { %v5499_v13 = vld [vmem:[%s5464_s23 + $0x88] sm:$0xff]  ;;  %v349_v15 = vld [vmem:[%s5464_s23 + $0x40] sm:$0xff]  ;;  %v5519_v18 = vld [vmem:[%s5464_s23 + $0x198] sm:$0xff]  ;;  %1858 = vmatpush.bf16.msra.mxu0 %v4938_v46  ;;  %p5295_p3 = por %p5294_p2, %p5293_p1 }
  0x1f   : > { %v350_v16 = vld [vmem:[%s5464_s23 + $0x48] sm:$0xff]  ;;  %v5527_v20 = vld [vmem:[%s5464_s23 + $0x70] sm:$0xff]  ;;  %v5530_v21 = vld [vmem:[%s5464_s23 + $0x58] sm:$0xff]  ;;  %p5291_p0 = pneg %p5290_p13 }
  0x20   : > { %v5539_v23 = vld [vmem:[%s5464_s23 + $0xe0] sm:$0xff]  ;;  %v5548_v25 = vld [vmem:[%s5464_s23 + $0x98] sm:$0xff]  ;;  %v354_v37 = vld [vmem:[%s5464_s23 + $0x68] sm:$0xff]  ;;  %5069 = vmatpush.bf16.msra.mxu3 %v4938_v46 }
  0x21   : > { %v5554_v27 = vld [vmem:[%s5464_s23 + $0x180] sm:$0xff]  ;;  %v400_v30 = vld [vmem:[%s5464_s23 + $0x1d8] sm:$0xff]  ;;  %v391_v49 = vld [vmem:[%s5464_s23 + $0x190] sm:$0xff]  ;;  %5067 = vmatpush.bf16.msra.mxu1 %v4938_v46  ;;  %5068 = vmatpush.bf16.msra.mxu2 %v4938_v46  ;;  %p5296_p5 = pnand %p5295_p3, %p5291_p0 }
  0x22   : > { %v364_v34 = vld [vmem:[%s5464_s23 + $0xb8] sm:$0xff]  ;;  %1859 = vmatpush.bf16.msra.mxu0 %v4937_v50 }
  0x23   : > { %1201 = vperm.xlu0 %5142, %v347_v4   ;;  %1181 = vperm.xlu2 %5133, %v342_v5   ;;  %v404_v38 = vld [vmem:[%s5464_s23 + $0x1f8] sm:$0xff] }
  0x24   : > { %796 = vperm.xlu1 %5132, %v342_v5   ;;  %v368_v44 = vld [vmem:[%s5464_s23 + $0xd8] sm:$0xff]  ;;  %5072 = vmatpush.bf16.msra.mxu3 %v4937_v50 }
  0x25   : > { %5070 = vmatpush.bf16.msra.mxu1 %v4937_v50  ;;  %5071 = vmatpush.bf16.msra.mxu2 %v4937_v50  ;;  %v5709_v50 = vld [vmem:[%s5464_s23 + $0xf0] sm:$0xff] }
  0x2b   : > { %1373 = vperm.xlu0 %5142, %v5471_v6   ;;  %5135 = vset.pattern.permute.xlu2 %v7895_v1 }
  0x2c   : > { %5134 = vset.pattern.permute.xlu1 %v7897_v9  ;;  %800 = vperm.xlu2 %5135, %v343_v7  }
  0x2d   : > { %423 = vperm.xlu1 %5134, %v5475_v8  }
  0x33   : > { %1225 = vperm.xlu0 %5142, %v5482_v10  }
  0x34   : > { %5137 = vset.pattern.permute.xlu2 %v7901_v0 }
  0x35   : > { %5136 = vset.pattern.permute.xlu1 %v7901_v0  ;;  %1189 = vperm.xlu2 %5137, %v5475_v8  }
  0x36   : > { %1185 = vperm.xlu1 %5136, %v343_v7  }
  0x3b   : > { %1389 = vperm.xlu0 %5142, %v5489_v11  }
  0x3d   : > { %5139 = vset.pattern.permute.xlu2 %v7897_v9 }
  0x3e   : > { %5138 = vset.pattern.permute.xlu1 %v7897_v9  ;;  %433 = vperm.xlu2 %5139, %v346_v2  }
  0x3f   : > { %428 = vperm.xlu1 %5138, %v5493_v12  }
  0x43   : > { %1245 = vperm.xlu0 %5142, %v5499_v13  }
  0x46   : > { %5141 = vset.pattern.permute.xlu2 %v7901_v0 }
  0x47   : > { %5140 = vset.pattern.permute.xlu1 %v7895_v1  ;;  %1193 = vperm.xlu2 %5141, %v5493_v12  }
  0x48   : > { %812 = vperm.xlu1 %5140, %v346_v2  }
  0x4b   : > { %5186 = vset.pattern.permute.xlu0 %v7897_v9 }
  0x4c   : > { %408 = vperm.xlu0 %5186, %v341_v3  }
  0x4f   : > { %5144 = vset.pattern.permute.xlu2 %v7897_v9 }
  0x50   : > { %5143 = vset.pattern.permute.xlu1 %v7897_v9  ;;  %443 = vperm.xlu2 %5144, %v348_v14  }
  0x51   : > { %438 = vperm.xlu1 %5143, %v347_v4  }
  0x54   : > { %413 = vperm.xlu0 %5186, %v342_v5  }
  0x58   : > { %5146 = vset.pattern.permute.xlu2 %v7895_v1 }
  0x59   : > { %5145 = vset.pattern.permute.xlu1 %v7895_v1  ;;  %820 = vperm.xlu2 %5146, %v348_v14  }
  0x5a   : > { %816 = vperm.xlu1 %5145, %v347_v4  }
  0x5c   : > { %418 = vperm.xlu0 %5186, %v343_v7  }
  0x61   : > { %5148 = vset.pattern.permute.xlu2 %v7897_v9 }
  0x62   : > { %5147 = vset.pattern.permute.xlu1 %v7901_v0  ;;  %448 = vperm.xlu2 %5148, %v349_v15  }
  0x63   : > { %1205 = vperm.xlu1 %5147, %v348_v14  }
  0x64   : > { %453 = vperm.xlu0 %5186, %v350_v16  }
  0x6a   : > { %5150 = vset.pattern.permute.xlu2 %v7895_v1 }
  0x6b   : > { %5149 = vset.pattern.permute.xlu1 %v7895_v1  ;;  %828 = vperm.xlu2 %5150, %v350_v16  }
  0x6c   : > { %824 = vperm.xlu1 %5149, %v349_v15   ;;  %458 = vperm.xlu0 %5186, %v351_v17  }
  0x73   : > { %5152 = vset.pattern.permute.xlu2 %v7901_v0 }
  0x74   : > { %5151 = vset.pattern.permute.xlu1 %v7901_v0  ;;  %663 = vperm.xlu0 %5186, %v5519_v18  }
  0x75   : > { %1213 = vperm.xlu2 %5152, %v350_v16   ;;  %1209 = vperm.xlu1 %5151, %v349_v15   ;;  %v5524_v19 = vpop.permute.xlu2 %1177 }
  0x76   : > { %v1433_v2 = vmul.f32 %v5638_v60, %v5524_v19 }
  0x7c   : > { %478 = vperm.xlu0 %5186, %v5527_v20  }
  0x7d   : > { %5154 = vset.pattern.permute.xlu2 %v7895_v1  ;;  %5153 = vset.pattern.permute.xlu1 %v7897_v9  ;;  %v5536_v22 = vpop.permute.xlu2 %1181 }
  0x7e   : > { %832 = vperm.xlu2 %5154, %v351_v17   ;;  %463 = vperm.xlu1 %5153, %v5530_v21  }
  0x84   : > { %548 = vperm.xlu0 %5186, %v5539_v23  }
  0x86   : > { %5156 = vset.pattern.permute.xlu2 %v7901_v0  ;;  %5155 = vset.pattern.permute.xlu1 %v7901_v0  ;;  %v5544_v24 = vpop.permute.xlu2 %800 }
  0x87   : > { %1221 = vperm.xlu2 %5156, %v5530_v21   ;;  %1217 = vperm.xlu1 %5155, %v351_v17   ;;  %v356_v17 = vld [vmem:[%s5464_s23 + $0x78] sm:$0xff] }
  0x8c   : > { %503 = vperm.xlu0 %5186, %v5548_v25  }
  0x8d   : > { %v5551_v26 = vpop.permute.xlu0 %1197 }
  0x8e   : > { %v5556_v28 = vpop.permute.xlu1 %792 }
  0x8f   : > { %5158 = vset.pattern.permute.xlu2 %v7897_v9  ;;  %5157 = vset.pattern.permute.xlu1 %v7897_v9  ;;  %v5560_v29 = vpop.permute.xlu2 %1189  ;;  %v1048_v61 = vmul.f32 %v5631_v56, %v5556_v28 }
  0x90   : > { %653 = vperm.xlu2 %5158, %v5471_v6   ;;  %648 = vperm.xlu1 %5157, %v5554_v27  }
  0x94   : > { %703 = vperm.xlu0 %5186, %v400_v30  }
  0x95   : > { %v5565_v31 = vpop.permute.xlu0 %1201 }
  0x96   : > { %v5567_v32 = vpop.permute.xlu1 %796 }
  0x97   : > { %v1049_v5 = vmul.f32 %v5631_v56, %v5567_v32 }
  0x98   : > { %5160 = vset.pattern.permute.xlu2 %v7901_v0  ;;  %5159 = vset.pattern.permute.xlu1 %v7895_v1  ;;  %v5571_v33 = vpop.permute.xlu2 %433 }
  0x99   : > { %1369 = vperm.xlu2 %5160, %v5554_v27   ;;  %988 = vperm.xlu1 %5159, %v5471_v6  }
  0x9c   : > { %523 = vperm.xlu0 %5186, %v364_v34  }
  0x9d   : > { %v5576_v35 = vpop.permute.xlu0 %1373 }
  0x9f   : > { %v5578_v36 = vpop.permute.xlu1 %423 }
  0xa1   : > { %5162 = vset.pattern.permute.xlu2 %v7897_v9  ;;  %5161 = vset.pattern.permute.xlu1 %v7897_v9  ;;  %v5584_v39 = vpop.permute.xlu2 %1193 }
  0xa2   : > { %473 = vperm.xlu2 %5162, %v354_v37   ;;  %468 = vperm.xlu1 %5161, %v5482_v10  }
  0xa4   : > { %723 = vperm.xlu0 %5186, %v404_v38  }
  0xa5   : > { %v5590_v41 = vpop.permute.xlu0 %1225 }
  0xa8   : > { %v5592_v42 = vpop.permute.xlu1 %1185 }
  0xaa   : > { %5164 = vset.pattern.permute.xlu2 %v7895_v1  ;;  %5163 = vset.pattern.permute.xlu1 %v7895_v1  ;;  %v5600_v45 = vpop.permute.xlu2 %443 }
  0xab   : > { %844 = vperm.xlu2 %5164, %v354_v37   ;;  %840 = vperm.xlu1 %5163, %v5482_v10  }
  0xac   : > { %543 = vperm.xlu0 %5186, %v368_v44   ;;  %v5696_v44 = vld [vmem:[%s5464_s23 + $0x1b0] sm:$0xff] }
  0xad   : > { %v5606_v47 = vpop.permute.xlu0 %1389 }
  0xb1   : > { %v5608_v48 = vpop.permute.xlu1 %428 }
  0xb3   : > { %5166 = vset.pattern.permute.xlu2 %v7897_v9  ;;  %5165 = vset.pattern.permute.xlu1 %v7901_v0  ;;  %v5616_v51 = vpop.permute.xlu2 %820 }
  0xb4   : > { %658 = vperm.xlu2 %5166, %v391_v49   ;;  %1229 = vperm.xlu1 %5165, %v354_v37   ;;  %v393_v37 = vld [vmem:[%s5464_s23 + $0x1a0] sm:$0xff] }
  0xb5   : > { %5248 = vset.pattern.permute.xlu0 %v7895_v1  ;;  %v5619_v52 = vpop.permute.xlu0 %1245 }
  0xb6   : > { %7912 = vst [vmem:[#allocation6_spill] sm:$0xff] %v5619_v52  ;;  %804 = vperm.xlu0 %5248, %v5475_v8   ;;  %v1434_v8 = vmul.f32 %v5638_v60, %v5536_v22 }
  0xba   : > { %v5625_v54 = vpop.permute.xlu1 %812 }
  0xbc   : > { %5168 = vset.pattern.permute.xlu2 %v7895_v1  ;;  %5167 = vset.pattern.permute.xlu1 %v7895_v1  ;;  %v5629_v55 = vpop.permute.xlu2 %448 }
  0xbd   : > { %996 = vperm.xlu2 %5168, %v5519_v18   ;;  %992 = vperm.xlu1 %5167, %v391_v49  }
  0xbe   : > { %808 = vperm.xlu0 %5248, %v5493_v12   ;;  %v409_v58 = vpop.permute.xlu0 %408  ;;  %v5660_v12 = vld [vmem:[%s7893_s7] ss:$0 sm:$0xff] }
  0xbf   : > { %v727_v59 = vmul.f32 %v5633_v57, %v409_v58 }
  0xc1   : > { %v1112_v62 = vadd.f32 %v1048_v61, %v727_v59  ;;  %v357_v59 = vld [vmem:[%s5464_s23 + $0x80] sm:$0xff] }
  0xc3   : > { %v5642_v63 = vpop.permute.xlu1 %438  ;;  %v1497_v6 = vadd.f32 %v1433_v2, %v1112_v62 }
  0xc5   : > { %5170 = vset.pattern.permute.xlu2 %v7901_v0  ;;  %5169 = vset.pattern.permute.xlu1 %v7901_v0  ;;  %v5648_v3 = vpop.permute.xlu2 %828  ;;  %v1562_v15 = vadd.f32 %v5660_v12, %v1497_v6 }
  0xc6   : > { %836 = vperm.xlu0 %5248, %v5530_v21   ;;  %1381 = vperm.xlu2 %5170, %v5519_v18   ;;  %v414_v4 = vpop.permute.xlu0 %413 }
  0xc7   : > { %1377 = vperm.xlu1 %5169, %v391_v49   ;;  %v728_v7 = vmul.f32 %v5633_v57, %v414_v4  ;;  %v1626_v21 = vmax.f32 %v1562_v15, 0.0  ;;  %v5732_v4 = vld [vmem:[%s5464_s23 + $0xa0] sm:$0xff] }
  0xc8   : > { %7915 = vst [vmem:[#allocation9_spill] sm:$0xff] %v5732_v4 }
  0xc9   : > { %v1113_v10 = vadd.f32 %v1049_v5, %v728_v7 }
  0xcb   : > { %v1498_v14 = vadd.f32 %v1434_v8, %v1113_v10  ;;  %v370_v8 = vld [vmem:[%s5464_s23 + $0xe8] sm:$0xff] }
  0xcc   : > { %v5663_v16 = vpop.permute.xlu1 %816  ;;  %v5745_v10 = vld [vmem:[%s5464_s23 + $0x108] sm:$0xff] }
  0xcd   : > { %v1563_v18 = vadd.f32 %v5660_v12, %v1498_v14  ;;  %7917 = vst [vmem:[#allocation11_spill] sm:$0xff] %v5745_v10 }
  0xce   : > { %984 = vperm.xlu0 %5248, %v5554_v27   ;;  %5172 = vset.pattern.permute.xlu2 %v7895_v1  ;;  %v5669_v19 = vpop.permute.xlu0 %418 }
  0xcf   : > { %5171 = vset.pattern.permute.xlu1 %v7897_v9  ;;  %848 = vperm.xlu2 %5172, %v5527_v20   ;;  %v1627_v22 = vmax.f32 %v1563_v18, 0.0  ;;  %v5673_v28 = vpop.permute.xlu2 %1213 }
  0xd0   : > { %483 = vperm.xlu1 %5171, %v356_v17  }
  0xd1   : > { %v1690_v30 = vpack.c.bf16 %v1627_v22, %v1626_v21  ;;  %v5767_v22 = vld [vmem:[%s5464_s23 + $0x160] sm:$0xff] }
  0xd2   : > { %7921 = vst [vmem:[#allocation15_spill] sm:$0xff] %v5767_v22 }
  0xd3   : > { %4420 = vmatmul.msk.bf16.vlgmr.msra.gmra.mxu0 %vm1755_vm0, %v1690_v30 }
  0xd5   : > { %v5676_v32 = vpop.permute.xlu1 %1205 }
  0xd6   : > { %852 = vperm.xlu0 %5248, %v356_v17   ;;  %v5678_v27 = vpop.permute.xlu0 %453 }
  0xd7   : > { %5174 = vset.pattern.permute.xlu2 %v7901_v0 }
  0xd8   : > { %5173 = vset.pattern.permute.xlu1 %v7901_v0  ;;  %1237 = vperm.xlu2 %5174, %v356_v17   ;;  %v5682_v34 = vpop.permute.xlu2 %832  ;;  %v5757_v17 = vld [vmem:[%s5464_s23 + $0x110] sm:$0xff] }
  0xd9   : > { %1233 = vperm.xlu1 %5173, %v5527_v20   ;;  %7919 = vst [vmem:[#allocation13_spill] sm:$0xff] %v5757_v17 }
  0xde   : > { %v5686_v38 = vpop.permute.xlu1 %824  ;;  %v5688_v40 = vpop.permute.xlu0 %458  ;;  %1000 = vperm.xlu0 %5248, %v393_v37  }
  0xe0   : > { %5176 = vset.pattern.permute.xlu2 %v7897_v9 }
  0xe1   : > { %5175 = vset.pattern.permute.xlu1 %v7897_v9  ;;  %673 = vperm.xlu2 %5176, %v5489_v11   ;;  %v5693_v43 = vpop.permute.xlu2 %1221 }
  0xe2   : > { %668 = vperm.xlu1 %5175, %v393_v37  }
  0xe6   : > { %v5698_v20 = vpop.permute.xlu0 %663  ;;  %1008 = vperm.xlu0 %5248, %v5696_v44  }
  0xe7   : > { %v5701_v46 = vpop.permute.xlu1 %1209 }
  0xe9   : > { %5178 = vset.pattern.permute.xlu2 %v7901_v0 }
  0xea   : > { %5177 = vset.pattern.permute.xlu1 %v7895_v1  ;;  %1385 = vperm.xlu2 %5178, %v393_v37   ;;  %v5705_v49 = vpop.permute.xlu2 %653 }
  0xeb   : > { %1004 = vperm.xlu1 %5177, %v5489_v11   ;;  %v5723_v11 = vld [vmem:[%s5464_s23 + $0x140] sm:$0xff] }
  0xee   : > { %v5711_v53 = vpop.permute.xlu0 %478  ;;  %912 = vperm.xlu0 %5248, %v5709_v50  }
  0xef   : > { %7913 = vst [vmem:[#allocation7_spill] sm:$0xff] %v5711_v53  ;;  %v5810_v53 = vld [vmem:[%s5464_s23 + $0x90] sm:$0xff] }
  0xf0   : > { %v5714_v58 = vpop.permute.xlu1 %463 }
  0xf2   : > { %5180 = vset.pattern.permute.xlu2 %v7897_v9 }
  0xf3   : > { %5179 = vset.pattern.permute.xlu1 %v7897_v9  ;;  %493 = vperm.xlu2 %5180, %v5499_v13   ;;  %v5720_v61 = vpop.permute.xlu2 %1369 }
  0xf4   : > { %488 = vperm.xlu1 %5179, %v357_v59  }
  0xf6   : > { %v5725_v62 = vpop.permute.xlu0 %548  ;;  %952 = vperm.xlu0 %5248, %v5723_v11  }
  0xf7   : > { %7914 = vst [vmem:[#allocation8_spill] sm:$0xff] %v5725_v62  ;;  %v379_v62 = vld [vmem:[%s5464_s23 + $0x130] sm:$0xff] }
  0xf9   : > { %v5728_v2 = vpop.permute.xlu1 %1217 }
  0xfb   : > { %5182 = vset.pattern.permute.xlu2 %v7895_v1 }
  0xfc   : > { %5181 = vset.pattern.permute.xlu1 %v7895_v1  ;;  %860 = vperm.xlu2 %5182, %v5499_v13   ;;  %v5736_v5 = vpop.permute.xlu2 %473 }
  0xfd   : > { %856 = vperm.xlu1 %5181, %v357_v59  }
  0xfe   : > { %v5738_v6 = vpop.permute.xlu0 %503  ;;  %872 = vperm.xlu0 %5248, %v5732_v4   ;;  %v7926_v4 = vmov 1  }
  0xff   : > { %7916 = vst [vmem:[#allocation10_spill] sm:$0xff] %v5738_v6  ;;  %v7925_v6 = vmov 2  }
 0x102   : > { %v5741_v7 = vpop.permute.xlu1 %648 }
 0x104   : > { %904 = vperm.xlu2 %5182, %v5539_v23  }
 0x105   : > { %5183 = vset.pattern.permute.xlu1 %v7897_v9  ;;  %v5749_v14 = vpop.permute.xlu2 %844  ;;  %v365_v9 = vld [vmem:[%s5464_s23 + $0xc0] sm:$0xff] }
 0x106   : > { %553 = vperm.xlu1 %5183, %v370_v8   ;;  %v5751_v13 = vpop.permute.xlu0 %703  ;;  %924 = vperm.xlu0 %5248, %v5745_v10   ;;  %v730_v10 = vmul.f32 %v5633_v57, %v5578_v36 }
 0x107   : > { %7918 = vst [vmem:[#allocation12_spill] sm:$0xff] %v5751_v13 }
 0x10b   : > { %v5754_v15 = vpop.permute.xlu1 %988 }
 0x10c   : > { %5185 = vset.pattern.permute.xlu2 %v7901_v0 }
 0x10d   : > { %1241 = vperm.xlu2 %5185, %v357_v59  }
 0x10e   : > { %5184 = vset.pattern.permute.xlu1 %v7895_v1  ;;  %v5761_v18 = vpop.permute.xlu0 %523  ;;  %v5763_v21 = vpop.permute.xlu2 %658  ;;  %928 = vperm.xlu0 %5248, %v5757_v17   ;;  %v396_v1 = vld [vmem:[%s5464_s23 + $0x1b8] sm:$0xff] }
 0x10f   : > { %7920 = vst [vmem:[#allocation14_spill] sm:$0xff] %v5761_v18  ;;  %908 = vperm.xlu1 %5184, %v370_v8   ;;  %v7923_v18 = vmov 0  }
 0x114   : > { %v5769_v30 = vpop.permute.xlu1 %468 }
 0x115   : > { %1293 = vperm.xlu2 %5185, %v370_v8  }
 0x116   : > { %v5771_v37 = vpop.permute.xlu0 %723  ;;  %968 = vperm.xlu0 %5248, %v5767_v22  }
 0x117   : > { %7922 = vst [vmem:[#allocation16_spill] sm:$0xff] %v5771_v37  ;;  %5187 = vset.pattern.permute.xlu1 %v7901_v0  ;;  %v5775_v59 = vpop.permute.xlu2 %996  ;;  %v729_v0 = vmul.f32 %v5633_v57, %v5669_v19  ;;  %v378_v37 = vld [vmem:[%s5464_s23 + $0x128] sm:$0xff] }
 0x118   : > { %1289 = vperm.xlu1 %5187, %v5539_v23   ;;  %v1050_v23 = vmul.f32 %v5631_v56, %v5544_v24 }
 0x11a   : > { %v1114_v22 = vadd.f32 %v1050_v23, %v729_v0 }
 0x11d   : > { %5189 = vset.pattern.permute.xlu2 %v7923_v18  ;;  %v5781_v13 = vpop.permute.xlu1 %840 }
 0x11e   : > { %683 = vperm.xlu2 %5189, %v396_v1   ;;  %v5783_v17 = vpop.permute.xlu0 %543  ;;  %888 = vperm.xlu0 %5248, %v365_v9   ;;  %v1435_v9 = vmul.f32 %v5638_v60, %v5592_v42 }
 0x11f   : > { %7924 = vst [vmem:[#allocation17_spill] sm:$0xff] %v5783_v17 }
 0x120   : > { %5188 = vset.pattern.permute.xlu1 %v7923_v18  ;;  %v5786_v8 = vpop.permute.xlu2 %1381  ;;  %v1499_v52 = vadd.f32 %v1435_v9, %v1114_v22  ;;  %v1053_v9 = vmul.f32 %v5631_v56, %v5625_v54 }
 0x121   : > { %678 = vperm.xlu1 %5188, %v5696_v44  }
 0x126   : > { %5191 = vset.pattern.permute.xlu2 %v7925_v6  ;;  %v5795_v17 = vpop.permute.xlu1 %1229  ;;  %940 = vperm.xlu0 %5248, %v378_v37   ;;  %v1436_v37 = vmul.f32 %v5638_v60, %v5560_v29  ;;  %v731_v29 = vmul.f32 %v5633_v57, %v5608_v48  ;;  %v1437_v48 = vmul.f32 %v5638_v60, %v5584_v39 }
 0x127   : > { %1393 = vperm.xlu2 %5191, %v5696_v44   ;;  %v1564_v44 = vadd.f32 %v5660_v12, %v1499_v52  ;;  %v776_v39 = vmul.f32 %v5633_v57, %v5705_v49  ;;  %v734_v49 = vmul.f32 %v5633_v57, %v5600_v45 }
 0x128   : > { %v805_v19 = vpop.permute.xlu0 %804 }
 0x129   : > { %v1051_v24 = vmul.f32 %v5631_v56, %v805_v19  ;;  %5190 = vset.pattern.permute.xlu1 %v7926_v4  ;;  %v5804_v0 = vpop.permute.xlu2 %848  ;;  %v1628_v52 = vmax.f32 %v1564_v44, 0.0  ;;  %v5834_v44 = vld [vmem:[%s5464_s23 + $0xf8] sm:$0xff] }
 0x12a   : > { %7927 = vst [vmem:[#allocation18_spill] sm:$0xff] %v5804_v0  ;;  %1012 = vperm.xlu1 %5190, %v396_v1  }
 0x12b   : > { %v1115_v23 = vadd.f32 %v1051_v24, %v730_v10  ;;  %v732_v24 = vmul.f32 %v5633_v57, %v5571_v33 }
 0x12d   : > { %v1500_v42 = vadd.f32 %v1436_v37, %v1115_v23  ;;  %v1117_v0 = vadd.f32 %v1053_v9, %v732_v24  ;;  %v1055_v24 = vmul.f32 %v5631_v56, %v5616_v51  ;;  %v733_v51 = vmul.f32 %v5633_v57, %v5642_v63 }
 0x12e   : > { %944 = vperm.xlu0 %5248, %v379_v62  }
 0x12f   : > { %5193 = vset.pattern.permute.xlu2 %v7923_v18  ;;  %v5814_v36 = vpop.permute.xlu1 %992  ;;  %v1565_v22 = vadd.f32 %v5660_v12, %v1500_v42  ;;  %v1438_v42 = vmul.f32 %v5638_v60, %v5551_v26  ;;  %v1097_v26 = vmul.f32 %v5631_v56, %v5754_v15 }
 0x130   : > { %v809_v19 = vpop.permute.xlu0 %808  ;;  %498 = vperm.xlu2 %5193, %v5810_v53  }
 0x131   : > { %v1052_v10 = vmul.f32 %v5631_v56, %v809_v19  ;;  %v1629_v62 = vmax.f32 %v1565_v22, 0.0  ;;  %v1502_v22 = vadd.f32 %v1438_v42, %v1117_v0  ;;  %v1161_v15 = vadd.f32 %v1097_v26, %v776_v39 }
 0x132   : > { %5192 = vset.pattern.permute.xlu1 %v7925_v6  ;;  %v5826_v37 = vpop.permute.xlu2 %1237  ;;  %v1054_v42 = vmul.f32 %v5631_v56, %v5663_v16  ;;  %v1481_v16 = vmul.f32 %v5638_v60, %v5720_v61  ;;  %v1439_v39 = vmul.f32 %v5638_v60, %v5565_v31  ;;  %v778_v61 = vmul.f32 %v5633_v57, %v5698_v20 }
 0x133   : > { %v1116_v23 = vadd.f32 %v1052_v10, %v731_v29  ;;  %1397 = vperm.xlu1 %5192, %v396_v1   ;;  %v1691_v54 = vpack.c.bf16 %v1629_v62, %v1628_v52  ;;  %v1567_v0 = vadd.f32 %v5660_v12, %v1502_v22  ;;  %v1482_v10 = vmul.f32 %v5638_v60, %v5576_v35  ;;  %v5855_v52 = vld [vmem:[%s5464_s23 + $0x148] sm:$0xff] }
 0x134   : > { %v775_v35 = vmul.f32 %v5633_v57, %v5741_v7  ;;  %v1440_v22 = vmul.f32 %v5638_v60, %v5676_v32  ;;  %v1118_v32 = vadd.f32 %v1054_v42, %v733_v51  ;;  %v1099_v31 = vmul.f32 %v5631_v56, %v5775_v59 }
 0x135   : > { %4421 = vmatmul.msk.bf16.gmra.mxu0 %vm1755_vm0, %v1691_v54  ;;  %v1501_v33 = vadd.f32 %v1437_v48, %v1116_v23  ;;  %v1631_v54 = vmax.f32 %v1567_v0, 0.0  ;;  %v1546_v48 = vadd.f32 %v1482_v10, %v1161_v15  ;;  %v1484_v59 = vmul.f32 %v5638_v60, %v5786_v8 }
 0x136   : > { %5253 = vset.pattern.permute.xlu0 %v7925_v6  ;;  %v1163_v20 = vadd.f32 %v1099_v31, %v778_v61  ;;  %v1057_v8 = vmul.f32 %v5631_v56, %v5648_v3  ;;  %v1441_v3 = vmul.f32 %v5638_v60, %v5701_v46 }
 0x137   : > { %1301 = vperm.xlu0 %5253, %v5834_v44   ;;  %v1566_v19 = vadd.f32 %v5660_v12, %v1501_v33  ;;  %v1611_v63 = vadd.f32 %v5660_v12, %v1546_v48  ;;  %v777_v48 = vmul.f32 %v5633_v57, %v5763_v21 }
 0x138   : > { %v5838_v1 = vpop.permute.xlu0 %836  ;;  %5195 = vset.pattern.permute.xlu2 %v7926_v4 }
 0x139   : > { %v1378_v9 = vpop.permute.xlu1 %1377  ;;  %868 = vperm.xlu2 %5195, %v5548_v25   ;;  %v1630_v62 = vmax.f32 %v1566_v19, 0.0  ;;  %v1119_v19 = vadd.f32 %v1055_v24, %v734_v49  ;;  %v1503_v49 = vadd.f32 %v1439_v39, %v1118_v32  ;;  %v1098_v24 = vmul.f32 %v5631_v56, %v5814_v36 }
 0x13a   : > { %v1675_v42 = vmax.f32 %v1611_v63, 0.0  ;;  %v1056_v39 = vmul.f32 %v5631_v56, %v5686_v38 }
 0x13b   : > { %5194 = vset.pattern.permute.xlu1 %v7926_v4  ;;  %v5848_v29 = vpop.permute.xlu2 %673  ;;  %v1692_v7 = vpack.c.bf16 %v1631_v54, %v1630_v62  ;;  %v1504_v15 = vadd.f32 %v1440_v22, %v1119_v19  ;;  %v1162_v51 = vadd.f32 %v1098_v24, %v777_v48  ;;  %v1568_v21 = vadd.f32 %v5660_v12, %v1503_v49 }
 0x13c   : > { %864 = vperm.xlu1 %5194, %v5810_v53  }
 0x13d   : > { %v1632_v32 = vmax.f32 %v1568_v21, 0.0 }
 0x13f   : > { %1341 = vperm.xlu0 %5253, %v5855_v52  }
 0x140   : > { %v985_v23 = vpop.permute.xlu0 %984 }
 0x141   : > { %v1096_v33 = vmul.f32 %v5631_v56, %v985_v23  ;;  %5197 = vset.pattern.permute.xlu2 %v7923_v18 }
 0x142   : > { %v5870_v45 = vpop.permute.xlu1 %483  ;;  %563 = vperm.xlu2 %5197, %v5834_v44  }
 0x143   : > { %v1160_v26 = vadd.f32 %v1096_v33, %v775_v35  ;;  %v1569_v35 = vadd.f32 %v5660_v12, %v1504_v15  ;;  %v1483_v33 = vmul.f32 %v5638_v60, %v1378_v9  ;;  %v1548_v9 = vadd.f32 %v1484_v59, %v1163_v20 }
 0x144   : > { %5196 = vset.pattern.permute.xlu1 %v7923_v18  ;;  %v5880_v0 = vpop.permute.xlu2 %1385 }
 0x145   : > { %v1545_v10 = vadd.f32 %v1481_v16, %v1160_v26  ;;  %558 = vperm.xlu1 %5196, %v5709_v50   ;;  %4422 = vmatmul.msk.bf16.gmra.mxu0 %vm1755_vm0, %v1692_v7  ;;  %v736_v26 = vmul.f32 %v5633_v57, %v5678_v27  ;;  %v1633_v7 = vmax.f32 %v1569_v35, 0.0  ;;  %v1442_v27 = vmul.f32 %v5638_v60, %v5673_v28 }
 0x147   : > { %v1610_v62 = vadd.f32 %v5660_v12, %v1545_v10  ;;  %v735_v10 = vmul.f32 %v5633_v57, %v5629_v55  ;;  %v1121_v63 = vadd.f32 %v1057_v8, %v736_v26  ;;  %v1693_v61 = vpack.c.bf16 %v1633_v7, %v1632_v32 }
 0x148   : > { %v5892_v23 = vpop.permute.xlu0 %852  ;;  %v1059_v26 = vmul.f32 %v5631_v56, %v5838_v1 }
 0x149   : > { %v1674_v54 = vmax.f32 %v1610_v62, 0.0  ;;  %v1120_v31 = vadd.f32 %v1056_v39, %v735_v10  ;;  %v1506_v62 = vadd.f32 %v1442_v27, %v1121_v63  ;;  %v398_v39 = vld [vmem:[%s5464_s23 + $0x1c8] sm:$0xff] }
 0x14a   : > { %5199 = vset.pattern.permute.xlu2 %v7925_v6 }
 0x14b   : > { %v5901_v22 = vpop.permute.xlu1 %1233  ;;  %1249 = vperm.xlu2 %5199, %v5810_v53   ;;  %v1714_v36 = vpack.c.bf16 %v1675_v42, %v1674_v54  ;;  %v1547_v53 = vadd.f32 %v1483_v33, %v1162_v51  ;;  %v1505_v28 = vadd.f32 %v1441_v3, %v1120_v31  ;;  %v1571_v42 = vadd.f32 %v5660_v12, %v1506_v62 }
 0x14c   : > { %v1486_v33 = vmul.f32 %v5638_v60, %v5606_v47  ;;  %v737_v47 = vmul.f32 %v5633_v57, %v5688_v40  ;;  %v1444_v40 = vmul.f32 %v5638_v60, %v5693_v43 }
 0x14d   : > { %5198 = vset.pattern.permute.xlu1 %v7926_v4  ;;  %4444 = vmatmul.msk.bf16.vlgmr.msra.gmra.mxu3 %vm1755_vm0, %v1714_v36  ;;  %v5907_v16 = vpop.permute.xlu2 %493  ;;  %v1612_v15 = vadd.f32 %v5660_v12, %v1547_v53  ;;  %v1570_v35 = vadd.f32 %v5660_v12, %v1505_v28  ;;  %v780_v36 = vmul.f32 %v5633_v57, %v5848_v29  ;;  %v1635_v8 = vmax.f32 %v1571_v42, 0.0  ;;  %v5982_v42 = vld [vmem:[%s5464_s23 + $0x100] sm:$0xff] }
 0x14e   : > { %916 = vperm.xlu1 %5198, %v5834_v44   ;;  %v1613_v44 = vadd.f32 %v5660_v12, %v1548_v9  ;;  %v1058_v29 = vmul.f32 %v5631_v56, %v5682_v34  ;;  %v738_v53 = vmul.f32 %v5633_v57, %v5714_v58  ;;  %v1443_v34 = vmul.f32 %v5638_v60, %v5728_v2  ;;  %v397_v58 = vld [vmem:[%s5464_s23 + $0x1c0] sm:$0xff] }
 0x14f   : > { %v1676_v46 = vmax.f32 %v1612_v15, 0.0  ;;  %1305 = vperm.xlu0 %5253, %v5982_v42  }
 0x150   : > { %v1001_v19 = vpop.permute.xlu0 %1000  ;;  %v1677_v49 = vmax.f32 %v1613_v44, 0.0  ;;  %v1122_v27 = vadd.f32 %v1058_v29, %v737_v47 }
 0x151   : > { %v1100_v24 = vmul.f32 %v5631_v56, %v1001_v19  ;;  %v1123_v19 = vadd.f32 %v1059_v26, %v738_v53 }
 0x152   : > { %v1715_v48 = vpack.c.bf16 %v1677_v49, %v1676_v46  ;;  %v1507_v31 = vadd.f32 %v1443_v34, %v1122_v27  ;;  %v1447_v34 = vmul.f32 %v5638_v60, %v5901_v22 }
 0x153   : > { %1297 = vperm.xlu2 %5199, %v5709_v50   ;;  %v1508_v15 = vadd.f32 %v1444_v40, %v1123_v19 }
 0x154   : > { %v669_v38 = vpop.permute.xlu1 %668  ;;  %v1572_v2 = vadd.f32 %v5660_v12, %v1507_v31 }
 0x155   : > { %4423 = vmatmul.msk.bf16.gmra.mxu0 %vm1755_vm0, %v1693_v61  ;;  %v779_v54 = vmul.f32 %v5633_v57, %v669_v38  ;;  %v1573_v43 = vadd.f32 %v5660_v12, %v1508_v15  ;;  %v6028_v15 = vld [vmem:[%s5464_s23 + $0xa8] sm:$0xff] }
 0x156   : > { %5200 = vset.pattern.permute.xlu1 %v7925_v6  ;;  %v5927_v55 = vpop.permute.xlu2 %860 }
 0x157   : > { %1253 = vperm.xlu1 %5200, %v5548_v25   ;;  %v1485_v25 = vmul.f32 %v5638_v60, %v5880_v0  ;;  %v1164_v20 = vadd.f32 %v1100_v24, %v779_v54  ;;  %v1634_v0 = vmax.f32 %v1570_v35, 0.0  ;;  %v1637_v24 = vmax.f32 %v1573_v43, 0.0 }
 0x158   : > { %v5932_v50 = vpop.permute.xlu0 %1008  ;;  %v740_v35 = vmul.f32 %v5633_v57, %v5736_v5 }
 0x159   : > { %v1549_v7 = vadd.f32 %v1485_v25, %v1164_v20  ;;  %v1694_v32 = vpack.c.bf16 %v1635_v8, %v1634_v0  ;;  %v1060_v25 = vmul.f32 %v5631_v56, %v5781_v13  ;;  %v1636_v20 = vmax.f32 %v1572_v2, 0.0 }
 0x15a   : > { %v1063_v8 = vmul.f32 %v5631_v56, %v5892_v23  ;;  %v1448_v23 = vmul.f32 %v5638_v60, %v5826_v37 }
 0x15b   : > { %5202 = vset.pattern.permute.xlu2 %v7923_v18  ;;  %v1614_v3 = vadd.f32 %v5660_v12, %v1549_v7  ;;  %v742_v7 = vmul.f32 %v5633_v57, %v5870_v45 }
 0x15c   : > { %613 = vperm.xlu2 %5202, %v5855_v52  }
 0x15d   : > { %v1005_v59 = vpop.permute.xlu1 %1004  ;;  %4445 = vmatmul.msk.bf16.gmra.mxu3 %vm1755_vm0, %v1715_v48  ;;  %v1678_v62 = vmax.f32 %v1614_v3, 0.0  ;;  %v1061_v48 = vmul.f32 %v5631_v56, %v5749_v14 }
 0x15e   : > { %v1101_v51 = vmul.f32 %v5631_v56, %v1005_v59  ;;  %v5946_v21 = vpop.permute.xlu2 %904  ;;  %v739_v59 = vmul.f32 %v5633_v57, %v5769_v30 }
 0x15f   : > { %5201 = vset.pattern.permute.xlu1 %v7923_v18  ;;  %v1125_v5 = vadd.f32 %v1061_v48, %v740_v35  ;;  %v1076_v22 = vmul.f32 %v5631_v56, %v5946_v21  ;;  %v6043_v35 = vld [vmem:[%s5464_s23 + $0x150] sm:$0xff] }
 0x160   : > { %v1165_v9 = vadd.f32 %v1101_v51, %v780_v36  ;;  %608 = vperm.xlu1 %5201, %v5723_v11   ;;  %v5959_v10 = vpop.permute.xlu0 %912  ;;  %v1695_v36 = vpack.c.bf16 %v1637_v24, %v1636_v20  ;;  %v1445_v51 = vmul.f32 %v5638_v60, %v5590_v41  ;;  %v1124_v26 = vadd.f32 %v1060_v25, %v739_v59  ;;  %v7931_v59 = vld [vmem:[#allocation9_spill] sm:$0xff] }
 0x161   : > { %1345 = vperm.xlu0 %5253, %v6043_v35  }
 0x162   : > { %v1550_v1 = vadd.f32 %v1486_v33, %v1165_v9  ;;  %v1446_v33 = vmul.f32 %v5638_v60, %v5795_v17  ;;  %v1509_v0 = vadd.f32 %v1445_v51, %v1124_v26  ;;  %v7928_v9 = vld [vmem:[#allocation7_spill] sm:$0xff] }
 0x163   : > { %v741_v47 = vmul.f32 %v5633_v57, %v7928_v9 }
 0x164   : > { %693 = vperm.xlu2 %5202, %v398_v39   ;;  %v1615_v63 = vadd.f32 %v5660_v12, %v1550_v1  ;;  %v1510_v14 = vadd.f32 %v1446_v33, %v1125_v5  ;;  %v1574_v41 = vadd.f32 %v5660_v12, %v1509_v0  ;;  %v1065_v0 = vmul.f32 %v5631_v56, %v5927_v55 }
 0x165   : > { %4424 = vmatmul.msk.bf16.gmra.mxu0 %vm1755_vm0, %v1694_v32 }
 0x166   : > { %v5969_v44 = vpop.permute.xlu1 %488  ;;  %v1679_v61 = vmax.f32 %v1615_v63, 0.0  ;;  %v1575_v17 = vadd.f32 %v5660_v12, %v1510_v14  ;;  %v1638_v19 = vmax.f32 %v1574_v41, 0.0 }
 0x167   : > { %v5971_v38 = vpop.permute.xlu2 %1241 }
 0x168   : > { %688 = vperm.xlu1 %5201, %v397_v58   ;;  %v1716_v28 = vpack.c.bf16 %v1679_v61, %v1678_v62  ;;  %v5977_v46 = vpop.permute.xlu0 %952  ;;  %v1639_v53 = vmax.f32 %v1575_v17, 0.0  ;;  %v743_v17 = vmul.f32 %v5633_v57, %v5969_v44 }
 0x16a   : > { %v1696_v3 = vpack.c.bf16 %v1639_v53, %v1638_v19 }
 0x16c   : > { %5204 = vset.pattern.permute.xlu2 %v7926_v4 }
 0x16d   : > { %1016 = vperm.xlu2 %5204, %v397_v58   ;;  %4446 = vmatmul.msk.bf16.gmra.mxu3 %vm1755_vm0, %v1716_v28 }
 0x16f   : > { %v5979_v49 = vpop.permute.xlu1 %856  ;;  %v1294_v54 = vpop.permute.xlu2 %1293 }
 0x170   : > { %5203 = vset.pattern.permute.xlu1 %v7926_v4  ;;  %v6002_v13 = vpop.permute.xlu0 %872  ;;  %v1462_v61 = vmul.f32 %v5638_v60, %v1294_v54  ;;  %v1064_v51 = vmul.f32 %v5631_v56, %v5979_v49  ;;  %v1449_v49 = vmul.f32 %v5638_v60, %v5971_v38 }
 0x171   : > { %956 = vperm.xlu1 %5203, %v5855_v52  }
 0x172   : > { %v1128_v9 = vadd.f32 %v1064_v51, %v743_v17 }
 0x174   : > { %v1513_v38 = vadd.f32 %v1449_v49, %v1128_v9 }
 0x175   : > { %5205 = vset.pattern.permute.xlu2 %v7925_v6  ;;  %4425 = vmatmul.msk.bf16.gmra.mxu0 %vm1755_vm0, %v1695_v36 }
 0x176   : > { %1337 = vperm.xlu2 %5205, %v5723_v11   ;;  %v7929_v11 = vld [vmem:[#allocation18_spill] sm:$0xff]  ;;  %v1578_v19 = vadd.f32 %v5660_v12, %v1513_v38 }
 0x177   : > { %v1062_v29 = vmul.f32 %v5631_v56, %v7929_v11 }
 0x178   : > { %v554_v52 = vpop.permute.xlu1 %553  ;;  %v6004_v30 = vpop.permute.xlu2 %683 }
 0x179   : > { %1020 = vperm.xlu1 %5203, %v398_v39   ;;  %v6022_v27 = vpop.permute.xlu0 %924  ;;  %v1126_v40 = vadd.f32 %v1062_v29, %v741_v47  ;;  %v756_v45 = vmul.f32 %v5633_v57, %v554_v52  ;;  %v744_v52 = vmul.f32 %v5633_v57, %v5907_v16  ;;  %v7932_v16 = vld [vmem:[#allocation6_spill] sm:$0xff] }
 0x17a   : > { %v1450_v55 = vmul.f32 %v5638_v60, %v7932_v16 }
 0x17b   : > { %v1511_v28 = vadd.f32 %v1447_v34, %v1126_v40  ;;  %v7933_v34 = vld [vmem:[#allocation11_spill] sm:$0xff] }
 0x17d   : > { %v1576_v48 = vadd.f32 %v5660_v12, %v1511_v28 }
 0x17e   : > { %1405 = vperm.xlu2 %5205, %v398_v39   ;;  %v1127_v39 = vadd.f32 %v1063_v8, %v742_v7  ;;  %v1129_v7 = vadd.f32 %v1065_v0, %v744_v52  ;;  %v1078_v0 = vmul.f32 %v5631_v56, %v5959_v10 }
 0x17f   : > { %v1640_v26 = vmax.f32 %v1576_v48, 0.0 }
 0x180   : > { %v1512_v37 = vadd.f32 %v1448_v23, %v1127_v39  ;;  %v1102_v23 = vmul.f32 %v5631_v56, %v5932_v50 }
 0x181   : > { %5206 = vset.pattern.permute.xlu1 %v7925_v6  ;;  %v909_v1 = vpop.permute.xlu1 %908  ;;  %v6017_v32 = vpop.permute.xlu2 %1393 }
 0x182   : > { %v1077_v63 = vmul.f32 %v5631_v56, %v909_v1  ;;  %1401 = vperm.xlu1 %5206, %v397_v58   ;;  %v7930_v58 = vld [vmem:[#allocation8_spill] sm:$0xff]  ;;  %v1577_v54 = vadd.f32 %v5660_v12, %v1512_v37  ;;  %v6049_v21 = vpop.permute.xlu0 %928  ;;  %v1514_v1 = vadd.f32 %v1450_v55, %v1129_v7 }
 0x183   : > { %v755_v62 = vmul.f32 %v5633_v57, %v7930_v58 }
 0x184   : > { %v1141_v31 = vadd.f32 %v1077_v63, %v756_v45  ;;  %v1641_v14 = vmax.f32 %v1577_v54, 0.0  ;;  %v1579_v45 = vadd.f32 %v5660_v12, %v1514_v1  ;;  %v5261_v1 = vld [vmem:[%s5464_s23 + $0x1d8] sm:$0xff] }
 0x185   : > { %4426 = vmatmul.msk.bf16.gmra.mxu0 %vm1755_vm0, %v1696_v3  ;;  %v1140_v25 = vadd.f32 %v1076_v22, %v755_v62  ;;  %v1642_v3 = vmax.f32 %v1578_v19, 0.0  ;;  %v782_v62 = vmul.f32 %v5633_v57, %v6004_v30 }
 0x186   : > { %5208 = vset.pattern.permute.xlu2 %v7923_v18  ;;  %v1526_v43 = vadd.f32 %v1462_v61, %v1141_v31  ;;  %v1697_v29 = vpack.c.bf16 %v1641_v14, %v1640_v26  ;;  %v1643_v50 = vmax.f32 %v1579_v45, 0.0 }
 0x187   : > { %513 = vperm.xlu2 %5208, %v6028_v15  }
 0x188   : > { %v1591_v36 = vadd.f32 %v5660_v12, %v1526_v43  ;;  %v1698_v58 = vpack.c.bf16 %v1643_v50, %v1642_v3 }
 0x18a   : > { %5207 = vset.pattern.permute.xlu1 %v7923_v18  ;;  %v1290_v2 = vpop.permute.xlu1 %1289  ;;  %v6039_v24 = vpop.permute.xlu2 %498  ;;  %v1655_v8 = vmax.f32 %v1591_v36, 0.0 }
 0x18b   : > { %v1461_v20 = vmul.f32 %v5638_v60, %v1290_v2  ;;  %508 = vperm.xlu1 %5207, %v7931_v59   ;;  %v6072_v44 = vpop.permute.xlu0 %968  ;;  %v745_v7 = vmul.f32 %v5633_v57, %v6039_v24  ;;  %v6137_v24 = vld [vmem:[%s5464_s23 + $0x118] sm:$0xff] }
 0x18c   : > { %1317 = vperm.xlu0 %5253, %v6137_v24  }
 0x18d   : > { %v1525_v33 = vadd.f32 %v1461_v20, %v1140_v25 }
 0x18f   : > { %v1590_v5 = vadd.f32 %v5660_v12, %v1525_v33  ;;  %568 = vperm.xlu2 %5208, %v5982_v42  }
 0x191   : > { %v1654_v41 = vmax.f32 %v1590_v5, 0.0  ;;  %v384_v5 = vld [vmem:[%s5464_s23 + $0x158] sm:$0xff] }
 0x193   : > { %5209 = vset.pattern.permute.xlu1 %v7926_v4  ;;  %v679_v47 = vpop.permute.xlu1 %678  ;;  %v1704_v11 = vpack.c.bf16 %v1655_v8, %v1654_v41  ;;  %v6065_v53 = vpop.permute.xlu2 %868 }
 0x194   : > { %876 = vperm.xlu1 %5209, %v6028_v15   ;;  %v781_v39 = vmul.f32 %v5633_v57, %v679_v47  ;;  %v6086_v31 = vpop.permute.xlu0 %888 }
 0x195   : > { %4434 = vmatmul.msk.bf16.vlgmr.msra.gmra.mxu1 %vm1755_vm0, %v1704_v11  ;;  %4427 = vmatmul.msk.bf16.gmra.mxu0 %vm1755_vm0, %v1697_v29 }
 0x196   : > { %v1166_v61 = vadd.f32 %v1102_v23, %v781_v39 }
 0x197   : > { %5211 = vset.pattern.permute.xlu2 %v7926_v4 }
 0x198   : > { %920 = vperm.xlu2 %5211, %v5982_v42   ;;  %v1487_v42 = vmul.f32 %v5638_v60, %v6017_v32 }
 0x19a   : > { %v1551_v28 = vadd.f32 %v1487_v42, %v1166_v61 }
 0x19c   : > { %5210 = vset.pattern.permute.xlu1 %v7923_v18  ;;  %v1013_v63 = vpop.permute.xlu1 %1012  ;;  %v564_v40 = vpop.permute.xlu2 %563  ;;  %v1616_v54 = vadd.f32 %v5660_v12, %v1551_v28 }
 0x19d   : > { %573 = vperm.xlu1 %5210, %v7933_v34   ;;  %v1103_v37 = vmul.f32 %v5631_v56, %v1013_v63  ;;  %v6100_v48 = vpop.permute.xlu0 %940  ;;  %v758_v10 = vmul.f32 %v5633_v57, %v564_v40  ;;  %v7934_v63 = vld [vmem:[#allocation10_spill] sm:$0xff] }
 0x19e   : > { %v1680_v20 = vmax.f32 %v1616_v54, 0.0  ;;  %v746_v40 = vmul.f32 %v5633_v57, %v7934_v63 }
 0x19f   : > { %v1167_v43 = vadd.f32 %v1103_v37, %v782_v62 }
 0x1a0   : > { %5213 = vset.pattern.permute.xlu2 %v7925_v6 }
 0x1a1   : > { %1261 = vperm.xlu2 %5213, %v6028_v15  }
 0x1a5   : > { %5212 = vset.pattern.permute.xlu1 %v7925_v6  ;;  %v1398_v22 = vpop.permute.xlu1 %1397  ;;  %4428 = vmatmul.msk.bf16.gmra.mxu0 %vm1755_vm0, %v1698_v58  ;;  %v1250_v32 = vpop.permute.xlu2 %1249 }
 0x1a6   : > { %v1488_v2 = vmul.f32 %v5638_v60, %v1398_v22  ;;  %1257 = vperm.xlu1 %5212, %v7931_v59   ;;  %v399_v59 = vld [vmem:[%s5464_s23 + $0x1d0] sm:$0xff]  ;;  %v6106_v26 = vpop.permute.xlu0 %944  ;;  %v1451_v19 = vmul.f32 %v5638_v60, %v1250_v32 }
 0x1a8   : > { %v1552_v15 = vadd.f32 %v1488_v2, %v1167_v43 }
 0x1a9   : > { %5214 = vset.pattern.permute.xlu2 %v7923_v18 }
 0x1aa   : > { %v1617_v30 = vadd.f32 %v5660_v12, %v1552_v15  ;;  %618 = vperm.xlu2 %5214, %v6043_v35  }
 0x1ac   : > { %v1681_v25 = vmax.f32 %v1617_v30, 0.0 }
 0x1ad   : > { %v1298_v33 = vpop.permute.xlu2 %1297 }
 0x1ae   : > { %1309 = vperm.xlu1 %5212, %v7933_v34   ;;  %v865_v36 = vpop.permute.xlu1 %864  ;;  %v1717_v51 = vpack.c.bf16 %v1681_v25, %v1680_v20  ;;  %v1463_v41 = vmul.f32 %v5638_v60, %v1298_v33  ;;  %v1302_v9 = vpop.permute.xlu0 %1301  ;;  %v1067_v34 = vmul.f32 %v5631_v56, %v6065_v53  ;;  %v363_v25 = vld [vmem:[%s5464_s23 + $0xb0] sm:$0xff] }
 0x1af   : > { %v1066_v47 = vmul.f32 %v5631_v56, %v865_v36  ;;  %v1464_v55 = vmul.f32 %v5638_v60, %v1302_v9 }
 0x1b0   : > { %4447 = vmatmul.msk.bf16.gmra.mxu3 %vm1755_vm0, %v1717_v51  ;;  %v1131_v58 = vadd.f32 %v1067_v34, %v746_v40  ;;  %v5262_v51 = vld [vmem:[%s5464_s23 + $0xb8] sm:$0xff] }
 0x1b1   : > { %v1130_v23 = vadd.f32 %v1066_v47, %v745_v7  ;;  %v7935_v7 = vld [vmem:[#allocation13_spill] sm:$0xff] }
 0x1b2   : > { %698 = vperm.xlu2 %5214, %v399_v59  }
 0x1b3   : > { %v1515_v42 = vadd.f32 %v1451_v19, %v1130_v23 }
 0x1b5   : > { %v1580_v22 = vadd.f32 %v5660_v12, %v1515_v42 }
 0x1b6   : > { %5215 = vset.pattern.permute.xlu1 %v7923_v18  ;;  %v6109_v14 = vpop.permute.xlu2 %613 }
 0x1b7   : > { %623 = vperm.xlu1 %5215, %v384_v5   ;;  %v559_v52 = vpop.permute.xlu1 %558  ;;  %v1644_v15 = vmax.f32 %v1580_v22, 0.0 }
 0x1b8   : > { %v757_v17 = vmul.f32 %v5633_v57, %v559_v52  ;;  %v6156_v52 = vld [vmem:[%s5464_s23 + $0x168] sm:$0xff] }
 0x1b9   : > { %1357 = vperm.xlu0 %5253, %v6156_v52  }
 0x1ba   : > { %5217 = vset.pattern.permute.xlu2 %v7926_v4  ;;  %v1142_v8 = vadd.f32 %v1078_v0, %v757_v17  ;;  %v1342_v0 = vpop.permute.xlu0 %1341 }
 0x1bb   : > { %964 = vperm.xlu2 %5217, %v384_v5   ;;  %v1474_v47 = vmul.f32 %v5638_v60, %v1342_v0 }
 0x1bc   : > { %v1527_v29 = vadd.f32 %v1463_v41, %v1142_v8  ;;  %v768_v41 = vmul.f32 %v5633_v57, %v6109_v14 }
 0x1be   : > { %v6116_v49 = vpop.permute.xlu2 %693 }
 0x1bf   : > { %5216 = vset.pattern.permute.xlu1 %v7926_v4 }
 0x1c0   : > { %960 = vperm.xlu1 %5216, %v6043_v35   ;;  %v917_v11 = vpop.permute.xlu1 %916  ;;  %v1592_v35 = vadd.f32 %v5660_v12, %v1527_v29 }
 0x1c1   : > { %v1079_v16 = vmul.f32 %v5631_v56, %v917_v11 }
 0x1c2   : > { %v1656_v37 = vmax.f32 %v1592_v35, 0.0 }
 0x1c3   : > { %v1143_v38 = vadd.f32 %v1079_v16, %v758_v10  ;;  %1028 = vperm.xlu2 %5217, %v5261_v1   ;;  %v6171_v10 = vld [vmem:[%s7893_s7] ss:$0 sm:$0xff] }
 0x1c5   : > { %v1528_v39 = vadd.f32 %v1464_v55, %v1143_v38 }
 0x1c7   : > { %v1593_v45 = vadd.f32 %v5660_v12, %v1528_v39  ;;  %v6134_v3 = vpop.permute.xlu2 %1016  ;;  %v784_v39 = vmul.f32 %v5633_v57, %v6116_v49 }
 0x1c8   : > { %1024 = vperm.xlu1 %5216, %v399_v59   ;;  %v1104_v34 = vmul.f32 %v5631_v56, %v6134_v3 }
 0x1c9   : > { %v1657_v61 = vmax.f32 %v1593_v45, 0.0  ;;  %v1254_v50 = vpop.permute.xlu1 %1253 }
 0x1ca   : > { %v1452_v62 = vmul.f32 %v5638_v60, %v1254_v50 }
 0x1cb   : > { %5219 = vset.pattern.permute.xlu2 %v7925_v6  ;;  %v1705_v53 = vpack.c.bf16 %v1657_v61, %v1656_v37 }
 0x1cc   : > { %v1516_v28 = vadd.f32 %v1452_v62, %v1131_v58  ;;  %1409 = vperm.xlu2 %5219, %v399_v59  }
 0x1cd   : > { %4435 = vmatmul.msk.bf16.gmra.mxu1 %vm1755_vm0, %v1705_v53 }
 0x1ce   : > { %v1581_v32 = vadd.f32 %v5660_v12, %v1516_v28  ;;  %v1088_v12 = vmul.f32 %v5631_v56, %v5977_v46 }
 0x1d0   : > { %v1645_v43 = vmax.f32 %v1581_v32, 0.0  ;;  %5218 = vset.pattern.permute.xlu1 %v7925_v6  ;;  %v1338_v2 = vpop.permute.xlu2 %1337 }
 0x1d1   : > { %1349 = vperm.xlu1 %5218, %v384_v5   ;;  %v1473_v5 = vmul.f32 %v5638_v60, %v1338_v2  ;;  %v7936_v2 = vld [vmem:[#allocation15_spill] sm:$0xff] }
 0x1d2   : > { %v609_v54 = vpop.permute.xlu1 %608  ;;  %v1699_v30 = vpack.c.bf16 %v1645_v43, %v1644_v15 }
 0x1d3   : > { %v767_v36 = vmul.f32 %v5633_v57, %v609_v54  ;;  %v402_v54 = vld [vmem:[%s5464_s23 + $0x1e8] sm:$0xff] }
 0x1d4   : > { %4429 = vmatmul.msk.bf16.gmra.mxu0 %vm1755_vm0, %v1699_v30  ;;  %5220 = vset.pattern.permute.xlu2 %v7923_v18  ;;  %v401_v30 = vld [vmem:[%s5464_s23 + $0x1e0] sm:$0xff] }
 0x1d5   : > { %518 = vperm.xlu2 %5220, %v363_v25   ;;  %v1152_v59 = vadd.f32 %v1088_v12, %v767_v36 }
 0x1d7   : > { %v1537_v8 = vadd.f32 %v1473_v5, %v1152_v59  ;;  %v6210_v59 = vld [vmem:[%s5464_s23 + $0x120] sm:$0xff]  ;;  %v1068_v5 = vmul.f32 %v5631_v56, %v6002_v13 }
 0x1d8   : > { %v1406_v20 = vpop.permute.xlu2 %1405  ;;  %1321 = vperm.xlu0 %5253, %v6210_v59  }
 0x1d9   : > { %1413 = vperm.xlu1 %5218, %v5261_v1   ;;  %v1602_v29 = vadd.f32 %v6171_v10, %v1537_v8  ;;  %v1490_v63 = vmul.f32 %v5638_v60, %v1406_v20 }
 0x1da   : > { %v689_v33 = vpop.permute.xlu1 %688 }
 0x1db   : > { %v1666_v1 = vmax.f32 %v1602_v29, 0.0  ;;  %v783_v45 = vmul.f32 %v5633_v57, %v689_v33 }
 0x1dd   : > { %5222 = vset.pattern.permute.xlu2 %v7926_v4  ;;  %v1168_v50 = vadd.f32 %v1104_v34, %v783_v45 }
 0x1de   : > { %884 = vperm.xlu2 %5222, %v5262_v51  }
 0x1e1   : > { %5221 = vset.pattern.permute.xlu1 %v7926_v4  ;;  %v6159_v17 = vpop.permute.xlu2 %513 }
 0x1e2   : > { %880 = vperm.xlu1 %5221, %v363_v25   ;;  %v748_v12 = vmul.f32 %v5633_v57, %v6159_v17 }
 0x1e3   : > { %v957_v46 = vpop.permute.xlu1 %956 }
 0x1e4   : > { %v1089_v9 = vmul.f32 %v5631_v56, %v957_v46 }
 0x1e6   : > { %v1153_v11 = vadd.f32 %v1089_v9, %v768_v41  ;;  %5224 = vset.pattern.permute.xlu2 %v7923_v18  ;;  %v1306_v9 = vpop.permute.xlu0 %1305 }
 0x1e7   : > { %583 = vperm.xlu2 %5224, %v6137_v24  }
 0x1e8   : > { %v1538_v16 = vadd.f32 %v1474_v47, %v1153_v11 }
 0x1e9   : > { %v569_v55 = vpop.permute.xlu2 %568 }
 0x1ea   : > { %v1603_v14 = vadd.f32 %v6171_v10, %v1538_v16  ;;  %5223 = vset.pattern.permute.xlu1 %v7923_v18  ;;  %v759_v17 = vmul.f32 %v5633_v57, %v569_v55  ;;  %v1465_v16 = vmul.f32 %v5638_v60, %v1306_v9 }
 0x1eb   : > { %578 = vperm.xlu1 %5223, %v7935_v7   ;;  %v1021_v38 = vpop.permute.xlu1 %1020 }
 0x1ec   : > { %v1667_v19 = vmax.f32 %v1603_v14, 0.0  ;;  %v1105_v23 = vmul.f32 %v5631_v56, %v1021_v38 }
 0x1ee   : > { %v1710_v35 = vpack.c.bf16 %v1667_v19, %v1666_v1  ;;  %v1169_v40 = vadd.f32 %v1105_v23, %v784_v39 }
 0x1ef   : > { %5226 = vset.pattern.permute.xlu2 %v7925_v6 }
 0x1f0   : > { %4440 = vmatmul.msk.bf16.vlgmr.msra.gmra.mxu2 %vm1755_vm0, %v1710_v35  ;;  %1265 = vperm.xlu2 %5226, %v363_v25   ;;  %v1554_v61 = vadd.f32 %v1490_v63, %v1169_v40 }
 0x1f2   : > { %v921_v42 = vpop.permute.xlu2 %920  ;;  %v1619_v62 = vadd.f32 %v6171_v10, %v1554_v61 }
 0x1f3   : > { %5225 = vset.pattern.permute.xlu1 %v7926_v4  ;;  %v1080_v41 = vmul.f32 %v5631_v56, %v921_v42 }
 0x1f4   : > { %932 = vperm.xlu1 %5225, %v6137_v24   ;;  %v1402_v49 = vpop.permute.xlu1 %1401  ;;  %v1683_v22 = vmax.f32 %v1619_v62, 0.0  ;;  %v366_v62 = vld [vmem:[%s5464_s23 + $0xc8] sm:$0xff] }
 0x1f5   : > { %v1489_v37 = vmul.f32 %v5638_v60, %v1402_v49  ;;  %v1144_v29 = vadd.f32 %v1080_v41, %v759_v17 }
 0x1f7   : > { %v1553_v58 = vadd.f32 %v1489_v37, %v1168_v50  ;;  %v1529_v19 = vadd.f32 %v1465_v16, %v1144_v29 }
 0x1f8   : > { %1313 = vperm.xlu2 %5226, %v7935_v7   ;;  %v1081_v7 = vmul.f32 %v5631_v56, %v6022_v27 }
 0x1f9   : > { %v1618_v3 = vadd.f32 %v6171_v10, %v1553_v58  ;;  %v1594_v45 = vadd.f32 %v6171_v10, %v1529_v19 }
 0x1fb   : > { %v1682_v53 = vmax.f32 %v1618_v3, 0.0  ;;  %v1262_v28 = vpop.permute.xlu2 %1261  ;;  %v1658_v49 = vmax.f32 %v1594_v45, 0.0  ;;  %v4966_v45 = vld [vmem:[%s7889_s3 + $0xcc] sm:$0xf] }
 0x1fc   : > { %5227 = vset.pattern.permute.xlu1 %v7925_v6  ;;  %v1454_v36 = vmul.f32 %v5638_v60, %v1262_v28  ;;  %v5264_v28 = vld [vmem:[%s5464_s23 + $0xc0] sm:$0xff] }
 0x1fd   : > { %1269 = vperm.xlu1 %5227, %v5262_v51   ;;  %v509_v24 = vpop.permute.xlu1 %508  ;;  %v1718_v32 = vpack.c.bf16 %v1683_v22, %v1682_v53  ;;  %v6244_v53 = vld [vmem:[%s5464_s23 + $0x170] sm:$0xff] }
 0x1fe   : > { %v747_v0 = vmul.f32 %v5633_v57, %v509_v24  ;;  %1361 = vperm.xlu0 %5253, %v6244_v53   ;;  %v4970_v24 = vld [vmem:[%s7889_s3 + $0xec] sm:$0xf] }
 0x1ff   : > { %4448 = vmatmul.msk.bf16.gmra.mxu3 %vm1755_vm0, %v1718_v32  ;;  %v4577_v32 = vld [vmem:[%s7889_s3 + $0xf8] sm:$0xf0] }
 0x200   : > { %5229 = vset.pattern.permute.xlu2 %v7923_v18  ;;  %v1132_v11 = vadd.f32 %v1068_v5, %v747_v0 }
 0x201   : > { %633 = vperm.xlu2 %5229, %v6156_v52  }
 0x204   : > { %v6196_v43 = vpop.permute.xlu2 %618 }
 0x205   : > { %5228 = vset.pattern.permute.xlu1 %v7923_v18 }
 0x206   : > { %628 = vperm.xlu1 %5228, %v7936_v2   ;;  %v877_v15 = vpop.permute.xlu1 %876 }
 0x207   : > { %v1069_v20 = vmul.f32 %v5631_v56, %v877_v15 }
 0x209   : > { %713 = vperm.xlu2 %5229, %v402_v54   ;;  %v1133_v51 = vadd.f32 %v1069_v20, %v748_v12  ;;  %v1346_v20 = vpop.permute.xlu0 %1345 }
 0x20b   : > { %v1518_v8 = vadd.f32 %v1454_v36, %v1133_v51  ;;  %v1475_v36 = vmul.f32 %v5638_v60, %v1346_v20 }
 0x20c   : > { %v6202_v25 = vpop.permute.xlu2 %698 }
 0x20d   : > { %v1583_v55 = vadd.f32 %v6171_v10, %v1518_v8  ;;  %v5265_v8 = vld [vmem:[%s5464_s23 + $0x128] sm:$0xff]  ;;  %v785_v9 = vmul.f32 %v5633_v57, %v6202_v25 }
 0x20e   : > { %708 = vperm.xlu1 %5228, %v401_v30  }
 0x20f   : > { %v574_v33 = vpop.permute.xlu1 %573  ;;  %v1647_v39 = vmax.f32 %v1583_v55, 0.0 }
 0x211   : > { %5231 = vset.pattern.permute.xlu2 %v7926_v4 }
 0x212   : > { %1032 = vperm.xlu2 %5231, %v401_v30  }
 0x215   : > { %v6215_v46 = vpop.permute.xlu2 %964 }
 0x216   : > { %5230 = vset.pattern.permute.xlu1 %v7926_v4  ;;  %v1091_v51 = vmul.f32 %v5631_v56, %v6215_v46 }
 0x217   : > { %972 = vperm.xlu1 %5230, %v6156_v52   ;;  %v760_v52 = vmul.f32 %v5633_v57, %v574_v33  ;;  %v769_v33 = vmul.f32 %v5633_v57, %v6196_v43  ;;  %v6273_v43 = vld [vmem:[%s5464_s23 + $0x138] sm:$0xff] }
 0x218   : > { %v1258_v47 = vpop.permute.xlu1 %1257  ;;  %1333 = vperm.xlu0 %5253, %v6273_v43  }
 0x219   : > { %v1453_v13 = vmul.f32 %v5638_v60, %v1258_v47  ;;  %v1145_v63 = vadd.f32 %v1081_v7, %v760_v52  ;;  %v7937_v7 = vld [vmem:[#allocation12_spill] sm:$0xff] }
 0x21a   : > { %5232 = vset.pattern.permute.xlu2 %v7925_v6  ;;  %v786_v25 = vmul.f32 %v5633_v57, %v7937_v7  ;;  %v7938_v7 = vld [vmem:[#allocation14_spill] sm:$0xff] }
 0x21b   : > { %v1517_v14 = vadd.f32 %v1453_v13, %v1132_v11  ;;  %1353 = vperm.xlu2 %5232, %v7936_v2   ;;  %v4580_v2 = vor.u32 %v4970_v24, %v4577_v32 }
 0x21d   : > { %v1582_v38 = vadd.f32 %v6171_v10, %v1517_v14  ;;  %v6231_v1 = vpop.permute.xlu2 %1028  ;;  %2827 = vmatpush.bf16.msrb.mxu0 %v4580_v2 }
 0x21e   : > { %v1107_v14 = vmul.f32 %v5631_v56, %v6231_v1 }
 0x21f   : > { %v1646_v23 = vmax.f32 %v1582_v38, 0.0  ;;  %1036 = vperm.xlu1 %5230, %v402_v54  }
 0x220   : > { %v1310_v35 = vpop.permute.xlu1 %1309 }
 0x221   : > { %v1466_v40 = vmul.f32 %v5638_v60, %v1310_v35  ;;  %v1700_v34 = vpack.c.bf16 %v1647_v39, %v1646_v23  ;;  %v1171_v35 = vadd.f32 %v1107_v14, %v786_v25 }
 0x223   : > { %v1530_v42 = vadd.f32 %v1466_v40, %v1145_v63  ;;  %4430 = vmatmul.msk.bf16.gmra.mxu0 %vm1755_vm0, %v1700_v34  ;;  %1421 = vperm.xlu2 %5232, %v402_v54  }
 0x225   : > { %v1595_v27 = vadd.f32 %v6171_v10, %v1530_v42  ;;  %v4561_v42 = vld [vmem:[%s7889_s3 + $0xd8] sm:$0xf0] }
 0x226   : > { %v1410_v61 = vpop.permute.xlu2 %1409 }
 0x227   : > { %v1659_v50 = vmax.f32 %v1595_v27, 0.0  ;;  %5233 = vset.pattern.permute.xlu1 %v7925_v6  ;;  %v1491_v11 = vmul.f32 %v5638_v60, %v1410_v61  ;;  %v4564_v61 = vor.u32 %v4966_v45, %v4561_v42  ;;  %v367_v42 = vld [vmem:[%s5464_s23 + $0xd0] sm:$0xff] }
 0x228   : > { %1417 = vperm.xlu1 %5233, %v401_v30  }
 0x229   : > { %v624_v37 = vpop.permute.xlu1 %623  ;;  %v1706_v58 = vpack.c.bf16 %v1659_v50, %v1658_v49  ;;  %2828 = vmatpush.bf16.msrb.mxu0 %v4564_v61 }
 0x22a   : > { %v770_v5 = vmul.f32 %v5633_v57, %v624_v37 }
 0x22b   : > { %4436 = vmatmul.msk.bf16.gmra.mxu1 %vm1755_vm0, %v1706_v58  ;;  %5235 = vset.pattern.permute.xlu2 %v7923_v18 }
 0x22c   : > { %533 = vperm.xlu2 %5235, %v366_v62   ;;  %v1155_v46 = vadd.f32 %v1091_v51, %v770_v5 }
 0x22f   : > { %v6241_v3 = vpop.permute.xlu2 %518 }
 0x230   : > { %5234 = vset.pattern.permute.xlu1 %v7923_v18 }
 0x231   : > { %528 = vperm.xlu1 %5234, %v5264_v28  }
 0x232   : > { %v961_v22 = vpop.permute.xlu1 %960 }
 0x233   : > { %v1090_v54 = vmul.f32 %v5631_v56, %v961_v22  ;;  %v388_v22 = vld [vmem:[%s5464_s23 + $0x178] sm:$0xff] }
 0x234   : > { %588 = vperm.xlu2 %5235, %v6210_v59  }
 0x235   : > { %v1154_v12 = vadd.f32 %v1090_v54, %v769_v33  ;;  %v1082_v54 = vmul.f32 %v5631_v56, %v6049_v21 }
 0x237   : > { %v1539_v17 = vadd.f32 %v1475_v36, %v1154_v12  ;;  %v1318_v12 = vpop.permute.xlu0 %1317 }
 0x238   : > { %v6256_v15 = vpop.permute.xlu2 %884 }
 0x239   : > { %5236 = vset.pattern.permute.xlu1 %v7926_v4  ;;  %v1604_v13 = vadd.f32 %v6171_v10, %v1539_v17 }
 0x23a   : > { %892 = vperm.xlu1 %5236, %v366_v62   ;;  %v1025_v30 = vpop.permute.xlu1 %1024 }
 0x23b   : > { %v1106_v41 = vmul.f32 %v5631_v56, %v1025_v30  ;;  %v1668_v52 = vmax.f32 %v1604_v13, 0.0 }
 0x23c   : > { %5238 = vset.pattern.permute.xlu2 %v7926_v4 }
 0x23d   : > { %936 = vperm.xlu2 %5238, %v6210_v59   ;;  %v1170_v29 = vadd.f32 %v1106_v41, %v785_v9  ;;  %v1468_v41 = vmul.f32 %v5638_v60, %v1318_v12  ;;  %v5266_v9 = vld [vmem:[%s5464_s23 + $0x1f8] sm:$0xff] }
 0x23f   : > { %v1555_v38 = vadd.f32 %v1491_v11, %v1170_v29 }
 0x241   : > { %v6268_v0 = vpop.permute.xlu2 %583  ;;  %v1620_v1 = vadd.f32 %v6171_v10, %v1555_v38 }
 0x242   : > { %5237 = vset.pattern.permute.xlu1 %v7923_v18  ;;  %v762_v5 = vmul.f32 %v5633_v57, %v6268_v0 }
 0x243   : > { %593 = vperm.xlu1 %5237, %v5265_v8   ;;  %v1350_v59 = vpop.permute.xlu1 %1349  ;;  %v1684_v50 = vmax.f32 %v1620_v1, 0.0 }
 0x244   : > { %v1476_v47 = vmul.f32 %v5638_v60, %v1350_v59  ;;  %v4545_v59 = vld [vmem:[%s7889_s3 + $0xb8] sm:$0xf0] }
 0x245   : > { %5240 = vset.pattern.permute.xlu2 %v7925_v6 }
 0x246   : > { %v1540_v16 = vadd.f32 %v1476_v47, %v1155_v46  ;;  %1277 = vperm.xlu2 %5240, %v366_v62  }
 0x248   : > { %v1605_v55 = vadd.f32 %v6171_v10, %v1540_v16  ;;  %v1071_v16 = vmul.f32 %v5631_v56, %v6256_v15 }
 0x24a   : > { %v1669_v19 = vmax.f32 %v1605_v55, 0.0  ;;  %v1266_v23 = vpop.permute.xlu2 %1265 }
 0x24b   : > { %5239 = vset.pattern.permute.xlu1 %v7925_v6  ;;  %v1414_v39 = vpop.permute.xlu1 %1413  ;;  %v1455_v47 = vmul.f32 %v5638_v60, %v1266_v23 }
 0x24c   : > { %v1492_v63 = vmul.f32 %v5638_v60, %v1414_v39  ;;  %1273 = vperm.xlu1 %5239, %v5264_v28   ;;  %v1711_v40 = vpack.c.bf16 %v1669_v19, %v1668_v52  ;;  %v403_v28 = vld [vmem:[%s5464_s23 + $0x1f0] sm:$0xff] }
 0x24e   : > { %v1556_v34 = vadd.f32 %v1492_v63, %v1171_v35  ;;  %4441 = vmatmul.msk.bf16.gmra.mxu2 %vm1755_vm0, %v1711_v40  ;;  %5241 = vset.pattern.permute.xlu2 %v7923_v18 }
 0x24f   : > { %638 = vperm.xlu2 %5241, %v6244_v53  }
 0x250   : > { %v1621_v27 = vadd.f32 %v6171_v10, %v1556_v34 }
 0x252   : > { %v1685_v49 = vmax.f32 %v1621_v27, 0.0  ;;  %v1314_v37 = vpop.permute.xlu2 %1313 }
 0x253   : > { %v1467_v30 = vmul.f32 %v5638_v60, %v1314_v37 }
 0x254   : > { %1325 = vperm.xlu1 %5239, %v5265_v8   ;;  %v881_v58 = vpop.permute.xlu1 %880  ;;  %v1719_v62 = vpack.c.bf16 %v1685_v49, %v1684_v50  ;;  %v4962_v8 = vld [vmem:[%s7889_s3 + $0xac] sm:$0xf] }
 0x255   : > { %v1070_v36 = vmul.f32 %v5631_v56, %v881_v58  ;;  %v4548_v46 = vor.u32 %v4962_v8, %v4545_v59  ;;  %v5267_v58 = vld [vmem:[%s5464_s23 + $0xd8] sm:$0xff] }
 0x256   : > { %4449 = vmatmul.msk.bf16.gmra.mxu3 %vm1755_vm0, %v1719_v62  ;;  %v1092_v62 = vmul.f32 %v5631_v56, %v6072_v44 }
 0x257   : > { %718 = vperm.xlu2 %5241, %v403_v28   ;;  %2829 = vmatpush.bf16.msrb.mxu0 %v4548_v46 }
 0x25b   : > { %v6304_v24 = vpop.permute.xlu2 %633 }
 0x25c   : > { %5242 = vset.pattern.permute.xlu1 %v7923_v18  ;;  %v772_v44 = vmul.f32 %v5633_v57, %v6304_v24 }
 0x25d   : > { %643 = vperm.xlu1 %5242, %v388_v22   ;;  %v579_v32 = vpop.permute.xlu1 %578 }
 0x25e   : > { %v761_v2 = vmul.f32 %v5633_v57, %v579_v32  ;;  %v4958_v32 = vld [vmem:[%s7889_s3 + $0x8c] sm:$0xf] }
 0x25f   : > { %5244 = vset.pattern.permute.xlu2 %v7926_v4 }
 0x260   : > { %980 = vperm.xlu2 %5244, %v388_v22   ;;  %v1146_v20 = vadd.f32 %v1082_v54, %v761_v2  ;;  %v4529_v2 = vld [vmem:[%s7889_s3 + $0x98] sm:$0xf0]  ;;  %v1358_v54 = vpop.permute.xlu0 %1357 }
 0x262   : > { %v1531_v17 = vadd.f32 %v1467_v30, %v1146_v20  ;;  %v4532_v30 = vor.u32 %v4958_v32, %v4529_v2 }
 0x263   : > { %v6312_v33 = vpop.permute.xlu2 %713 }
 0x264   : > { %v1596_v29 = vadd.f32 %v6171_v10, %v1531_v17  ;;  %2830 = vmatpush.bf16.msrb.mxu0 %v4532_v30 }
 0x265   : > { %5243 = vset.pattern.permute.xlu1 %v7926_v4 }
 0x266   : > { %976 = vperm.xlu1 %5243, %v6244_v53   ;;  %v933_v51 = vpop.permute.xlu1 %932  ;;  %v749_v53 = vmul.f32 %v5633_v57, %v6241_v3  ;;  %v750_v3 = vmul.f32 %v5633_v57, %v7938_v7  ;;  %v1660_v19 = vmax.f32 %v1596_v29, 0.0  ;;  %v788_v29 = vmul.f32 %v5633_v57, %v6312_v33  ;;  %v4968_v33 = vld [vmem:[%s7889_s3 + $0xd4] sm:$0xf0] }
 0x267   : > { %v1083_v21 = vmul.f32 %v5631_v56, %v933_v51 }
 0x268   : > { %1044 = vperm.xlu2 %5244, %v5266_v9   ;;  %v1134_v11 = vadd.f32 %v1070_v36, %v749_v53  ;;  %v1135_v23 = vadd.f32 %v1071_v16, %v750_v3 }
 0x269   : > { %v1147_v0 = vadd.f32 %v1083_v21, %v762_v5  ;;  %v1478_v5 = vmul.f32 %v5638_v60, %v1358_v54  ;;  %v4575_v21 = vld [vmem:[%s7889_s3 + $0xe8] sm:$0xf] }
 0x26a   : > { %v1519_v25 = vadd.f32 %v1455_v47, %v1134_v11 }
 0x26b   : > { %v1532_v13 = vadd.f32 %v1468_v41, %v1147_v0  ;;  %v4972_v41 = vld [vmem:[%s7889_s3 + $0xf4] sm:$0xf0] }
 0x26c   : > { %v6334_v14 = vpop.permute.xlu2 %1032  ;;  %v1584_v63 = vadd.f32 %v6171_v10, %v1519_v25  ;;  %v4576_v59 = vor.u32 %v4972_v41, %v4575_v21  ;;  %v4559_v25 = vld [vmem:[%s7889_s3 + $0xc8] sm:$0xf] }
 0x26d   : > { %v1597_v55 = vadd.f32 %v6171_v10, %v1532_v13 }
 0x26e   : > { %1040 = vperm.xlu1 %5243, %v403_v28   ;;  %v1648_v45 = vmax.f32 %v1584_v63, 0.0  ;;  %2658 = vmatpush.bf16.msrb.mxu3 %v4576_v59 }
 0x26f   : > { %v1661_v52 = vmax.f32 %v1597_v55, 0.0  ;;  %v1270_v38 = vpop.permute.xlu1 %1269 }
 0x270   : > { %v1456_v39 = vmul.f32 %v5638_v60, %v1270_v38  ;;  %5246 = vset.pattern.permute.xlu2 %v7925_v6  ;;  %v4560_v38 = vor.u32 %v4968_v33, %v4559_v25  ;;  %v4969_v33 = vld [vmem:[%s7889_s3 + $0xe4] sm:$0xf] }
 0x271   : > { %1425 = vperm.xlu2 %5246, %v403_v28   ;;  %v1707_v15 = vpack.c.bf16 %v1661_v52, %v1660_v19 }
 0x272   : > { %v1520_v35 = vadd.f32 %v1456_v39, %v1135_v23  ;;  %2659 = vmatpush.bf16.msrb.mxu3 %v4560_v38 }
 0x273   : > { %4437 = vmatmul.msk.bf16.gmra.mxu1 %vm1755_vm0, %v1707_v15 }
 0x274   : > { %v1585_v40 = vadd.f32 %v6171_v10, %v1520_v35 }
 0x275   : > { %v1354_v34 = vpop.permute.xlu2 %1353 }
 0x276   : > { %v1649_v1 = vmax.f32 %v1585_v40, 0.0  ;;  %5245 = vset.pattern.permute.xlu1 %v7925_v6 }
 0x277   : > { %1365 = vperm.xlu1 %5245, %v388_v22   ;;  %v1477_v22 = vmul.f32 %v5638_v60, %v1354_v34 }
 0x278   : > { %v629_v27 = vpop.permute.xlu1 %628  ;;  %v1701_v61 = vpack.c.bf16 %v1649_v1, %v1648_v45 }
 0x279   : > { %5247 = vset.pattern.permute.xlu2 %v7923_v18  ;;  %v771_v37 = vmul.f32 %v5633_v57, %v629_v27  ;;  %v4513_v27 = vld [vmem:[%s7889_s3 + $0x78] sm:$0xf0] }
 0x27a   : > { %4431 = vmatmul.msk.bf16.gmra.mxu0 %vm1755_vm0, %v1701_v61  ;;  %538 = vperm.xlu2 %5247, %v367_v42  }
 0x27b   : > { %v1156_v28 = vadd.f32 %v1092_v62, %v771_v37 }
 0x27d   : > { %v1422_v49 = vpop.permute.xlu2 %1421  ;;  %v1541_v36 = vadd.f32 %v1477_v22, %v1156_v28  ;;  %v4567_v28 = vld [vmem:[%s7889_s3 + $0xe0] sm:$0xf]  ;;  %v4971_v22 = vld [vmem:[%s7889_s3 + $0xec] sm:$0xf0] }
 0x27e   : > { %v1494_v55 = vmul.f32 %v5638_v60, %v1422_v49  ;;  %v4568_v54 = vor.u32 %v4971_v22, %v4567_v28 }
 0x27f   : > { %1429 = vperm.xlu1 %5245, %v5266_v9   ;;  %v1606_v24 = vadd.f32 %v6171_v10, %v1541_v36  ;;  %v5268_v9 = vld [vmem:[%s5464_s23 + $0x130] sm:$0xff]  ;;  %s320_s23 = scalar_lea.vmem [#allocation3], %s319_s20 }
 0x280   : > { %v709_v50 = vpop.permute.xlu1 %708  ;;  %2320 = vmatpush.bf16.msrb.mxu1 %v4568_v54  ;;  %v4957_v54 = vld [vmem:[%s7889_s3 + $0x84] sm:$0xf]  ;;  %s4326_s25 = sshll.u32 %s320_s23, 4  ;;  %s4327_s25 = int_to_ptr.vmem [resolvable:$true] %s4326_s25 }
 0x281   : > { %v1670_v0 = vmax.f32 %v1606_v24, 0.0  ;;  %v787_v3 = vmul.f32 %v5633_v57, %v709_v50  ;;  %v4964_v50 = vld [vmem:[%s7889_s3 + $0xb4] sm:$0xf0] }
 0x282   : > { %5250 = vset.pattern.permute.xlu2 %v7926_v4 }
 0x283   : > { %900 = vperm.xlu2 %5250, %v5267_v58  }
 0x286   : > { %v6361_v20 = vpop.permute.xlu2 %533 }
 0x287   : > { %5249 = vset.pattern.permute.xlu1 %v7926_v4 }
 0x288   : > { %896 = vperm.xlu1 %5249, %v367_v42  }
 0x289   : > { %v973_v12 = vpop.permute.xlu1 %972 }
 0x28a   : > { %v1093_v51 = vmul.f32 %v5631_v56, %v973_v12  ;;  %v752_v12 = vmul.f32 %v5633_v57, %v6361_v20  ;;  %v4527_v20 = vld [vmem:[%s7889_s3 + $0x88] sm:$0xf] }
 0x28b   : > { %5252 = vset.pattern.permute.xlu2 %v7923_v18 }
 0x28c   : > { %v1157_v17 = vadd.f32 %v1093_v51, %v772_v44  ;;  %603 = vperm.xlu2 %5252, %v6273_v43  }
 0x28e   : > { %v1542_v8 = vadd.f32 %v1478_v5, %v1157_v17  ;;  %v589_v13 = vpop.permute.xlu2 %588  ;;  %v1072_v17 = vmul.f32 %v5631_v56, %v6086_v31 }
 0x28f   : > { %v763_v21 = vmul.f32 %v5633_v57, %v589_v13  ;;  %v4967_v13 = vld [vmem:[%s7889_s3 + $0xcc] sm:$0xf0] }
 0x290   : > { %v1607_v53 = vadd.f32 %v6171_v10, %v1542_v8  ;;  %5251 = vset.pattern.permute.xlu1 %v7923_v18  ;;  %v1108_v18 = vmul.f32 %v5631_v56, %v6334_v14  ;;  %v1322_v8 = vpop.permute.xlu0 %1321 }
 0x291   : > { %598 = vperm.xlu1 %5251, %v5268_v9   ;;  %v1037_v46 = vpop.permute.xlu1 %1036 }
 0x292   : > { %v1671_v47 = vmax.f32 %v1607_v53, 0.0  ;;  %v1109_v11 = vmul.f32 %v5631_v56, %v1037_v46  ;;  %v1172_v23 = vadd.f32 %v1108_v18, %v787_v3  ;;  %v4960_v53 = vld [vmem:[%s7889_s3 + $0x94] sm:$0xf0]  ;;  %v1469_v18 = vmul.f32 %v5638_v60, %v1322_v8 }
 0x293   : > { %v4956_v8 = vld [vmem:[%s7889_s3 + $0x74] sm:$0xf0] }
 0x294   : > { %v1712_v16 = vpack.c.bf16 %v1671_v47, %v1670_v0  ;;  %5255 = vset.pattern.permute.xlu2 %v7925_v6  ;;  %v1173_v7 = vadd.f32 %v1109_v11, %v788_v29  ;;  %v4528_v0 = vor.u32 %v4960_v53, %v4527_v20  ;;  %v4497_v47 = vld [vmem:[%s7889_s3 + $0x58] sm:$0xf0]  ;;  %v4551_v11 = vld [vmem:[%s7889_s3 + $0xc0] sm:$0xf]  ;;  %v4953_v20 = vld [vmem:[%s7889_s3 + $0x64] sm:$0xf] }
 0x295   : > { %1281 = vperm.xlu2 %5255, %v367_v42   ;;  %v4954_v42 = vld [vmem:[%s7889_s3 + $0x6c] sm:$0xf]  ;;  %v4505_v53 = vld [vmem:[%s7889_s3 + $0x70] sm:$0xf0] }
 0x296   : > { %4442 = vmatmul.msk.bf16.gmra.mxu2 %vm1755_vm0, %v1712_v16  ;;  %v1558_v52 = vadd.f32 %v1494_v55, %v1173_v7  ;;  %v4516_v61 = vor.u32 %v4954_v42, %v4513_v27  ;;  %v4552_v16 = vor.u32 %v4967_v13, %v4551_v11 }
 0x297   : > { %v937_v39 = vpop.permute.xlu2 %936 }
 0x298   : > { %v1623_v35 = vadd.f32 %v6171_v10, %v1558_v52  ;;  %2831 = vmatpush.bf16.msrb.mxu0 %v4516_v61  ;;  %v1084_v41 = vmul.f32 %v5631_v56, %v937_v39  ;;  %2321 = vmatpush.bf16.msrb.mxu1 %v4552_v16  ;;  %v4569_v52 = vld [vmem:[%s7889_s3 + $0xf0] sm:$0xf0]  ;;  %v1085_v39 = vmul.f32 %v5631_v56, %v6100_v48  ;;  %v4959_v16 = vld [vmem:[%s7889_s3 + $0x8c] sm:$0xf0] }
 0x299   : > { %5254 = vset.pattern.permute.xlu1 %v7926_v4 }
 0x29a   : > { %948 = vperm.xlu1 %5254, %v6273_v43   ;;  %v1418_v19 = vpop.permute.xlu1 %1417  ;;  %v1687_v34 = vmax.f32 %v1623_v35, 0.0  ;;  %v6400_v43 = vpop.f32.mrf.mxu0  ;;  %v1148_v7 = vadd.f32 %v1084_v41, %v763_v21  ;;  %v4963_v21 = vld [vmem:[%s7889_s3 + $0xac] sm:$0xf0]  ;;  %v4511_v41 = vld [vmem:[%s7889_s3 + $0x68] sm:$0xf] }
 0x29b   : > { %v1493_v14 = vmul.f32 %v5638_v60, %v1418_v19 }
 0x29d   : > { %v1557_v15 = vadd.f32 %v1493_v14, %v1172_v23  ;;  %1329 = vperm.xlu2 %5255, %v5268_v9   ;;  %v4950_v9 = vld [vmem:[%s7889_s3 + $0x4c] sm:$0xf]  ;;  %v4572_v23 = vor.u32 %v4969_v33, %v4569_v52  ;;  %v4481_v52 = vld [vmem:[%s7889_s3 + $0x38] sm:$0xf0] }
 0x29e   : > { %v4500_v29 = vor.u32 %v4950_v9, %v4497_v47  ;;  %v4508_v9 = vor.u32 %v4953_v20, %v4505_v53  ;;  %v4489_v47 = vld [vmem:[%s7889_s3 + $0x50] sm:$0xf0]  ;;  %v4946_v33 = vld [vmem:[%s7889_s3 + $0x2c] sm:$0xf] }
 0x29f   : > { %v1622_v63 = vadd.f32 %v6171_v10, %v1557_v15  ;;  %v1533_v15 = vadd.f32 %v1469_v18, %v1148_v7  ;;  %2489 = vmatpush.bf16.msrb.mxu2 %v4572_v23  ;;  %v4945_v18 = vld [vmem:[%s7889_s3 + $0x24] sm:$0xf]  ;;  %v4952_v23 = vld [vmem:[%s7889_s3 + $0x54] sm:$0xf0] }
 0x2a0   : > { %v1278_v45 = vpop.permute.xlu2 %1277  ;;  %2832 = vmatpush.bf16.msrb.mxu0 %v4500_v29  ;;  %v4519_v29 = vld [vmem:[%s7889_s3 + $0x80] sm:$0xf] }
 0x2a1   : > { %v1686_v40 = vmax.f32 %v1622_v63, 0.0  ;;  %v1458_v44 = vmul.f32 %v5638_v60, %v1278_v45  ;;  %v1598_v48 = vadd.f32 %v6171_v10, %v1533_v15  ;;  %v4520_v7 = vor.u32 %v4959_v16, %v4519_v29  ;;  %v4457_v15 = vld [vmem:[%s7889_s3 + $0x10] sm:$0xf0] }
 0x2a2   : > { %5256 = vset.pattern.permute.xlu1 %v7925_v6  ;;  %v4543_v6 = vld [vmem:[%s7889_s3 + $0xa8] sm:$0xf] }
 0x2a3   : > { %1285 = vperm.xlu1 %5256, %v5267_v58   ;;  %v529_v4 = vpop.permute.xlu1 %528  ;;  %v1720_v1 = vpack.c.bf16 %v1687_v34, %v1686_v40  ;;  %v4544_v37 = vor.u32 %v4964_v50, %v4543_v6  ;;  %v6415_v58 = vpop.f32.mrf.mxu0  ;;  %v4965_v34 = vld [vmem:[%s7889_s3 + $0xc4] sm:$0xf]  ;;  %v4537_v6 = vld [vmem:[%s7889_s3 + $0xb0] sm:$0xf0]  ;;  %v1662_v22 = vmax.f32 %v1598_v48, 0.0 }
 0x2a4   : > { %v751_v5 = vmul.f32 %v5633_v57, %v529_v4  ;;  %v4553_v4 = vld [vmem:[%s7889_s3 + $0xd0] sm:$0xf0] }
 0x2a5   : > { %4450 = vmatmul.msk.bf16.gmra.mxu3 %vm1755_vm0, %v1720_v1  ;;  %v4556_v27 = vor.u32 %v4965_v34, %v4553_v4 }
 0x2a6   : > { %2660 = vmatpush.bf16.msrb.mxu3 %v4544_v37  ;;  %v1136_v31 = vadd.f32 %v1072_v17, %v751_v5  ;;  %v4535_v17 = vld [vmem:[%s7889_s3 + $0xa0] sm:$0xf] }
 0x2a7   : > { %2490 = vmatpush.bf16.msrb.mxu2 %v4556_v27  ;;  %v4948_v27 = vld [vmem:[%s7889_s3 + $0x34] sm:$0xf0] }
 0x2a9   : > { %v6417_v62 = vpop.permute.xlu2 %638 }
 0x2aa   : > { %2661 = vmatpush.bf16.msrb.mxu3 %v4528_v0  ;;  %v4949_v0 = vld [vmem:[%s7889_s3 + $0x44] sm:$0xf] }
 0x2ab   : > { %v6426_v30 = vpop.f32.mrf.mxu0  ;;  %v4492_v11 = vor.u32 %v4949_v0, %v4489_v47 }
 0x2ac   : > { %v893_v49 = vpop.permute.xlu1 %892 }
 0x2ad   : > { %v1073_v32 = vmul.f32 %v5631_v56, %v893_v49  ;;  %v4961_v49 = vld [vmem:[%s7889_s3 + $0xa4] sm:$0xf] }
 0x2ae   : > { %v4540_v28 = vor.u32 %v4961_v49, %v4537_v6  ;;  %v4503_v49 = vld [vmem:[%s7889_s3 + $0x60] sm:$0xf]  ;;  %v4955_v6 = vld [vmem:[%s7889_s3 + $0x6c] sm:$0xf0] }
 0x2af   : > { %v1137_v36 = vadd.f32 %v1073_v32, %v752_v12  ;;  %v4521_v12 = vld [vmem:[%s7889_s3 + $0x90] sm:$0xf0] }
 0x2b0   : > { %2491 = vmatpush.bf16.msrb.mxu2 %v4540_v28  ;;  %v4524_v5 = vor.u32 %v4957_v54, %v4521_v12  ;;  %v4463_v54 = vld [vmem:[%s7889_s3 + $0x8] sm:$0xf]  ;;  %v4944_v12 = vld [vmem:[%s7889_s3 + $0x14] sm:$0xf0] }
 0x2b1   : > { %v6431_v51 = vpop.permute.xlu2 %718  ;;  %v1522_v24 = vadd.f32 %v1458_v44, %v1137_v36 }
 0x2b3   : > { %v6457_v55 = vpop.f32.mrf.mxu0  ;;  %v1587_v3 = vadd.f32 %v6171_v10, %v1522_v24  ;;  %v4536_v24 = vor.u32 %v4963_v21, %v4535_v17 }
 0x2b4   : > { %2492 = vmatpush.bf16.msrb.mxu2 %v4524_v5 }
 0x2b5   : > { %v594_v2 = vpop.permute.xlu1 %593  ;;  %v1651_v35 = vmax.f32 %v1587_v3, 0.0  ;;  %2322 = vmatpush.bf16.msrb.mxu1 %v4536_v24  ;;  %v4473_v3 = vld [vmem:[%s7889_s3 + $0x30] sm:$0xf0] }
 0x2b6   : > { %v764_v38 = vmul.f32 %v5633_v57, %v594_v2 }
 0x2b8   : > { %v1149_v1 = vadd.f32 %v1085_v39, %v764_v38  ;;  %2493 = vmatpush.bf16.msrb.mxu2 %v4508_v9  ;;  %v4495_v38 = vld [vmem:[%s7889_s3 + $0x48] sm:$0xf]  ;;  %v4941_v39 = vld [vmem:[%s7889_s3 + $0x4] sm:$0xf] }
 0x2b9   : > { %2323 = vmatpush.bf16.msrb.mxu1 %v4520_v7 }
 0x2ba   : > { %v6469_v14 = vpop.permute.xlu2 %980 }
 0x2bb   : > { %v6488_v50 = vpop.f32.mrf.mxu0  ;;  %v1095_v28 = vmul.f32 %v5631_v56, %v6469_v14 }
 0x2bc   : > { %2494 = vmatpush.bf16.msrb.mxu2 %v4492_v11  ;;  %v7939_v11 = vld [vmem:[#allocation16_spill] sm:$0xff] }
 0x2be   : > { %v1274_v59 = vpop.permute.xlu1 %1273 }
 0x2bf   : > { %v1457_v46 = vmul.f32 %v5638_v60, %v1274_v59  ;;  %v4512_v59 = vor.u32 %v4956_v8, %v4511_v41 }
 0x2c1   : > { %v1521_v25 = vadd.f32 %v1457_v46, %v1136_v31  ;;  %2662 = vmatpush.bf16.msrb.mxu3 %v4512_v59 }
 0x2c2   : > { %v6491_v2 = vpop.permute.xlu2 %1044 }
 0x2c3   : > { %v1586_v19 = vadd.f32 %v6171_v10, %v1521_v25  ;;  %v6518_v31 = vpop.f32.mrf.mxu0  ;;  %v4476_v25 = vor.u32 %v4945_v18, %v4473_v3  ;;  %v1111_v0 = vmul.f32 %v5631_v56, %v6491_v2  ;;  %v4951_v18 = vld [vmem:[%s7889_s3 + $0x4c] sm:$0xf0] }
 0x2c5   : > { %v1650_v63 = vmax.f32 %v1586_v19, 0.0  ;;  %2495 = vmatpush.bf16.msrb.mxu2 %v4476_v25  ;;  %v4484_v19 = vor.u32 %v4946_v33, %v4481_v52 }
 0x2c6   : > { %v1326_v40 = vpop.permute.xlu1 %1325 }
 0x2c7   : > { %v1702_v45 = vpack.c.bf16 %v1651_v35, %v1650_v63  ;;  %v1470_v42 = vmul.f32 %v5638_v60, %v1326_v40  ;;  %v4496_v63 = vor.u32 %v4952_v23, %v4495_v38  ;;  %v4460_v40 = vor.u32 %v4941_v39, %v4457_v15  ;;  %2833 = vmatpush.bf16.msrb.mxu0 %v4484_v19  ;;  %v4942_v39 = vld [vmem:[%s7889_s3 + $0xc] sm:$0xf]  ;;  %v4465_v15 = vld [vmem:[%s7889_s3 + $0x18] sm:$0xf0] }
 0x2c9   : > { %v1534_v61 = vadd.f32 %v1470_v42, %v1149_v1  ;;  %4432 = vmatmul.msk.bf16.gmra.mxu0 %vm1755_vm0, %v1702_v45  ;;  %2663 = vmatpush.bf16.msrb.mxu3 %v4496_v63  ;;  %v773_v45 = vmul.f32 %v5633_v57, %v6417_v62  ;;  %v4479_v42 = vld [vmem:[%s7889_s3 + $0x28] sm:$0xf]  ;;  %v4504_v62 = vor.u32 %v4955_v6, %v4503_v49 }
 0x2ca   : > { %2496 = vmatpush.bf16.msrb.mxu2 %v4460_v40  ;;  %v4480_v48 = vor.u32 %v4948_v27, %v4479_v42  ;;  %v4468_v63 = vor.u32 %v4942_v39, %v4465_v15 }
 0x2cb   : > { %v1599_v37 = vadd.f32 %v6171_v10, %v1534_v61  ;;  %v1426_v46 = vpop.permute.xlu2 %1425  ;;  %v6556_v35 = vpop.f32.mrf.mxu0  ;;  %2324 = vmatpush.bf16.msrb.mxu1 %v4504_v62  ;;  %v4471_v62 = vld [vmem:[%s7889_s3 + $0x20] sm:$0xf] }
 0x2cc   : > { %v1495_v59 = vmul.f32 %v5638_v60, %v1426_v46  ;;  %v4487_v46 = vld [vmem:[%s7889_s3 + $0x40] sm:$0xf]  ;;  %2834 = vmatpush.bf16.msrb.mxu0 %v4468_v63 }
 0x2cd   : > { %v1663_v32 = vmax.f32 %v1599_v37, 0.0  ;;  %v1362_v37 = vpop.permute.xlu0 %1361  ;;  %2664 = vmatpush.bf16.msrb.mxu3 %v4480_v48  ;;  %v4488_v52 = vor.u32 %v4951_v18, %v4487_v46 }
 0x2cf   : > { %v644_v44 = vpop.permute.xlu1 %643  ;;  %v1708_v36 = vpack.c.bf16 %v1663_v32, %v1662_v22  ;;  %v1479_v22 = vmul.f32 %v5638_v60, %v1362_v37  ;;  %2325 = vmatpush.bf16.msrb.mxu1 %v4488_v52 }
 0x2d0   : > { %v774_v32 = vmul.f32 %v5633_v57, %v644_v44  ;;  %v789_v44 = vmul.f32 %v5633_v57, %v6431_v51 }
 0x2d1   : > { %4438 = vmatmul.msk.bf16.gmra.mxu1 %vm1755_vm0, %v1708_v36  ;;  %v4464_v36 = vor.u32 %v4944_v12, %v4463_v54  ;;  %v4455_v54 = vld [vmem:[%s7889_s3] sm:$0xf]  ;;  %v4943_v12 = vld [vmem:[%s7889_s3 + $0xc] sm:$0xf0] }
 0x2d2   : > { %v1159_v41 = vadd.f32 %v1095_v28, %v774_v32 }
 0x2d3   : > { %v6586_v21 = vpop.f32.mrf.mxu0  ;;  %2665 = vmatpush.bf16.msrb.mxu3 %v4464_v36  ;;  %v4456_v36 = vor.u32 %v4943_v12, %v4455_v54 }
 0x2d4   : > { %v6558_v34 = vpop.permute.xlu2 %538 }
 0x2d8   : > { %v977_v13 = vpop.permute.xlu1 %976 }
 0x2d9   : > { %v1094_v4 = vmul.f32 %v5631_v56, %v977_v13  ;;  %v790_v13 = vmul.f32 %v5633_v57, %v7939_v11 }
 0x2db   : > { %v1158_v61 = vadd.f32 %v1094_v4, %v773_v45  ;;  %v1175_v3 = vadd.f32 %v1111_v0, %v790_v13  ;;  %v6607_v38 = vpop.f32.mrf.mxu0  ;;  %v6621_v45 = vld [vmem:[%s7893_s7 + $0x1] ss:$0 sm:$0xff] }
 0x2dc   : > { %v1864_v42 = vadd.f32 %v6415_v58, %v6621_v45  ;;  %v4947_v58 = vld [vmem:[%s7889_s3 + $0x2c] sm:$0xf0]  ;;  %v1879_v12 = vadd.f32 %v6586_v21, %v6621_v45 }
 0x2dd   : > { %v1543_v5 = vadd.f32 %v1479_v22, %v1158_v61  ;;  %v6590_v24 = vpop.permute.xlu2 %900  ;;  %v1862_v61 = vadd.f32 %v6400_v43, %v6621_v45  ;;  %v4472_v28 = vor.u32 %v4947_v58, %v4471_v62 }
 0x2de   : > { %v2022_v37 = vmax.f32 %v1864_v42, 0.0 }
 0x2df   : > { %v1608_v9 = vadd.f32 %v6171_v10, %v1543_v5  ;;  %v2021_v22 = vmax.f32 %v1862_v61, 0.0  ;;  %2326 = vmatpush.bf16.msrb.mxu1 %v4472_v28 }
 0x2e0   : > { %v1041_v1 = vpop.permute.xlu1 %1040 }
 0x2e1   : > { %v1110_v17 = vmul.f32 %v5631_v56, %v1041_v1  ;;  %v1672_v16 = vmax.f32 %v1608_v9, 0.0  ;;  %v6638_v43 = vpack.c.bf16 %v2022_v37, %v2021_v22  ;;  %v1334_v9 = vpop.permute.xlu0 %1333  ;;  %v1872_v37 = vadd.f32 %v6488_v50, %v6621_v45 }
 0x2e2   : > { %v1877_v50 = vadd.f32 %v6556_v35, %v6621_v45  ;;  %v1882_v35 = vadd.f32 %v6607_v38, %v6621_v45 }
 0x2e3   : > { %v1174_v20 = vadd.f32 %v1110_v17, %v789_v44  ;;  %v6630_v6 = vpop.f32.mrf.mxu0  ;;  %2327 = vmatpush.bf16.msrb.mxu1 %v4456_v36  ;;  %v2025_v22 = vmax.f32 %v1872_v37, 0.0  ;;  %v2028_v36 = vmax.f32 %v1879_v12, 0.0 }
 0x2e4   : > { %v1884_v21 = vadd.f32 %v6630_v6, %v6621_v45 }
 0x2e5   : > { %v1559_v51 = vadd.f32 %v1495_v59, %v1174_v20  ;;  %v1869_v20 = vadd.f32 %v6457_v55, %v6621_v45  ;;  %v1472_v55 = vmul.f32 %v5638_v60, %v1334_v9 }
 0x2e6   : > { %v604_v25 = vpop.permute.xlu2 %603  ;;  %v2030_v9 = vmax.f32 %v1884_v21, 0.0 }
 0x2e7   : > { %v1624_v23 = vadd.f32 %v6171_v10, %v1559_v51  ;;  %v2024_v51 = vmax.f32 %v1869_v20, 0.0 }
 0x2e9   : > { %v1366_v14 = vpop.permute.xlu1 %1365  ;;  %v1688_v1 = vmax.f32 %v1624_v23, 0.0  ;;  %v7940_v23 = vld [vmem:[#allocation17_spill] sm:$0xff] }
 0x2ea   : > { %v1480_v8 = vmul.f32 %v5638_v60, %v1366_v14  ;;  %v1086_v14 = vmul.f32 %v5631_v56, %v6106_v26  ;;  %v766_v26 = vmul.f32 %v5633_v57, %v604_v25  ;;  %v754_v39 = vmul.f32 %v5633_v57, %v7940_v23 }
 0x2ec   : > { %v1544_v53 = vadd.f32 %v1480_v8, %v1159_v41  ;;  %v6652_v41 = vpop.f32.mrf.mxu0 }
 0x2ee   : > { %v1609_v47 = vadd.f32 %v6171_v10, %v1544_v53  ;;  %v1867_v53 = vadd.f32 %v6426_v30, %v6621_v45 }
 0x2ef   : > { %v1282_v49 = vpop.permute.xlu2 %1281 }
 0x2f0   : > { %v1673_v29 = vmax.f32 %v1609_v47, 0.0  ;;  %v1459_v46 = vmul.f32 %v5638_v60, %v1282_v49 }
 0x2f1   : > { %v1430_v7 = vpop.permute.xlu1 %1429 }
 0x2f2   : > { %v1496_v2 = vmul.f32 %v5638_v60, %v1430_v7  ;;  %v1713_v33 = vpack.c.bf16 %v1673_v29, %v1672_v16  ;;  %v753_v29 = vmul.f32 %v5633_v57, %v6558_v34  ;;  %v2023_v7 = vmax.f32 %v1867_v53, 0.0  ;;  %v6703_v53 = vpop.f32.mrf.mxu1 }
 0x2f3   : > { %v1075_v34 = vmul.f32 %v5631_v56, %v6590_v24 }
 0x2f4   : > { %v1560_v19 = vadd.f32 %v1496_v2, %v1175_v3  ;;  %4443 = vmatmul.msk.bf16.gmra.mxu2 %vm1755_vm0, %v1713_v33  ;;  %v6669_v3 = vpop.f32.mrf.mxu0  ;;  %v5269_v2 = vld [vmem:[%s7893_s7] ss:$0 sm:$0xff]  ;;  %v2086_v52 = vpack.c.bf16 %v2024_v51, %v2023_v7 }
 0x2f5   : > { %v1889_v38 = vadd.f32 %v6669_v3, %v6621_v45 }
 0x2f6   : > { %v1625_v40 = vadd.f32 %v6171_v10, %v1560_v19  ;;  %v6628_v10 = vpop.f32.mrf.mxu3 }
 0x2f7   : > { %v1330_v17 = vpop.permute.xlu2 %1329 }
 0x2f8   : > { %v1689_v4 = vmax.f32 %v1625_v40, 0.0  ;;  %v1471_v59 = vmul.f32 %v5638_v60, %v1330_v17 }
 0x2fa   : > { %v897_v27 = vpop.permute.xlu1 %896  ;;  %v1721_v48 = vpack.c.bf16 %v1689_v4, %v1688_v1  ;;  %v1139_v1 = vadd.f32 %v1075_v34, %v754_v39 }
 0x2fb   : > { %v1074_v0 = vmul.f32 %v5631_v56, %v897_v27 }
 0x2fc   : > { %4451 = vmatmul.msk.bf16.gmra.mxu3 %vm1755_vm0, %v1721_v48 }
 0x2fd   : > { %v1138_v30 = vadd.f32 %v1074_v0, %v753_v29  ;;  %v2029_v0 = vmax.f32 %v1882_v35, 0.0  ;;  %v1887_v29 = vadd.f32 %v6652_v41, %v6621_v45 }
 0x2fe   : > { %v6650_v44 = vpop.f32.mrf.mxu3 }
 0x2ff   : > { %v1523_v15 = vadd.f32 %v1459_v46, %v1138_v30  ;;  %v2031_v30 = vmax.f32 %v1887_v29, 0.0 }
 0x301   : > { %v1588_v48 = vadd.f32 %v5269_v2, %v1523_v15 }
 0x303   : > { %v599_v32 = vpop.permute.xlu1 %598  ;;  %v1652_v62 = vmax.f32 %v1588_v48, 0.0 }
 0x304   : > { %2497 = vmatmul.bf16.vlgmr.msrb.gmra.mxu2 %v6638_v43  ;;  %v765_v5 = vmul.f32 %v5633_v57, %v599_v32  ;;  %v1891_v57 = vpop.f32.mrf.mxu0 }
 0x305   : > { %v1892_v34 = vadd.f32 %v1891_v57, %v6621_v45 }
 0x306   : > { %v1150_v8 = vadd.f32 %v1086_v14, %v765_v5  ;;  %v6667_v18 = vpop.f32.mrf.mxu3  ;;  %v2027_v14 = vmax.f32 %v1877_v50, 0.0 }
 0x307   : > { %v2033_v15 = vmax.f32 %v1892_v34, 0.0 }
 0x308   : > { %v1535_v11 = vadd.f32 %v1471_v59, %v1150_v8  ;;  %v2088_v8 = vpack.c.bf16 %v2028_v36, %v2027_v14 }
 0x30a   : > { %v1600_v25 = vadd.f32 %v5269_v2, %v1535_v11 }
 0x30c   : > { %2666 = vmatmul.bf16.vlgmr.msrb.gmra.mxu3 %v6638_v43  ;;  %v949_v47 = vpop.permute.xlu1 %948  ;;  %v1664_v63 = vmax.f32 %v1600_v25, 0.0 }
 0x30d   : > { %v1087_v13 = vmul.f32 %v5631_v56, %v949_v47  ;;  %v1874_v56 = vadd.f32 %v6518_v31, %v6621_v45  ;;  %v1893_v31 = vpop.f32.mrf.mxu0 }
 0x30e   : > { %v6682_v49 = vpop.f32.mrf.mxu3  ;;  %v1894_v41 = vadd.f32 %v1893_v31, %v6621_v45 }
 0x30f   : > { %v1151_v16 = vadd.f32 %v1087_v13, %v766_v26  ;;  %v2026_v28 = vmax.f32 %v1874_v56, 0.0  ;;  %v2089_v26 = vpack.c.bf16 %v2030_v9, %v2029_v0  ;;  %v6709_v13 = vpop.f32.mrf.mxu1 }
 0x310   : > { %v2034_v23 = vmax.f32 %v1894_v41, 0.0 }
 0x311   : > { %v1536_v33 = vadd.f32 %v1472_v55, %v1151_v16  ;;  %v2087_v32 = vpack.c.bf16 %v2026_v28, %v2025_v22  ;;  %v2032_v16 = vmax.f32 %v1889_v38, 0.0 }
 0x313   : > { %v1601_v19 = vadd.f32 %v5269_v2, %v1536_v33  ;;  %v2090_v46 = vpack.c.bf16 %v2032_v16, %v2031_v30  ;;  %v6780_v16 = vld [vmem:[%s7893_s7 + $0x2] ss:$8 sm:$0xf] }
 0x314   : > { %2502 = vmatmul.bf16.gmra.mxu2 %v2086_v52 }
 0x315   : > { %v1286_v40 = vpop.permute.xlu1 %1285  ;;  %v1665_v4 = vmax.f32 %v1601_v19, 0.0  ;;  %v1896_v17 = vpop.f32.mrf.mxu0 }
 0x316   : > { %v1460_v42 = vmul.f32 %v5638_v60, %v1286_v40  ;;  %v6687_v54 = vpop.f32.mrf.mxu3  ;;  %v2091_v40 = vpack.c.bf16 %v2034_v23, %v2033_v15  ;;  %v6785_v15 = vperm.slane %v6780_v16, 1 }
 0x317   : > { %v1709_v27 = vpack.c.bf16 %v1665_v4, %v1664_v63  ;;  %v6719_v7 = vpop.f32.mrf.mxu1 }
 0x318   : > { %v1524_v61 = vadd.f32 %v1460_v42, %v1139_v1 }
 0x319   : > { %4439 = vmatmul.msk.bf16.gmra.mxu1 %vm1755_vm0, %v1709_v27 }
 0x31a   : > { %v1589_v24 = vadd.f32 %v5269_v2, %v1524_v61  ;;  %v1897_v61 = vadd.f32 %v1896_v17, %v6621_v45 }
 0x31c   : > { %v1653_v58 = vmax.f32 %v1589_v24, 0.0  ;;  %2671 = vmatmul.bf16.gmra.mxu3 %v2086_v52  ;;  %v2035_v37 = vmax.f32 %v1897_v61, 0.0 }
 0x31d   : > { %v1898_v20 = vpop.f32.mrf.mxu0 }
 0x31e   : > { %v1703_v60 = vpack.c.bf16 %v1653_v58, %v1652_v62  ;;  %v6694_v5 = vpop.f32.mrf.mxu3  ;;  %v1899_v27 = vadd.f32 %v1898_v20, %v6621_v45 }
 0x31f   : > { %v6727_v3 = vpop.f32.mrf.mxu1 }
 0x320   : > { %4433 = vmatmul.msk.bf16.gmra.mxu0 %vm1755_vm0, %v1703_v60  ;;  %v2036_v24 = vmax.f32 %v1899_v27, 0.0 }
 0x322   : > { %v6751_v58 = vpack.c.bf16 %v2036_v24, %v2035_v37 }
 0x324   : > { %2507 = vmatmul.bf16.gmra.mxu2 %v2087_v32 }
 0x325   : > { %v1901_v11 = vpop.f32.mrf.mxu0 }
 0x326   : > { %v6697_v59 = vpop.f32.mrf.mxu3  ;;  %v1902_v12 = vadd.f32 %v1901_v11, %v6621_v45 }
 0x327   : > { %v6735_v63 = vpop.f32.mrf.mxu1 }
 0x328   : > { %v2037_v20 = vmax.f32 %v1902_v12, 0.0 }
 0x329   : > { %2328 = vmatmul.bf16.vlgmr.msrb.gmra.mxu1 %v6638_v43 }
 0x32c   : > { %2676 = vmatmul.bf16.gmra.mxu3 %v2087_v32 }
 0x32d   : > { %v1903_v55 = vpop.f32.mrf.mxu0 }
 0x32e   : > { %v6705_v47 = vpop.f32.mrf.mxu3  ;;  %v1904_v31 = vadd.f32 %v1903_v55, %v6621_v45 }
 0x32f   : > { %v6744_v48 = vpop.f32.mrf.mxu1 }
 0x330   : > { %2835 = vmatmul.bf16.vlgmr.msrb.gmra.mxu0 %v6638_v43  ;;  %v6707_v43 = vpop.f32.mrf.mxu2  ;;  %v2038_v36 = vmax.f32 %v1904_v31, 0.0 }
 0x332   : > { %v6767_v35 = vpack.c.bf16 %v2038_v36, %v2037_v20 }
 0x334   : > { %2512 = vmatmul.bf16.gmra.mxu2 %v2088_v8 }
 0x335   : > { %v6725_v33 = vpop.f32.mrf.mxu0 }
 0x336   : > { %v6711_v51 = vpop.f32.mrf.mxu3  ;;  %v1907_v61 = vadd.f32 %v6725_v33, %v6621_v45  ;;  %v6801_v33 = vperm.slane %v6780_v16, 2 }
 0x337   : > { %v6753_v28 = vpop.f32.mrf.mxu1 }
 0x338   : > { %v6715_v6 = vpop.f32.mrf.mxu2  ;;  %v2039_v36 = vmax.f32 %v1907_v61, 0.0 }
 0x339   : > { %2333 = vmatmul.bf16.gmra.mxu1 %v2086_v52 }
 0x33c   : > { %2681 = vmatmul.bf16.gmra.mxu3 %v2088_v8 }
 0x33d   : > { %v1908_v39 = vpop.f32.mrf.mxu0 }
 0x33e   : > { %v6721_v2 = vpop.f32.mrf.mxu3  ;;  %v1909_v41 = vadd.f32 %v1908_v39, %v6621_v45 }
 0x33f   : > { %v6762_v50 = vpop.f32.mrf.mxu1 }
 0x340   : > { %2840 = vmatmul.bf16.gmra.mxu0 %v2086_v52  ;;  %v6723_v25 = vpop.f32.mrf.mxu2  ;;  %v2040_v37 = vmax.f32 %v1909_v41, 0.0 }
 0x344   : > { %2517 = vmatmul.bf16.gmra.mxu2 %v2089_v26 }
 0x345   : > { %v6741_v42 = vpop.f32.mrf.mxu0 }
 0x346   : > { %v6730_v52 = vpop.f32.mrf.mxu3 }
 0x348   : > { %v6733_v19 = vpop.f32.mrf.mxu2 }
 0x349   : > { %2338 = vmatmul.bf16.gmra.mxu1 %v2087_v32 }
 0x34c   : > { %2686 = vmatmul.bf16.gmra.mxu3 %v2089_v26 }
 0x34d   : > { %v1913_v62 = vpop.f32.mrf.mxu0 }
 0x34e   : > { %v6737_v4 = vpop.f32.mrf.mxu3  ;;  %v6771_v11 = vpop.f32.mrf.mxu1  ;;  %v1914_v41 = vadd.f32 %v1913_v62, %v6621_v45 }
 0x350   : > { %2845 = vmatmul.bf16.gmra.mxu0 %v2087_v32  ;;  %v6739_v1 = vpop.f32.mrf.mxu2 }
 0x354   : > { %2522 = vmatmul.bf16.gmra.mxu2 %v2090_v46 }
 0x355   : > { %v6758_v32 = vpop.f32.mrf.mxu0 }
 0x356   : > { %v6747_v56 = vpop.f32.mrf.mxu3 }
 0x357   : > { %7941 = vst [vmem:[#allocation7_spill] sm:$0xff] %v6747_v56 }
 0x358   : > { %v6749_v57 = vpop.f32.mrf.mxu2 }
 0x359   : > { %2343 = vmatmul.bf16.gmra.mxu1 %v2088_v8 }
 0x35c   : > { %2691 = vmatmul.bf16.gmra.mxu3 %v2090_v46 }
 0x35e   : > { %v6756_v60 = vpop.f32.mrf.mxu3 }
 0x35f   : > { %7942 = vst [vmem:[#allocation18_spill] sm:$0xff] %v6756_v60 }
 0x360   : > { %2850 = vmatmul.bf16.gmra.mxu0 %v2088_v8 }
 0x364   : > { %2527 = vmatmul.bf16.gmra.mxu2 %v2091_v40 }
 0x369   : > { %2348 = vmatmul.bf16.gmra.mxu1 %v2089_v26 }
 0x36c   : > { %2696 = vmatmul.bf16.gmra.mxu3 %v2091_v40 }
 0x370   : > { %2855 = vmatmul.bf16.gmra.mxu0 %v2089_v26  ;;  %v6769_v26 = vpop.f32.mrf.mxu0 }
 0x374   : > { %2532 = vmatmul.bf16.gmra.mxu2 %v6751_v58 }
 0x377   : > { %v1976_v22 = vpop.f32.mrf.mxu2 }
 0x378   : > { %v1977_v17 = vadd.f32 %v1976_v22, %v6621_v45  ;;  %v6787_v27 = vpop.f32.mrf.mxu0  ;;  %v6794_v22 = vpop.f32.mrf.mxu1 }
 0x379   : > { %2353 = vmatmul.bf16.gmra.mxu1 %v2090_v46 }
 0x37a   : > { %v2067_v9 = vmax.f32 %v1977_v17, 0.0 }
 0x37c   : > { %2701 = vmatmul.bf16.gmra.mxu3 %v6751_v58 }
 0x37f   : > { %v1978_v14 = vpop.f32.mrf.mxu2  ;;  %v2016_v8 = vpop.f32.mrf.mxu3 }
 0x380   : > { %v1979_v21 = vadd.f32 %v1978_v14, %v6621_v45  ;;  %2860 = vmatmul.bf16.gmra.mxu0 %v2090_v46  ;;  %v2017_v29 = vadd.f32 %v2016_v8, %v6621_v45  ;;  %v6798_v14 = vpack.c.bf16 %v2040_v37, %v2039_v36  ;;  %v1912_v37 = vadd.f32 %v6741_v42, %v6621_v45 }
 0x382   : > { %v2068_v0 = vmax.f32 %v1979_v21, 0.0  ;;  %v2083_v34 = vmax.f32 %v2017_v29, 0.0 }
 0x384   : > { %v6773_v38 = vpack.c.bf16 %v2068_v0, %v2067_v9  ;;  %2537 = vmatmul.bf16.gmra.mxu2 %v6767_v35  ;;  %v6804_v9 = vpop.f32.mrf.mxu0 }
 0x387   : > { %v2018_v55 = vpop.f32.mrf.mxu3  ;;  %v2498_v30 = vpop.f32.mrf.mxu2 }
 0x388   : > { %v2019_v46 = vadd.f32 %v2018_v55, %v6621_v45  ;;  %v2499_v31 = vadd.f32 %v2498_v30, %v6785_v15 }
 0x389   : > { %2358 = vmatmul.bf16.gmra.mxu1 %v2091_v40 }
 0x38a   : > { %v2084_v23 = vmax.f32 %v2019_v46, 0.0  ;;  %v2997_v8 = vmax.f32 %v2499_v31, 0.0 }
 0x38c   : > { %v6791_v24 = vpack.c.bf16 %v2084_v23, %v2083_v34  ;;  %2706 = vmatmul.bf16.gmra.mxu3 %v6767_v35 }
 0x38e   : > { %7943 = vst [vmem:[#allocation8_spill] sm:$0xff] %v6791_v24 }
 0x38f   : > { %v2500_v39 = vpop.f32.mrf.mxu2  ;;  %v2667_v12 = vpop.f32.mrf.mxu3 }
 0x390   : > { %v2501_v17 = vadd.f32 %v2500_v39, %v6785_v15  ;;  %2865 = vmatmul.bf16.gmra.mxu0 %v2091_v40  ;;  %v2668_v0 = vadd.f32 %v2667_v12, %v6801_v33 }
 0x392   : > { %v3001_v20 = vmax.f32 %v2501_v17, 0.0  ;;  %v2998_v34 = vmax.f32 %v2668_v0, 0.0  ;;  %v2042_v17 = vmax.f32 %v1914_v41, 0.0  ;;  %v2041_v0 = vmax.f32 %v1912_v37, 0.0 }
 0x394   : > { %v3322_v21 = vmax.f32 %v2997_v8, %v3001_v20  ;;  %2542 = vmatmul.bf16.gmra.mxu2 %v6798_v14 }
 0x396   : > { %v1956_v29 = vpop.f32.mrf.mxu1 }
 0x397   : > { %v2503_v55 = vpop.f32.mrf.mxu2  ;;  %v2669_v30 = vpop.f32.mrf.mxu3  ;;  %v1957_v12 = vadd.f32 %v1956_v29, %v6621_v45 }
 0x398   : > { %v2504_v46 = vadd.f32 %v2503_v55, %v6785_v15  ;;  %v2670_v40 = vadd.f32 %v2669_v30, %v6801_v33 }
 0x399   : > { %2363 = vmatmul.bf16.gmra.mxu1 %v6751_v58  ;;  %v2059_v42 = vmax.f32 %v1957_v12, 0.0  ;;  %v6831_v12 = vperm.slane %v6780_v16, 0 }
 0x39a   : > { %v3005_v23 = vmax.f32 %v2504_v46, 0.0  ;;  %v3002_v61 = vmax.f32 %v2670_v40, 0.0  ;;  %v6821_v40 = vpack.c.bf16 %v2042_v17, %v2041_v0 }
 0x39c   : > { %v3323_v31 = vmax.f32 %v3322_v21, %v3005_v23  ;;  %v3391_v39 = vmax.f32 %v2998_v34, %v3002_v61  ;;  %2711 = vmatmul.bf16.gmra.mxu3 %v6798_v14 }
 0x39d   : > { %v6815_v36 = vpop.f32.mrf.mxu0 }
 0x39e   : > { %v1958_v8 = vpop.f32.mrf.mxu1 }
 0x39f   : > { %v1959_v20 = vadd.f32 %v1958_v8, %v6621_v45  ;;  %v2505_v55 = vpop.f32.mrf.mxu2  ;;  %v2672_v62 = vpop.f32.mrf.mxu3 }
 0x3a0   : > { %v2506_v30 = vadd.f32 %v2505_v55, %v6785_v15  ;;  %v2673_v46 = vadd.f32 %v2672_v62, %v6801_v33  ;;  %2870 = vmatmul.bf16.gmra.mxu0 %v6751_v58 }
 0x3a1   : > { %v2060_v21 = vmax.f32 %v1959_v20, 0.0  ;;  %v1917_v20 = vadd.f32 %v6758_v32, %v6621_v45 }
 0x3a2   : > { %v3009_v29 = vmax.f32 %v2506_v30, 0.0  ;;  %v3006_v34 = vmax.f32 %v2673_v46, 0.0  ;;  %v5004_v46 = vld [vmem:[%s7890_s4 + $0xf4] sm:$0xf0] }
 0x3a3   : > { %v6823_v23 = vpack.c.bf16 %v2060_v21, %v2059_v42 }
 0x3a4   : > { %v3324_v41 = vmax.f32 %v3323_v31, %v3009_v29  ;;  %v3392_v61 = vmax.f32 %v3391_v39, %v3006_v34  ;;  %2547 = vmatmul.bf16.gmra.mxu2 %v6821_v40  ;;  %v1919_v31 = vadd.f32 %v6769_v26, %v6621_v45 }
 0x3a5   : > { %v6826_v8 = vpop.f32.mrf.mxu0 }
 0x3a6   : > { %v2329_v37 = vpop.f32.mrf.mxu1  ;;  %v2044_v29 = vmax.f32 %v1919_v31, 0.0 }
 0x3a7   : > { %v2508_v55 = vpop.f32.mrf.mxu2  ;;  %v2674_v24 = vpop.f32.mrf.mxu3  ;;  %v2330_v42 = vadd.f32 %v2329_v37, %v6831_v12 }
 0x3a8   : > { %v2509_v62 = vadd.f32 %v2508_v55, %v6785_v15  ;;  %v2675_v58 = vadd.f32 %v2674_v24, %v6801_v33  ;;  %v4704_v24 = vld [vmem:[%s7890_s4 + $0xf0] sm:$0xf]  ;;  %v2043_v55 = vmax.f32 %v1917_v20, 0.0 }
 0x3a9   : > { %2368 = vmatmul.bf16.gmra.mxu1 %v6767_v35  ;;  %v4705_v21 = vor.u32 %v5004_v46, %v4704_v24  ;;  %v2996_v37 = vmax.f32 %v2330_v42, 0.0  ;;  %v4640_v20 = vld [vmem:[%s7890_s4 + $0x70] sm:$0xf] }
 0x3aa   : > { %v3013_v39 = vmax.f32 %v2509_v62, 0.0  ;;  %v3010_v17 = vmax.f32 %v2675_v58, 0.0  ;;  %v6848_v62 = vperm.slane %v6780_v16, 3  ;;  %v6853_v24 = vpack.c.bf16 %v2044_v29, %v2043_v55  ;;  %v4988_v16 = vld [vmem:[%s7890_s4 + $0x74] sm:$0xf0] }
 0x3ab   : > { %3970 = vmatpush.bf16.msra.mxu2 %v4705_v21 }
 0x3ac   : > { %v3325_v0 = vmax.f32 %v3324_v41, %v3013_v39  ;;  %v3393_v30 = vmax.f32 %v3392_v61, %v3010_v17  ;;  %2716 = vmatmul.bf16.gmra.mxu3 %v6821_v40 }
 0x3ad   : > { %v2836_v26 = vpop.f32.mrf.mxu0 }
 0x3ae   : > { %v2331_v34 = vpop.f32.mrf.mxu1  ;;  %v2837_v21 = vadd.f32 %v2836_v26, %v6848_v62 }
 0x3af   : > { %v2332_v32 = vadd.f32 %v2331_v34, %v6831_v12  ;;  %v2510_v41 = vpop.f32.mrf.mxu2  ;;  %v2677_v61 = vpop.f32.mrf.mxu3 }
 0x3b0   : > { %v2511_v58 = vadd.f32 %v2510_v41, %v6785_v15  ;;  %v2678_v39 = vadd.f32 %v2677_v61, %v6801_v33  ;;  %2875 = vmatmul.bf16.gmra.mxu0 %v6767_v35  ;;  %v4641_v35 = vor.u32 %v4988_v16, %v4640_v20 }
 0x3b1   : > { %v3000_v17 = vmax.f32 %v2332_v32, 0.0 }
 0x3b2   : > { %v3017_v31 = vmax.f32 %v2511_v58, 0.0  ;;  %v3014_v46 = vmax.f32 %v2678_v39, 0.0  ;;  %3957 = vmatpush.bf16.msra.mxu1 %v4641_v35  ;;  %v4768_v35 = vld [vmem:[%s7890_s4 + $0x170] sm:$0xf] }
 0x3b3   : > { %v3253_v34 = vmax.f32 %v2996_v37, %v3000_v17  ;;  %v2999_v37 = vmax.f32 %v2837_v21, 0.0  ;;  %v5020_v21 = vld [vmem:[%s7890_s4 + $0x174] sm:$0xf0] }
 0x3b4   : > { %v3326_v41 = vmax.f32 %v3325_v0, %v3017_v31  ;;  %v3394_v61 = vmax.f32 %v3393_v30, %v3014_v46  ;;  %2552 = vmatmul.bf16.gmra.mxu2 %v6853_v24  ;;  %v1924_v30 = vadd.f32 %v6804_v9, %v6621_v45  ;;  %v4769_v9 = vor.u32 %v5020_v21, %v4768_v35 }
 0x3b5   : > { %v2838_v42 = vpop.f32.mrf.mxu0 }
 0x3b6   : > { %v2839_v29 = vadd.f32 %v2838_v42, %v6848_v62  ;;  %v2334_v32 = vpop.f32.mrf.mxu1  ;;  %v1922_v42 = vadd.f32 %v6787_v27, %v6621_v45  ;;  %3983 = vmatpush.bf16.msra.mxu3 %v4769_v9 }
 0x3b7   : > { %v2335_v55 = vadd.f32 %v2334_v32, %v6831_v12  ;;  %v2513_v58 = vpop.f32.mrf.mxu2  ;;  %v2679_v39 = vpop.f32.mrf.mxu3 }
 0x3b8   : > { %v3003_v17 = vmax.f32 %v2839_v29, 0.0  ;;  %v2514_v56 = vadd.f32 %v2513_v58, %v6785_v15  ;;  %v2680_v26 = vadd.f32 %v2679_v39, %v6801_v33 }
 0x3b9   : > { %v3004_v0 = vmax.f32 %v2335_v55, 0.0  ;;  %2373 = vmatmul.bf16.gmra.mxu1 %v6798_v14 }
 0x3ba   : > { %v3460_v31 = vmax.f32 %v2999_v37, %v3003_v17  ;;  %v3021_v46 = vmax.f32 %v2514_v56, 0.0  ;;  %v3018_v20 = vmax.f32 %v2680_v26, 0.0  ;;  %v2046_v56 = vmax.f32 %v1924_v30, 0.0 }
 0x3bb   : > { %v3254_v16 = vmax.f32 %v3253_v34, %v3004_v0  ;;  %v2045_v26 = vmax.f32 %v1922_v42, 0.0 }
 0x3bc   : > { %v3327_v29 = vmax.f32 %v3326_v41, %v3021_v46  ;;  %v3395_v32 = vmax.f32 %v3394_v61, %v3018_v20  ;;  %2721 = vmatmul.bf16.gmra.mxu3 %v6853_v24 }
 0x3bd   : > { %v2841_v55 = vpop.f32.mrf.mxu0  ;;  %v6884_v61 = vpack.c.bf16 %v2046_v56, %v2045_v26 }
 0x3be   : > { %v2842_v34 = vadd.f32 %v2841_v55, %v6848_v62  ;;  %v2336_v58 = vpop.f32.mrf.mxu1 }
 0x3bf   : > { %v2337_v39 = vadd.f32 %v2336_v58, %v6831_v12  ;;  %v2515_v37 = vpop.f32.mrf.mxu2  ;;  %v2682_v17 = vpop.f32.mrf.mxu3 }
 0x3c0   : > { %v3007_v0 = vmax.f32 %v2842_v34, 0.0  ;;  %v2516_v60 = vadd.f32 %v2515_v37, %v6785_v15  ;;  %v2683_v27 = vadd.f32 %v2682_v17, %v6801_v33  ;;  %2880 = vmatmul.bf16.gmra.mxu0 %v6798_v14 }
 0x3c1   : > { %v3008_v41 = vmax.f32 %v2337_v39, 0.0 }
 0x3c2   : > { %v3461_v30 = vmax.f32 %v3460_v31, %v3007_v0  ;;  %v3025_v46 = vmax.f32 %v2516_v60, 0.0  ;;  %v3022_v20 = vmax.f32 %v2683_v27, 0.0  ;;  %v1927_v0 = vadd.f32 %v6815_v36, %v6621_v45 }
 0x3c3   : > { %v3255_v35 = vmax.f32 %v3254_v16, %v3008_v41  ;;  %v1929_v16 = vadd.f32 %v6826_v8, %v6621_v45 }
 0x3c4   : > { %v3328_v21 = vmax.f32 %v3327_v29, %v3025_v46  ;;  %v3396_v9 = vmax.f32 %v3395_v32, %v3022_v20  ;;  %2557 = vmatmul.bf16.gmra.mxu2 %v6884_v61 }
 0x3c5   : > { %v2843_v55 = vpop.f32.mrf.mxu0  ;;  %v2048_v20 = vmax.f32 %v1929_v16, 0.0 }
 0x3c6   : > { %v2844_v42 = vadd.f32 %v2843_v55, %v6848_v62  ;;  %v2339_v34 = vpop.f32.mrf.mxu1 }
 0x3c7   : > { %v2340_v58 = vadd.f32 %v2339_v34, %v6831_v12  ;;  %v2518_v37 = vpop.f32.mrf.mxu2  ;;  %v2684_v17 = vpop.f32.mrf.mxu3 }
 0x3c8   : > { %v3011_v14 = vmax.f32 %v2844_v42, 0.0  ;;  %v2519_v56 = vadd.f32 %v2518_v37, %v6785_v15  ;;  %v2685_v31 = vadd.f32 %v2684_v17, %v6801_v33 }
 0x3c9   : > { %v3012_v60 = vmax.f32 %v2340_v58, 0.0  ;;  %2378 = vmatmul.bf16.gmra.mxu1 %v6821_v40 }
 0x3ca   : > { %v3462_v29 = vmax.f32 %v3461_v30, %v3011_v14  ;;  %v3029_v32 = vmax.f32 %v2519_v56, 0.0  ;;  %v3026_v39 = vmax.f32 %v2685_v31, 0.0  ;;  %v2047_v30 = vmax.f32 %v1927_v0, 0.0 }
 0x3cb   : > { %v3256_v26 = vmax.f32 %v3255_v35, %v3012_v60 }
 0x3cc   : > { %v3329_v27 = vmax.f32 %v3328_v21, %v3029_v32  ;;  %v3397_v41 = vmax.f32 %v3396_v9, %v3026_v39  ;;  %2726 = vmatmul.bf16.gmra.mxu3 %v6884_v61  ;;  %v6902_v21 = vpack.c.bf16 %v2048_v20, %v2047_v30  ;;  %v1932_v30 = vadd.f32 %v6703_v53, %v6621_v45 }
 0x3cd   : > { %v2846_v46 = vpop.f32.mrf.mxu0 }
 0x3ce   : > { %v2847_v55 = vadd.f32 %v2846_v46, %v6848_v62  ;;  %v2341_v42 = vpop.f32.mrf.mxu1 }
 0x3cf   : > { %v2342_v34 = vadd.f32 %v2341_v42, %v6831_v12  ;;  %v2520_v58 = vpop.f32.mrf.mxu2  ;;  %v2687_v8 = vpop.f32.mrf.mxu3 }
 0x3d0   : > { %v3015_v37 = vmax.f32 %v2847_v55, 0.0  ;;  %v2521_v35 = vadd.f32 %v2520_v58, %v6785_v15  ;;  %v2688_v17 = vadd.f32 %v2687_v8, %v6801_v33  ;;  %2885 = vmatmul.bf16.gmra.mxu0 %v6821_v40 }
 0x3d1   : > { %v3016_v36 = vmax.f32 %v2342_v34, 0.0 }
 0x3d2   : > { %v3463_v9 = vmax.f32 %v3462_v29, %v3015_v37  ;;  %v3033_v14 = vmax.f32 %v2521_v35, 0.0  ;;  %v3030_v56 = vmax.f32 %v2688_v17, 0.0 }
 0x3d3   : > { %v3257_v31 = vmax.f32 %v3256_v26, %v3016_v36  ;;  %v1934_v26 = vadd.f32 %v6709_v13, %v6621_v45 }
 0x3d4   : > { %v3330_v60 = vmax.f32 %v3329_v27, %v3033_v14  ;;  %v3398_v16 = vmax.f32 %v3397_v41, %v3030_v56  ;;  %2562 = vmatmul.bf16.gmra.mxu2 %v6902_v21 }
 0x3d5   : > { %v2848_v32 = vpop.f32.mrf.mxu0  ;;  %v2050_v36 = vmax.f32 %v1934_v26, 0.0 }
 0x3d6   : > { %v2849_v39 = vadd.f32 %v2848_v32, %v6848_v62  ;;  %v2344_v0 = vpop.f32.mrf.mxu1 }
 0x3d7   : > { %v2345_v46 = vadd.f32 %v2344_v0, %v6831_v12  ;;  %v2523_v55 = vpop.f32.mrf.mxu2  ;;  %v2689_v42 = vpop.f32.mrf.mxu3 }
 0x3d8   : > { %v3019_v40 = vmax.f32 %v2849_v39, 0.0  ;;  %v2524_v20 = vadd.f32 %v2523_v55, %v6785_v15  ;;  %v2690_v29 = vadd.f32 %v2689_v42, %v6801_v33 }
 0x3d9   : > { %v3020_v34 = vmax.f32 %v2345_v46, 0.0  ;;  %2383 = vmatmul.bf16.gmra.mxu1 %v6853_v24 }
 0x3da   : > { %v3464_v27 = vmax.f32 %v3463_v9, %v3019_v40  ;;  %v3037_v41 = vmax.f32 %v2524_v20, 0.0  ;;  %v3034_v58 = vmax.f32 %v2690_v29, 0.0  ;;  %v2049_v9 = vmax.f32 %v1932_v30, 0.0 }
 0x3db   : > { %v3258_v8 = vmax.f32 %v3257_v31, %v3020_v34 }
 0x3dc   : > { %v3331_v37 = vmax.f32 %v3330_v60, %v3037_v41  ;;  %v3399_v35 = vmax.f32 %v3398_v16, %v3034_v58  ;;  %2731 = vmatmul.bf16.gmra.mxu3 %v6902_v21  ;;  %v6920_v60 = vpack.c.bf16 %v2050_v36, %v2049_v9 }
 0x3dd   : > { %v2851_v17 = vpop.f32.mrf.mxu0 }
 0x3de   : > { %v2852_v14 = vadd.f32 %v2851_v17, %v6848_v62  ;;  %v2346_v56 = vpop.f32.mrf.mxu1 }
 0x3df   : > { %v2347_v32 = vadd.f32 %v2346_v56, %v6831_v12  ;;  %v2525_v39 = vpop.f32.mrf.mxu2  ;;  %v2692_v13 = vpop.f32.mrf.mxu3 }
 0x3e0   : > { %v3023_v0 = vmax.f32 %v2852_v14, 0.0  ;;  %v2526_v31 = vadd.f32 %v2525_v39, %v6785_v15  ;;  %v2693_v46 = vadd.f32 %v2692_v13, %v6801_v33  ;;  %2890 = vmatmul.bf16.gmra.mxu0 %v6853_v24  ;;  %v1937_v39 = vadd.f32 %v6719_v7, %v6621_v45 }
 0x3e1   : > { %v3024_v53 = vmax.f32 %v2347_v32, 0.0 }
 0x3e2   : > { %v3465_v16 = vmax.f32 %v3464_v27, %v3023_v0  ;;  %v3041_v55 = vmax.f32 %v2526_v31, 0.0  ;;  %v3038_v42 = vmax.f32 %v2693_v46, 0.0  ;;  %v4696_v0 = vld [vmem:[%s7890_s4 + $0xe0] sm:$0xf]  ;;  %v5002_v31 = vld [vmem:[%s7890_s4 + $0xe4] sm:$0xf0] }
 0x3e3   : > { %v3259_v40 = vmax.f32 %v3258_v8, %v3024_v53  ;;  %v1939_v8 = vadd.f32 %v6727_v3, %v6621_v45  ;;  %v4697_v46 = vor.u32 %v5002_v31, %v4696_v0 }
 0x3e4   : > { %v3332_v20 = vmax.f32 %v3331_v37, %v3041_v55  ;;  %v3400_v29 = vmax.f32 %v3399_v35, %v3038_v42  ;;  %2567 = vmatmul.bf16.gmra.mxu2 %v6920_v60 }
 0x3e5   : > { %v2853_v34 = vpop.f32.mrf.mxu0  ;;  %v2052_v53 = vmax.f32 %v1939_v8, 0.0  ;;  %3971 = vmatpush.bf16.msra.mxu2 %v4697_v46 }
 0x3e6   : > { %v2854_v26 = vadd.f32 %v2853_v34, %v6848_v62  ;;  %v2349_v41 = vpop.f32.mrf.mxu1 }
 0x3e7   : > { %v2350_v58 = vadd.f32 %v2349_v41, %v6831_v12  ;;  %v2528_v30 = vpop.f32.mrf.mxu2  ;;  %v2694_v17 = vpop.f32.mrf.mxu3 }
 0x3e8   : > { %v3027_v24 = vmax.f32 %v2854_v26, 0.0  ;;  %v2529_v36 = vadd.f32 %v2528_v30, %v6785_v15  ;;  %v2695_v27 = vadd.f32 %v2694_v17, %v6801_v33 }
 0x3e9   : > { %v3028_v14 = vmax.f32 %v2350_v58, 0.0  ;;  %2388 = vmatmul.bf16.gmra.mxu1 %v6884_v61 }
 0x3ea   : > { %v3466_v37 = vmax.f32 %v3465_v16, %v3027_v24  ;;  %v3045_v35 = vmax.f32 %v2529_v36, 0.0  ;;  %v3042_v56 = vmax.f32 %v2695_v27, 0.0  ;;  %v4632_v27 = vld [vmem:[%s7890_s4 + $0x60] sm:$0xf] }
 0x3eb   : > { %v3260_v32 = vmax.f32 %v3259_v40, %v3028_v14  ;;  %v4986_v14 = vld [vmem:[%s7890_s4 + $0x64] sm:$0xf0] }
 0x3ec   : > { %v3333_v13 = vmax.f32 %v3332_v20, %v3045_v35  ;;  %v3401_v9 = vmax.f32 %v3400_v29, %v3042_v56  ;;  %2736 = vmatmul.bf16.gmra.mxu3 %v6920_v60  ;;  %v2051_v20 = vmax.f32 %v1937_v39, 0.0 }
 0x3ed   : > { %v2856_v3 = vpop.f32.mrf.mxu0 }
 0x3ee   : > { %v2857_v16 = vadd.f32 %v2856_v3, %v6848_v62  ;;  %v2351_v55 = vpop.f32.mrf.mxu1  ;;  %v6944_v58 = vpack.c.bf16 %v2052_v53, %v2051_v20  ;;  %v5018_v20 = vld [vmem:[%s7890_s4 + $0x164] sm:$0xf0] }
 0x3ef   : > { %v2352_v7 = vadd.f32 %v2351_v55, %v6831_v12  ;;  %v2530_v42 = vpop.f32.mrf.mxu2  ;;  %v2697_v40 = vpop.f32.mrf.mxu3 }
 0x3f0   : > { %v3031_v29 = vmax.f32 %v2857_v16, 0.0  ;;  %v2531_v34 = vadd.f32 %v2530_v42, %v6785_v15  ;;  %v2698_v26 = vadd.f32 %v2697_v40, %v6801_v33  ;;  %2895 = vmatmul.bf16.gmra.mxu0 %v6884_v61  ;;  %v4633_v61 = vor.u32 %v4986_v14, %v4632_v27  ;;  %v4760_v40 = vld [vmem:[%s7890_s4 + $0x160] sm:$0xf] }
 0x3f1   : > { %v3032_v41 = vmax.f32 %v2352_v7, 0.0 }
 0x3f2   : > { %v3467_v30 = vmax.f32 %v3466_v37, %v3031_v29  ;;  %v3049_v17 = vmax.f32 %v2531_v34, 0.0  ;;  %v3046_v24 = vmax.f32 %v2698_v26, 0.0  ;;  %3958 = vmatpush.bf16.msra.mxu1 %v4633_v61  ;;  %v1942_v29 = vadd.f32 %v6735_v63, %v6621_v45 }
 0x3f3   : > { %v3261_v36 = vmax.f32 %v3260_v32, %v3032_v41 }
 0x3f4   : > { %v3334_v8 = vmax.f32 %v3333_v13, %v3049_v17  ;;  %v3402_v35 = vmax.f32 %v3401_v9, %v3046_v24  ;;  %2572 = vmatmul.bf16.gmra.mxu2 %v6944_v58  ;;  %v1944_v13 = vadd.f32 %v6744_v48, %v6621_v45  ;;  %v4761_v48 = vor.u32 %v5018_v20, %v4760_v40 }
 0x3f5   : > { %v2858_v56 = vpop.f32.mrf.mxu0  ;;  %v2053_v61 = vmax.f32 %v1942_v29, 0.0 }
 0x3f6   : > { %v2859_v39 = vadd.f32 %v2858_v56, %v6848_v62  ;;  %v2354_v37 = vpop.f32.mrf.mxu1  ;;  %3984 = vmatpush.bf16.msra.mxu3 %v4761_v48 }
 0x3f7   : > { %v2355_v32 = vadd.f32 %v2354_v37, %v6831_v12  ;;  %v2533_v0 = vpop.f32.mrf.mxu2  ;;  %v2699_v31 = vpop.f32.mrf.mxu3 }
 0x3f8   : > { %v3035_v3 = vmax.f32 %v2859_v39, 0.0  ;;  %v2534_v46 = vadd.f32 %v2533_v0, %v6785_v15  ;;  %v2700_v53 = vadd.f32 %v2699_v31, %v6801_v33 }
 0x3f9   : > { %v3036_v16 = vmax.f32 %v2355_v32, 0.0  ;;  %2393 = vmatmul.bf16.gmra.mxu1 %v6902_v21 }
 0x3fa   : > { %v3468_v9 = vmax.f32 %v3467_v30, %v3035_v3  ;;  %v3053_v55 = vmax.f32 %v2534_v46, 0.0  ;;  %v3050_v7 = vmax.f32 %v2700_v53, 0.0  ;;  %v2054_v30 = vmax.f32 %v1944_v13, 0.0 }
 0x3fb   : > { %v3262_v42 = vmax.f32 %v3261_v36, %v3036_v16 }
 0x3fc   : > { %v3335_v34 = vmax.f32 %v3334_v8, %v3053_v55  ;;  %v3403_v26 = vmax.f32 %v3402_v35, %v3050_v7  ;;  %2741 = vmatmul.bf16.gmra.mxu3 %v6944_v58  ;;  %v6974_v8 = vpack.c.bf16 %v2054_v30, %v2053_v61 }
 0x3fd   : > { %v2861_v41 = vpop.f32.mrf.mxu0 }
 0x3fe   : > { %v2862_v17 = vadd.f32 %v2861_v41, %v6848_v62  ;;  %v2356_v24 = vpop.f32.mrf.mxu1 }
 0x3ff   : > { %v2357_v36 = vadd.f32 %v2356_v24, %v6831_v12  ;;  %v2535_v27 = vpop.f32.mrf.mxu2  ;;  %v2702_v14 = vpop.f32.mrf.mxu3 }
 0x400   : > { %v3039_v56 = vmax.f32 %v2862_v17, 0.0  ;;  %v2536_v39 = vadd.f32 %v2535_v27, %v6785_v15  ;;  %v2703_v45 = vadd.f32 %v2702_v14, %v6801_v33  ;;  %2900 = vmatmul.bf16.gmra.mxu0 %v6902_v21 }
 0x401   : > { %v3040_v63 = vmax.f32 %v2357_v36, 0.0 }
 0x402   : > { %v3469_v35 = vmax.f32 %v3468_v9, %v3039_v56  ;;  %v3057_v37 = vmax.f32 %v2536_v39, 0.0  ;;  %v3054_v32 = vmax.f32 %v2703_v45, 0.0 }
 0x403   : > { %v3263_v0 = vmax.f32 %v3262_v42, %v3040_v63  ;;  %v6985_v42 = vld [vmem:[%s7893_s7 + $0x1] ss:$0 sm:$0xff] }
 0x404   : > { %v3336_v31 = vmax.f32 %v3335_v34, %v3057_v37  ;;  %v3404_v3 = vmax.f32 %v3403_v26, %v3054_v32  ;;  %2577 = vmatmul.bf16.gmra.mxu2 %v6974_v8  ;;  %v1949_v29 = vadd.f32 %v6985_v42, %v6762_v50  ;;  %v1947_v30 = vadd.f32 %v6985_v42, %v6753_v28 }
 0x405   : > { %v2863_v46 = vpop.f32.mrf.mxu0 }
 0x406   : > { %v2864_v53 = vadd.f32 %v2863_v46, %v6848_v62  ;;  %v2359_v16 = vpop.f32.mrf.mxu1  ;;  %v2056_v27 = vmax.f32 %v1949_v29, 0.0  ;;  %v2055_v45 = vmax.f32 %v1947_v30, 0.0 }
 0x407   : > { %v2360_v13 = vadd.f32 %v2359_v16, %v6831_v12  ;;  %v2538_v55 = vpop.f32.mrf.mxu2  ;;  %v2704_v7 = vpop.f32.mrf.mxu3 }
 0x408   : > { %v3043_v21 = vmax.f32 %v2864_v53, 0.0  ;;  %v2539_v40 = vadd.f32 %v2538_v55, %v6785_v15  ;;  %v2705_v9 = vadd.f32 %v2704_v7, %v6801_v33  ;;  %v6997_v32 = vpack.c.bf16 %v2056_v27, %v2055_v45 }
 0x409   : > { %v3044_v20 = vmax.f32 %v2360_v13, 0.0  ;;  %2398 = vmatmul.bf16.gmra.mxu1 %v6920_v60 }
 0x40a   : > { %v3470_v34 = vmax.f32 %v3469_v35, %v3043_v21  ;;  %v3061_v26 = vmax.f32 %v2539_v40, 0.0  ;;  %v3058_v48 = vmax.f32 %v2705_v9, 0.0 }
 0x40b   : > { %v3264_v41 = vmax.f32 %v3263_v0, %v3044_v20 }
 0x40c   : > { %v3337_v17 = vmax.f32 %v3336_v31, %v3061_v26  ;;  %v3405_v24 = vmax.f32 %v3404_v3, %v3058_v48  ;;  %2746 = vmatmul.bf16.gmra.mxu3 %v6974_v8  ;;  %v1954_v26 = vadd.f32 %v6985_v42, %v6794_v22 }
 0x40d   : > { %v2866_v36 = vpop.f32.mrf.mxu0 }
 0x40e   : > { %v2867_v14 = vadd.f32 %v2866_v36, %v6848_v62  ;;  %v2361_v61 = vpop.f32.mrf.mxu1 }
 0x40f   : > { %v2362_v56 = vadd.f32 %v2361_v61, %v6831_v12  ;;  %v2540_v39 = vpop.f32.mrf.mxu2  ;;  %v2707_v50 = vpop.f32.mrf.mxu3  ;;  %v2058_v61 = vmax.f32 %v1954_v26, 0.0 }
 0x410   : > { %v3047_v63 = vmax.f32 %v2867_v14, 0.0  ;;  %v2541_v35 = vadd.f32 %v2540_v39, %v6785_v15  ;;  %v2708_v37 = vadd.f32 %v2707_v50, %v6801_v33  ;;  %2905 = vmatmul.bf16.gmra.mxu0 %v6920_v60 }
 0x411   : > { %v3048_v28 = vmax.f32 %v2362_v56, 0.0 }
 0x412   : > { %v3471_v0 = vmax.f32 %v3470_v34, %v3047_v63  ;;  %v3065_v31 = vmax.f32 %v2541_v35, 0.0  ;;  %v3062_v3 = vmax.f32 %v2708_v37, 0.0 }
 0x413   : > { %v3265_v46 = vmax.f32 %v3264_v41, %v3048_v28 }
 0x414   : > { %v3338_v53 = vmax.f32 %v3337_v17, %v3065_v31  ;;  %v3406_v16 = vmax.f32 %v3405_v24, %v3062_v3  ;;  %2582 = vmatmul.bf16.gmra.mxu2 %v6997_v32  ;;  %v1952_v24 = vadd.f32 %v6985_v42, %v6771_v11 }
 0x415   : > { %v2868_v13 = vpop.f32.mrf.mxu0 }
 0x416   : > { %v2869_v55 = vadd.f32 %v2868_v13, %v6848_v62  ;;  %v2364_v7 = vpop.f32.mrf.mxu1  ;;  %v2057_v63 = vmax.f32 %v1952_v24, 0.0 }
 0x417   : > { %v2365_v21 = vadd.f32 %v2364_v7, %v6831_v12  ;;  %v2543_v40 = vpop.f32.mrf.mxu2  ;;  %v2709_v9 = vpop.f32.mrf.mxu3 }
 0x418   : > { %v3051_v60 = vmax.f32 %v2869_v55, 0.0  ;;  %v2544_v20 = vadd.f32 %v2543_v40, %v6785_v15  ;;  %v2710_v29 = vadd.f32 %v2709_v9, %v6801_v33 }
 0x419   : > { %v3052_v34 = vmax.f32 %v2365_v21, 0.0  ;;  %2403 = vmatmul.bf16.gmra.mxu1 %v6944_v58 }
 0x41a   : > { %v3472_v48 = vmax.f32 %v3471_v0, %v3051_v60  ;;  %v3069_v41 = vmax.f32 %v2544_v20, 0.0  ;;  %v3066_v30 = vmax.f32 %v2710_v29, 0.0  ;;  %v7015_v0 = vpack.c.bf16 %v2058_v61, %v2057_v63 }
 0x41b   : > { %v3266_v17 = vmax.f32 %v3265_v46, %v3052_v34 }
 0x41c   : > { %v3339_v36 = vmax.f32 %v3338_v53, %v3069_v41  ;;  %v3407_v27 = vmax.f32 %v3406_v16, %v3066_v30  ;;  %2751 = vmatmul.bf16.gmra.mxu3 %v6997_v32 }
 0x41d   : > { %v2871_v14 = vpop.f32.mrf.mxu0 }
 0x41e   : > { %v2872_v56 = vadd.f32 %v2871_v14, %v6848_v62  ;;  %v2366_v39 = vpop.f32.mrf.mxu1 }
 0x41f   : > { %v2367_v50 = vadd.f32 %v2366_v39, %v6831_v12  ;;  %v2545_v45 = vpop.f32.mrf.mxu2  ;;  %v2712_v22 = vpop.f32.mrf.mxu3 }
 0x420   : > { %v3055_v35 = vmax.f32 %v2872_v56, 0.0  ;;  %v2546_v37 = vadd.f32 %v2545_v45, %v6785_v15  ;;  %v2713_v28 = vadd.f32 %v2712_v22, %v6801_v33  ;;  %2910 = vmatmul.bf16.gmra.mxu0 %v6944_v58 }
 0x421   : > { %v3056_v11 = vmax.f32 %v2367_v50, 0.0 }
 0x422   : > { %v3473_v31 = vmax.f32 %v3472_v48, %v3055_v35  ;;  %v3073_v3 = vmax.f32 %v2546_v37, 0.0  ;;  %v3070_v46 = vmax.f32 %v2713_v28, 0.0 }
 0x423   : > { %v3267_v53 = vmax.f32 %v3266_v17, %v3056_v11 }
 0x424   : > { %v3340_v16 = vmax.f32 %v3339_v36, %v3073_v3  ;;  %v3408_v13 = vmax.f32 %v3407_v27, %v3070_v46  ;;  %2587 = vmatmul.bf16.gmra.mxu2 %v7015_v0  ;;  %v4688_v36 = vld [vmem:[%s7890_s4 + $0xd0] sm:$0xf]  ;;  %v5000_v27 = vld [vmem:[%s7890_s4 + $0xd4] sm:$0xf0] }
 0x425   : > { %v2873_v55 = vpop.f32.mrf.mxu0  ;;  %v4689_v61 = vor.u32 %v5000_v27, %v4688_v36  ;;  %v4752_v36 = vld [vmem:[%s7890_s4 + $0x150] sm:$0xf]  ;;  %v5016_v27 = vld [vmem:[%s7890_s4 + $0x154] sm:$0xf0] }
 0x426   : > { %v2874_v7 = vadd.f32 %v2873_v55, %v6848_v62  ;;  %v2369_v21 = vpop.f32.mrf.mxu1 }
 0x427   : > { %v2370_v40 = vadd.f32 %v2369_v21, %v6831_v12  ;;  %v2548_v9 = vpop.f32.mrf.mxu2  ;;  %v2714_v60 = vpop.f32.mrf.mxu3  ;;  %3972 = vmatpush.bf16.msra.mxu2 %v4689_v61 }
 0x428   : > { %v3059_v58 = vmax.f32 %v2874_v7, 0.0  ;;  %v2549_v20 = vadd.f32 %v2548_v9, %v6785_v15  ;;  %v2715_v29 = vadd.f32 %v2714_v60, %v6801_v33 }
 0x429   : > { %v3060_v34 = vmax.f32 %v2370_v40, 0.0  ;;  %2408 = vmatmul.bf16.gmra.mxu1 %v6974_v8 }
 0x42a   : > { %v3474_v26 = vmax.f32 %v3473_v31, %v3059_v58  ;;  %v3077_v48 = vmax.f32 %v2549_v20, 0.0  ;;  %v3074_v41 = vmax.f32 %v2715_v29, 0.0 }
 0x42b   : > { %v3268_v30 = vmax.f32 %v3267_v53, %v3060_v34  ;;  %v4624_v53 = vld [vmem:[%s7890_s4 + $0x50] sm:$0xf] }
 0x42c   : > { %v3341_v17 = vmax.f32 %v3340_v16, %v3077_v48  ;;  %v3409_v24 = vmax.f32 %v3408_v13, %v3074_v41  ;;  %2756 = vmatmul.bf16.gmra.mxu3 %v7015_v0  ;;  %v4984_v16 = vld [vmem:[%s7890_s4 + $0x54] sm:$0xf0]  ;;  %v1964_v48 = vadd.f32 %v6985_v42, %v6715_v6  ;;  %v4753_v6 = vor.u32 %v5016_v27, %v4752_v36 }
 0x42d   : > { %v2876_v14 = vpop.f32.mrf.mxu0  ;;  %v4625_v7 = vor.u32 %v4984_v16, %v4624_v53  ;;  %v1967_v36 = vadd.f32 %v6985_v42, %v6723_v25 }
 0x42e   : > { %v2877_v56 = vadd.f32 %v2876_v14, %v6848_v62  ;;  %v2371_v39 = vpop.f32.mrf.mxu1  ;;  %v1962_v14 = vadd.f32 %v6985_v42, %v6707_v43  ;;  %3985 = vmatpush.bf16.msra.mxu3 %v4753_v6 }
 0x42f   : > { %v2372_v50 = vadd.f32 %v2371_v39, %v6831_v12  ;;  %v2550_v45 = vpop.f32.mrf.mxu2  ;;  %v2717_v22 = vpop.f32.mrf.mxu3  ;;  %3959 = vmatpush.bf16.msra.mxu1 %v4625_v7 }
 0x430   : > { %v3063_v63 = vmax.f32 %v2877_v56, 0.0  ;;  %v2551_v35 = vadd.f32 %v2550_v45, %v6785_v15  ;;  %v2718_v37 = vadd.f32 %v2717_v22, %v6801_v33  ;;  %2915 = vmatmul.bf16.gmra.mxu0 %v6974_v8 }
 0x431   : > { %v3064_v28 = vmax.f32 %v2372_v50, 0.0  ;;  %v2062_v50 = vmax.f32 %v1964_v48, 0.0  ;;  %v1969_v48 = vadd.f32 %v6985_v42, %v6733_v19 }
 0x432   : > { %v3475_v11 = vmax.f32 %v3474_v26, %v3063_v63  ;;  %v3081_v31 = vmax.f32 %v2551_v35, 0.0  ;;  %v3078_v3 = vmax.f32 %v2718_v37, 0.0 }
 0x433   : > { %v3269_v46 = vmax.f32 %v3268_v30, %v3064_v28  ;;  %v2061_v28 = vmax.f32 %v1962_v14, 0.0 }
 0x434   : > { %v3342_v13 = vmax.f32 %v3341_v17, %v3081_v31  ;;  %v3410_v55 = vmax.f32 %v3409_v24, %v3078_v3  ;;  %2592 = vmatmul.bf16.gmra.mxu2 %v6823_v23 }
 0x435   : > { %v2878_v21 = vpop.f32.mrf.mxu0 }
 0x436   : > { %v2879_v8 = vadd.f32 %v2878_v21, %v6848_v62  ;;  %v2374_v40 = vpop.f32.mrf.mxu1 }
 0x437   : > { %v2375_v9 = vadd.f32 %v2374_v40, %v6831_v12  ;;  %v2553_v60 = vpop.f32.mrf.mxu2  ;;  %v2719_v58 = vpop.f32.mrf.mxu3 }
 0x438   : > { %v3067_v20 = vmax.f32 %v2879_v8, 0.0  ;;  %v2554_v29 = vadd.f32 %v2553_v60, %v6785_v15  ;;  %v2720_v34 = vadd.f32 %v2719_v58, %v6801_v33 }
 0x439   : > { %v3068_v26 = vmax.f32 %v2375_v9, 0.0  ;;  %2413 = vmatmul.bf16.gmra.mxu1 %v6997_v32 }
 0x43a   : > { %v3476_v41 = vmax.f32 %v3475_v11, %v3067_v20  ;;  %v3085_v30 = vmax.f32 %v2554_v29, 0.0  ;;  %v3082_v17 = vmax.f32 %v2720_v34, 0.0 }
 0x43b   : > { %v3270_v24 = vmax.f32 %v3269_v46, %v3068_v26  ;;  %v7063_v46 = vpack.c.bf16 %v2062_v50, %v2061_v28 }
 0x43c   : > { %v3343_v61 = vmax.f32 %v3342_v13, %v3085_v30  ;;  %v3411_v56 = vmax.f32 %v3410_v55, %v3082_v17  ;;  %2761 = vmatmul.bf16.gmra.mxu3 %v6823_v23 }
 0x43d   : > { %v2881_v39 = vpop.f32.mrf.mxu0 }
 0x43e   : > { %v2882_v45 = vadd.f32 %v2881_v39, %v6848_v62  ;;  %v2376_v22 = vpop.f32.mrf.mxu1 }
 0x43f   : > { %v2377_v63 = vadd.f32 %v2376_v22, %v6831_v12  ;;  %v2555_v35 = vpop.f32.mrf.mxu2  ;;  %v2722_v37 = vpop.f32.mrf.mxu3  ;;  %v2063_v22 = vmax.f32 %v1967_v36, 0.0 }
 0x440   : > { %v3071_v11 = vmax.f32 %v2882_v45, 0.0  ;;  %v2556_v31 = vadd.f32 %v2555_v35, %v6785_v15  ;;  %v2723_v43 = vadd.f32 %v2722_v37, %v6801_v33  ;;  %2920 = vmatmul.bf16.gmra.mxu0 %v6997_v32 }
 0x441   : > { %v3072_v3 = vmax.f32 %v2377_v63, 0.0 }
 0x442   : > { %v3477_v53 = vmax.f32 %v3476_v41, %v3071_v11  ;;  %v3089_v16 = vmax.f32 %v2556_v31, 0.0  ;;  %v3086_v13 = vmax.f32 %v2723_v43, 0.0 }
 0x443   : > { %v3271_v55 = vmax.f32 %v3270_v24, %v3072_v3 }
 0x444   : > { %v3344_v7 = vmax.f32 %v3343_v61, %v3089_v16  ;;  %v3412_v21 = vmax.f32 %v3411_v56, %v3086_v13  ;;  %2597 = vmatmul.bf16.gmra.mxu2 %v7063_v46  ;;  %v2064_v56 = vmax.f32 %v1969_v48, 0.0  ;;  %v1972_v48 = vadd.f32 %v6985_v42, %v6739_v1 }
 0x445   : > { %v2883_v8 = vpop.f32.mrf.mxu0 }
 0x446   : > { %v2884_v40 = vadd.f32 %v2883_v8, %v6848_v62  ;;  %v2379_v9 = vpop.f32.mrf.mxu1  ;;  %v7081_v28 = vpack.c.bf16 %v2064_v56, %v2063_v22  ;;  %v2065_v56 = vmax.f32 %v1972_v48, 0.0 }
 0x447   : > { %v2380_v60 = vadd.f32 %v2379_v9, %v6831_v12  ;;  %v2558_v58 = vpop.f32.mrf.mxu2  ;;  %v2724_v20 = vpop.f32.mrf.mxu3 }
 0x448   : > { %v3075_v32 = vmax.f32 %v2884_v40, 0.0  ;;  %v2559_v29 = vadd.f32 %v2558_v58, %v6785_v15  ;;  %v2725_v34 = vadd.f32 %v2724_v20, %v6801_v33  ;;  %v1974_v20 = vadd.f32 %v6985_v42, %v6749_v57 }
 0x449   : > { %v3076_v26 = vmax.f32 %v2380_v60, 0.0  ;;  %2418 = vmatmul.bf16.gmra.mxu1 %v7015_v0 }
 0x44a   : > { %v3478_v41 = vmax.f32 %v3477_v53, %v3075_v32  ;;  %v3093_v30 = vmax.f32 %v2559_v29, 0.0  ;;  %v3090_v17 = vmax.f32 %v2725_v34, 0.0 }
 0x44b   : > { %v3272_v24 = vmax.f32 %v3271_v55, %v3076_v26 }
 0x44c   : > { %v3345_v27 = vmax.f32 %v3344_v7, %v3093_v30  ;;  %v3413_v14 = vmax.f32 %v3412_v21, %v3090_v17  ;;  %2766 = vmatmul.bf16.gmra.mxu3 %v7063_v46 }
 0x44d   : > { %v2886_v61 = vpop.f32.mrf.mxu0 }
 0x44e   : > { %v2887_v6 = vadd.f32 %v2886_v61, %v6848_v62  ;;  %v2381_v39 = vpop.f32.mrf.mxu1 }
 0x44f   : > { %v2382_v50 = vadd.f32 %v2381_v39, %v6831_v12  ;;  %v2560_v45 = vpop.f32.mrf.mxu2  ;;  %v2727_v19 = vpop.f32.mrf.mxu3 }
 0x450   : > { %v3079_v63 = vmax.f32 %v2887_v6, 0.0  ;;  %v2561_v35 = vadd.f32 %v2560_v45, %v6785_v15  ;;  %v2728_v37 = vadd.f32 %v2727_v19, %v6801_v33  ;;  %2925 = vmatmul.bf16.gmra.mxu0 %v7015_v0 }
 0x451   : > { %v3080_v25 = vmax.f32 %v2382_v50, 0.0 }
 0x452   : > { %v3479_v11 = vmax.f32 %v3478_v41, %v3079_v63  ;;  %v3097_v31 = vmax.f32 %v2561_v35, 0.0  ;;  %v3094_v43 = vmax.f32 %v2728_v37, 0.0 }
 0x453   : > { %v3273_v3 = vmax.f32 %v3272_v24, %v3080_v25  ;;  %v2066_v24 = vmax.f32 %v1974_v20, 0.0  ;;  %v4998_v20 = vld [vmem:[%s7890_s4 + $0xc4] sm:$0xf0] }
 0x454   : > { %v3346_v53 = vmax.f32 %v3345_v27, %v3097_v31  ;;  %v3414_v16 = vmax.f32 %v3413_v14, %v3094_v43  ;;  %2602 = vmatmul.bf16.gmra.mxu2 %v7081_v28 }
 0x455   : > { %v2888_v13 = vpop.f32.mrf.mxu0  ;;  %v7099_v45 = vpack.c.bf16 %v2066_v24, %v2065_v56 }
 0x456   : > { %v2889_v55 = vadd.f32 %v2888_v13, %v6848_v62  ;;  %v2384_v7 = vpop.f32.mrf.mxu1 }
 0x457   : > { %v2385_v21 = vadd.f32 %v2384_v7, %v6831_v12  ;;  %v2563_v8 = vpop.f32.mrf.mxu2  ;;  %v2729_v40 = vpop.f32.mrf.mxu3 }
 0x458   : > { %v3083_v0 = vmax.f32 %v2889_v55, 0.0  ;;  %v2564_v9 = vadd.f32 %v2563_v8, %v6785_v15  ;;  %v2730_v60 = vadd.f32 %v2729_v40, %v6801_v33 }
 0x459   : > { %v3084_v58 = vmax.f32 %v2385_v21, 0.0  ;;  %2423 = vmatmul.bf16.gmra.mxu1 %v6823_v23 }
 0x45a   : > { %v3480_v32 = vmax.f32 %v3479_v11, %v3083_v0  ;;  %v3101_v29 = vmax.f32 %v2564_v9, 0.0  ;;  %v3098_v34 = vmax.f32 %v2730_v60, 0.0 }
 0x45b   : > { %v3274_v26 = vmax.f32 %v3273_v3, %v3084_v58  ;;  %v4680_v58 = vld [vmem:[%s7890_s4 + $0xc0] sm:$0xf] }
 0x45c   : > { %v3347_v41 = vmax.f32 %v3346_v53, %v3101_v29  ;;  %v3415_v30 = vmax.f32 %v3414_v16, %v3098_v34  ;;  %2771 = vmatmul.bf16.gmra.mxu3 %v7081_v28  ;;  %v4681_v29 = vor.u32 %v4998_v20, %v4680_v58 }
 0x45d   : > { %v2891_v17 = vpop.f32.mrf.mxu0 }
 0x45e   : > { %v2892_v36 = vadd.f32 %v2891_v17, %v6848_v62  ;;  %v2386_v27 = vpop.f32.mrf.mxu1  ;;  %3973 = vmatpush.bf16.msra.mxu2 %v4681_v29 }
 0x45f   : > { %v2387_v14 = vadd.f32 %v2386_v27, %v6831_v12  ;;  %v2565_v61 = vpop.f32.mrf.mxu2  ;;  %v2732_v57 = vpop.f32.mrf.mxu3 }
 0x460   : > { %v3087_v6 = vmax.f32 %v2892_v36, 0.0  ;;  %v2566_v39 = vadd.f32 %v2565_v61, %v6785_v15  ;;  %v2733_v50 = vadd.f32 %v2732_v57, %v6801_v33  ;;  %2930 = vmatmul.bf16.gmra.mxu0 %v6823_v23 }
 0x461   : > { %v3088_v1 = vmax.f32 %v2387_v14, 0.0 }
 0x462   : > { %v3481_v19 = vmax.f32 %v3480_v32, %v3087_v6  ;;  %v3105_v22 = vmax.f32 %v2566_v39, 0.0  ;;  %v3102_v63 = vmax.f32 %v2733_v50, 0.0  ;;  %v4616_v6 = vld [vmem:[%s7890_s4 + $0x40] sm:$0xf]  ;;  %v4982_v39 = vld [vmem:[%s7890_s4 + $0x44] sm:$0xf0] }
 0x463   : > { %v3275_v35 = vmax.f32 %v3274_v26, %v3088_v1 }
 0x464   : > { %v3348_v37 = vmax.f32 %v3347_v41, %v3105_v22  ;;  %v3416_v25 = vmax.f32 %v3415_v30, %v3102_v63  ;;  %2607 = vmatmul.bf16.gmra.mxu2 %v7099_v45 }
 0x465   : > { %v2893_v11 = vpop.f32.mrf.mxu0 }
 0x466   : > { %v2894_v31 = vadd.f32 %v2893_v11, %v6848_v62  ;;  %v2389_v43 = vpop.f32.mrf.mxu1 }
 0x467   : > { %v2390_v3 = vadd.f32 %v2389_v43, %v6831_v12  ;;  %v2568_v53 = vpop.f32.mrf.mxu2  ;;  %v2734_v16 = vpop.f32.mrf.mxu3 }
 0x468   : > { %v3091_v23 = vmax.f32 %v2894_v31, 0.0  ;;  %v2569_v13 = vadd.f32 %v2568_v53, %v6785_v15  ;;  %v2735_v55 = vadd.f32 %v2734_v16, %v6801_v33  ;;  %v1984_v53 = vadd.f32 %v6985_v42, %v6650_v44 }
 0x469   : > { %v3092_v7 = vmax.f32 %v2390_v3, 0.0  ;;  %2428 = vmatmul.bf16.gmra.mxu1 %v7063_v46 }
 0x46a   : > { %v3482_v21 = vmax.f32 %v3481_v19, %v3091_v23  ;;  %v3109_v8 = vmax.f32 %v2569_v13, 0.0  ;;  %v3106_v40 = vmax.f32 %v2735_v55, 0.0  ;;  %v4617_v19 = vor.u32 %v4982_v39, %v4616_v6 }
 0x46b   : > { %v3276_v0 = vmax.f32 %v3275_v35, %v3092_v7  ;;  %v4744_v7 = vld [vmem:[%s7890_s4 + $0x140] sm:$0xf] }
 0x46c   : > { %v3349_v9 = vmax.f32 %v3348_v37, %v3109_v8  ;;  %v3417_v60 = vmax.f32 %v3416_v25, %v3106_v40  ;;  %2776 = vmatmul.bf16.gmra.mxu3 %v7099_v45  ;;  %3960 = vmatpush.bf16.msra.mxu1 %v4617_v19  ;;  %v1982_v8 = vadd.f32 %v6985_v42, %v6628_v10 }
 0x46d   : > { %v2896_v32 = vpop.f32.mrf.mxu0 }
 0x46e   : > { %v2897_v34 = vadd.f32 %v2896_v32, %v6848_v62  ;;  %v2391_v26 = vpop.f32.mrf.mxu1 }
 0x46f   : > { %v2392_v48 = vadd.f32 %v2391_v26, %v6831_v12  ;;  %v2570_v41 = vpop.f32.mrf.mxu2  ;;  %v2737_v30 = vpop.f32.mrf.mxu3  ;;  %v2069_v26 = vmax.f32 %v1982_v8, 0.0 }
 0x470   : > { %v3095_v17 = vmax.f32 %v2897_v34, 0.0  ;;  %v2571_v24 = vadd.f32 %v2570_v41, %v6785_v15  ;;  %v2738_v36 = vadd.f32 %v2737_v30, %v6801_v33  ;;  %2935 = vmatmul.bf16.gmra.mxu0 %v7063_v46 }
 0x471   : > { %v3096_v27 = vmax.f32 %v2392_v48, 0.0 }
 0x472   : > { %v3483_v14 = vmax.f32 %v3482_v21, %v3095_v17  ;;  %v3113_v61 = vmax.f32 %v2571_v24, 0.0  ;;  %v3110_v57 = vmax.f32 %v2738_v36, 0.0  ;;  %v5014_v21 = vld [vmem:[%s7890_s4 + $0x144] sm:$0xf0] }
 0x473   : > { %v3277_v56 = vmax.f32 %v3276_v0, %v3096_v27  ;;  %v4745_v44 = vor.u32 %v5014_v21, %v4744_v7 }
 0x474   : > { %v3350_v50 = vmax.f32 %v3349_v9, %v3113_v61  ;;  %v3418_v1 = vmax.f32 %v3417_v60, %v3110_v57  ;;  %2612 = vmatmul.bf16.gmra.mxu2 %v6773_v38  ;;  %v2070_v60 = vmax.f32 %v1984_v53, 0.0 }
 0x475   : > { %v2898_v22 = vpop.f32.mrf.mxu0  ;;  %3986 = vmatpush.bf16.msra.mxu3 %v4745_v44 }
 0x476   : > { %v2899_v46 = vadd.f32 %v2898_v22, %v6848_v62  ;;  %v2394_v63 = vpop.f32.mrf.mxu1  ;;  %v7147_v17 = vpack.c.bf16 %v2070_v60, %v2069_v26 }
 0x477   : > { %v2395_v35 = vadd.f32 %v2394_v63, %v6831_v12  ;;  %v2573_v37 = vpop.f32.mrf.mxu2  ;;  %v2739_v25 = vpop.f32.mrf.mxu3 }
 0x478   : > { %v3099_v11 = vmax.f32 %v2899_v46, 0.0  ;;  %v2574_v31 = vadd.f32 %v2573_v37, %v6785_v15  ;;  %v2740_v43 = vadd.f32 %v2739_v25, %v6801_v33 }
 0x479   : > { %v3100_v3 = vmax.f32 %v2395_v35, 0.0  ;;  %2433 = vmatmul.bf16.gmra.mxu1 %v7081_v28  ;;  %v1989_v35 = vadd.f32 %v6985_v42, %v6682_v49 }
 0x47a   : > { %v3484_v16 = vmax.f32 %v3483_v14, %v3099_v11  ;;  %v3117_v23 = vmax.f32 %v2574_v31, 0.0  ;;  %v3114_v13 = vmax.f32 %v2740_v43, 0.0  ;;  %v1987_v43 = vadd.f32 %v6985_v42, %v6667_v18 }
 0x47b   : > { %v3278_v55 = vmax.f32 %v3277_v56, %v3100_v3 }
 0x47c   : > { %v3351_v40 = vmax.f32 %v3350_v50, %v3117_v23  ;;  %v3419_v0 = vmax.f32 %v3418_v1, %v3114_v13  ;;  %2781 = vmatmul.bf16.gmra.mxu3 %v6773_v38  ;;  %v2072_v23 = vmax.f32 %v1989_v35, 0.0  ;;  %v2071_v8 = vmax.f32 %v1987_v43, 0.0 }
 0x47d   : > { %v2901_v9 = vpop.f32.mrf.mxu0 }
 0x47e   : > { %v2902_v58 = vadd.f32 %v2901_v9, %v6848_v62  ;;  %v2396_v20 = vpop.f32.mrf.mxu1  ;;  %v7165_v9 = vpack.c.bf16 %v2072_v23, %v2071_v8 }
 0x47f   : > { %v2397_v32 = vadd.f32 %v2396_v20, %v6831_v12  ;;  %v2575_v29 = vpop.f32.mrf.mxu2  ;;  %v2742_v34 = vpop.f32.mrf.mxu3 }
 0x480   : > { %v3103_v48 = vmax.f32 %v2902_v58, 0.0  ;;  %v2576_v41 = vadd.f32 %v2575_v29, %v6785_v15  ;;  %v2743_v10 = vadd.f32 %v2742_v34, %v6801_v33  ;;  %2940 = vmatmul.bf16.gmra.mxu0 %v7081_v28 }
 0x481   : > { %v3104_v30 = vmax.f32 %v2397_v32, 0.0 }
 0x482   : > { %v3485_v24 = vmax.f32 %v3484_v16, %v3103_v48  ;;  %v3121_v36 = vmax.f32 %v2576_v41, 0.0  ;;  %v3118_v27 = vmax.f32 %v2743_v10, 0.0 }
 0x483   : > { %v3279_v14 = vmax.f32 %v3278_v55, %v3104_v30 }
 0x484   : > { %v3352_v61 = vmax.f32 %v3351_v40, %v3121_v36  ;;  %v3420_v57 = vmax.f32 %v3419_v0, %v3118_v27  ;;  %2617 = vmatmul.bf16.gmra.mxu2 %v7147_v17 }
 0x485   : > { %v2903_v56 = vpop.f32.mrf.mxu0 }
 0x486   : > { %v2904_v6 = vadd.f32 %v2903_v56, %v6848_v62  ;;  %v2399_v39 = vpop.f32.mrf.mxu1 }
 0x487   : > { %v2400_v50 = vadd.f32 %v2399_v39, %v6831_v12  ;;  %v2578_v1 = vpop.f32.mrf.mxu2  ;;  %v2744_v19 = vpop.f32.mrf.mxu3 }
 0x488   : > { %v3107_v28 = vmax.f32 %v2904_v6, 0.0  ;;  %v2579_v22 = vadd.f32 %v2578_v1, %v6785_v15  ;;  %v2745_v46 = vadd.f32 %v2744_v19, %v6801_v33 }
 0x489   : > { %v3108_v63 = vmax.f32 %v2400_v50, 0.0  ;;  %2438 = vmatmul.bf16.gmra.mxu1 %v7099_v45  ;;  %v1992_v50 = vadd.f32 %v6985_v42, %v6687_v54 }
 0x48a   : > { %v3486_v37 = vmax.f32 %v3485_v24, %v3107_v28  ;;  %v3125_v25 = vmax.f32 %v2579_v22, 0.0  ;;  %v3122_v11 = vmax.f32 %v2745_v46, 0.0 }
 0x48b   : > { %v3280_v31 = vmax.f32 %v3279_v14, %v3108_v63 }
 0x48c   : > { %v3353_v3 = vmax.f32 %v3352_v61, %v3125_v25  ;;  %v3421_v53 = vmax.f32 %v3420_v57, %v3122_v11  ;;  %2786 = vmatmul.bf16.gmra.mxu3 %v7147_v17  ;;  %v1994_v61 = vadd.f32 %v6985_v42, %v6694_v5  ;;  %v2073_v25 = vmax.f32 %v1992_v50, 0.0 }
 0x48d   : > { %v2906_v16 = vpop.f32.mrf.mxu0 }
 0x48e   : > { %v2907_v13 = vadd.f32 %v2906_v16, %v6848_v62  ;;  %v2401_v55 = vpop.f32.mrf.mxu1  ;;  %v2074_v22 = vmax.f32 %v1994_v61, 0.0 }
 0x48f   : > { %v2402_v7 = vadd.f32 %v2401_v55, %v6831_v12  ;;  %v2580_v21 = vpop.f32.mrf.mxu2  ;;  %v2747_v49 = vpop.f32.mrf.mxu3 }
 0x490   : > { %v3111_v40 = vmax.f32 %v2907_v13, 0.0  ;;  %v2581_v0 = vadd.f32 %v2580_v21, %v6785_v15  ;;  %v2748_v44 = vadd.f32 %v2747_v49, %v6801_v33  ;;  %2945 = vmatmul.bf16.gmra.mxu0 %v7099_v45 }
 0x491   : > { %v3112_v18 = vmax.f32 %v2402_v7, 0.0 }
 0x492   : > { %v3487_v60 = vmax.f32 %v3486_v37, %v3111_v40  ;;  %v3129_v58 = vmax.f32 %v2581_v0, 0.0  ;;  %v3126_v20 = vmax.f32 %v2748_v44, 0.0 }
 0x493   : > { %v3281_v32 = vmax.f32 %v3280_v31, %v3112_v18 }
 0x494   : > { %v3354_v29 = vmax.f32 %v3353_v3, %v3129_v58  ;;  %v3422_v34 = vmax.f32 %v3421_v53, %v3126_v20  ;;  %2622 = vmatmul.bf16.gmra.mxu2 %v7165_v9  ;;  %v7183_v3 = vpack.c.bf16 %v2074_v22, %v2073_v25  ;;  %v1999_v20 = vadd.f32 %v6985_v42, %v6705_v47 }
 0x495   : > { %v2908_v26 = vpop.f32.mrf.mxu0 }
 0x496   : > { %v2909_v48 = vadd.f32 %v2908_v26, %v6848_v62  ;;  %v2404_v41 = vpop.f32.mrf.mxu1 }
 0x497   : > { %v2405_v10 = vadd.f32 %v2404_v41, %v6831_v12  ;;  %v2583_v30 = vpop.f32.mrf.mxu2  ;;  %v2749_v24 = vpop.f32.mrf.mxu3 }
 0x498   : > { %v3115_v45 = vmax.f32 %v2909_v48, 0.0  ;;  %v2584_v36 = vadd.f32 %v2583_v30, %v6785_v15  ;;  %v2750_v27 = vadd.f32 %v2749_v24, %v6801_v33  ;;  %v1997_v48 = vadd.f32 %v6985_v42, %v6697_v59  ;;  %v4672_v30 = vld [vmem:[%s7890_s4 + $0xb0] sm:$0xf]  ;;  %v4996_v24 = vld [vmem:[%s7890_s4 + $0xb4] sm:$0xf0] }
 0x499   : > { %v3116_v14 = vmax.f32 %v2405_v10, 0.0  ;;  %2443 = vmatmul.bf16.gmra.mxu1 %v6773_v38 }
 0x49a   : > { %v3488_v57 = vmax.f32 %v3487_v60, %v3115_v45  ;;  %v3133_v56 = vmax.f32 %v2584_v36, 0.0  ;;  %v3130_v6 = vmax.f32 %v2750_v27, 0.0  ;;  %v4673_v45 = vor.u32 %v4996_v24, %v4672_v30 }
 0x49b   : > { %v3282_v39 = vmax.f32 %v3281_v32, %v3116_v14  ;;  %v2076_v36 = vmax.f32 %v1999_v20, 0.0 }
 0x49c   : > { %v3355_v1 = vmax.f32 %v3354_v29, %v3133_v56  ;;  %v3423_v19 = vmax.f32 %v3422_v34, %v3130_v6  ;;  %2791 = vmatmul.bf16.gmra.mxu3 %v7165_v9  ;;  %3974 = vmatpush.bf16.msra.mxu2 %v4673_v45  ;;  %v2075_v56 = vmax.f32 %v1997_v48, 0.0 }
 0x49d   : > { %v2911_v28 = vpop.f32.mrf.mxu0 }
 0x49e   : > { %v2912_v46 = vadd.f32 %v2911_v28, %v6848_v62  ;;  %v2406_v63 = vpop.f32.mrf.mxu1 }
 0x49f   : > { %v2407_v35 = vadd.f32 %v2406_v63, %v6831_v12  ;;  %v2585_v37 = vpop.f32.mrf.mxu2  ;;  %v2752_v5 = vpop.f32.mrf.mxu3 }
 0x4a0   : > { %v3119_v11 = vmax.f32 %v2912_v46, 0.0  ;;  %v2586_v31 = vadd.f32 %v2585_v37, %v6785_v15  ;;  %v2753_v43 = vadd.f32 %v2752_v5, %v6801_v33  ;;  %2950 = vmatmul.bf16.gmra.mxu0 %v6773_v38  ;;  %v4980_v37 = vld [vmem:[%s7890_s4 + $0x34] sm:$0xf0] }
 0x4a1   : > { %v3120_v54 = vmax.f32 %v2407_v35, 0.0  ;;  %v4608_v35 = vld [vmem:[%s7890_s4 + $0x30] sm:$0xf] }
 0x4a2   : > { %v3489_v53 = vmax.f32 %v3488_v57, %v3119_v11  ;;  %v3137_v16 = vmax.f32 %v2586_v31, 0.0  ;;  %v3134_v23 = vmax.f32 %v2753_v43, 0.0 }
 0x4a3   : > { %v3283_v13 = vmax.f32 %v3282_v39, %v3120_v54 }
 0x4a4   : > { %v3356_v55 = vmax.f32 %v3355_v1, %v3137_v16  ;;  %v3424_v7 = vmax.f32 %v3423_v19, %v3134_v23  ;;  %2627 = vmatmul.bf16.gmra.mxu2 %v7183_v3  ;;  %v7207_v19 = vpack.c.bf16 %v2076_v36, %v2075_v56 }
 0x4a5   : > { %v2913_v21 = vpop.f32.mrf.mxu0 }
 0x4a6   : > { %v2914_v49 = vadd.f32 %v2913_v21, %v6848_v62  ;;  %v2409_v8 = vpop.f32.mrf.mxu1  ;;  %v2004_v21 = vadd.f32 %v6985_v42, %v6721_v2 }
 0x4a7   : > { %v2410_v40 = vadd.f32 %v2409_v8, %v6831_v12  ;;  %v2588_v0 = vpop.f32.mrf.mxu2  ;;  %v2754_v44 = vpop.f32.mrf.mxu3 }
 0x4a8   : > { %v3123_v38 = vmax.f32 %v2914_v49, 0.0  ;;  %v2589_v18 = vadd.f32 %v2588_v0, %v6785_v15  ;;  %v2755_v60 = vadd.f32 %v2754_v44, %v6801_v33  ;;  %v4736_v44 = vld [vmem:[%s7890_s4 + $0x130] sm:$0xf] }
 0x4a9   : > { %v3124_v58 = vmax.f32 %v2410_v40, 0.0  ;;  %2448 = vmatmul.bf16.gmra.mxu1 %v7147_v17 }
 0x4aa   : > { %v3490_v32 = vmax.f32 %v3489_v53, %v3123_v38  ;;  %v3141_v29 = vmax.f32 %v2589_v18, 0.0  ;;  %v3138_v34 = vmax.f32 %v2755_v60, 0.0  ;;  %v5012_v38 = vld [vmem:[%s7890_s4 + $0x134] sm:$0xf0]  ;;  %v2002_v18 = vadd.f32 %v6985_v42, %v6711_v51 }
 0x4ab   : > { %v3284_v26 = vmax.f32 %v3283_v13, %v3124_v58  ;;  %v4737_v2 = vor.u32 %v5012_v38, %v4736_v44 }
 0x4ac   : > { %v3357_v41 = vmax.f32 %v3356_v55, %v3141_v29  ;;  %v3425_v10 = vmax.f32 %v3424_v7, %v3138_v34  ;;  %2796 = vmatmul.bf16.gmra.mxu3 %v7183_v3 }
 0x4ad   : > { %v2916_v47 = vpop.f32.mrf.mxu0  ;;  %3987 = vmatpush.bf16.msra.mxu3 %v4737_v2 }
 0x4ae   : > { %v2917_v27 = vadd.f32 %v2916_v47, %v6848_v62  ;;  %v2411_v14 = vpop.f32.mrf.mxu1 }
 0x4af   : > { %v2412_v59 = vadd.f32 %v2411_v14, %v6831_v12  ;;  %v2590_v61 = vpop.f32.mrf.mxu2  ;;  %v2757_v57 = vpop.f32.mrf.mxu3 }
 0x4b0   : > { %v3127_v6 = vmax.f32 %v2917_v27, 0.0  ;;  %v2591_v39 = vadd.f32 %v2590_v61, %v6785_v15  ;;  %v2758_v50 = vadd.f32 %v2757_v57, %v6801_v33  ;;  %2955 = vmatmul.bf16.gmra.mxu0 %v7147_v17  ;;  %v4609_v17 = vor.u32 %v4980_v37, %v4608_v35 }
 0x4b1   : > { %v3128_v1 = vmax.f32 %v2412_v59, 0.0 }
 0x4b2   : > { %v3491_v28 = vmax.f32 %v3490_v32, %v3127_v6  ;;  %v3145_v22 = vmax.f32 %v2591_v39, 0.0  ;;  %v3142_v46 = vmax.f32 %v2758_v50, 0.0  ;;  %3961 = vmatpush.bf16.msra.mxu1 %v4609_v17  ;;  %v2078_v32 = vmax.f32 %v2004_v21, 0.0 }
 0x4b3   : > { %v3285_v63 = vmax.f32 %v3284_v26, %v3128_v1 }
 0x4b4   : > { %v3358_v5 = vmax.f32 %v3357_v41, %v3145_v22  ;;  %v3426_v25 = vmax.f32 %v3425_v10, %v3142_v46  ;;  %2632 = vmatmul.bf16.gmra.mxu2 %v7207_v19  ;;  %v2077_v10 = vmax.f32 %v2002_v18, 0.0 }
 0x4b5   : > { %v2918_v11 = vpop.f32.mrf.mxu0 }
 0x4b6   : > { %v2919_v31 = vadd.f32 %v2918_v11, %v6848_v62  ;;  %v2414_v43 = vpop.f32.mrf.mxu1  ;;  %v7237_v47 = vpack.c.bf16 %v2078_v32, %v2077_v10 }
 0x4b7   : > { %v2415_v54 = vadd.f32 %v2414_v43, %v6831_v12  ;;  %v2593_v53 = vpop.f32.mrf.mxu2  ;;  %v2759_v16 = vpop.f32.mrf.mxu3 }
 0x4b8   : > { %v3131_v23 = vmax.f32 %v2919_v31, 0.0  ;;  %v2594_v13 = vadd.f32 %v2593_v53, %v6785_v15  ;;  %v2760_v55 = vadd.f32 %v2759_v16, %v6801_v33 }
 0x4b9   : > { %v3132_v7 = vmax.f32 %v2415_v54, 0.0  ;;  %2453 = vmatmul.bf16.gmra.mxu1 %v7165_v9 }
 0x4ba   : > { %v3492_v49 = vmax.f32 %v3491_v28, %v3131_v23  ;;  %v3149_v8 = vmax.f32 %v2594_v13, 0.0  ;;  %v3146_v40 = vmax.f32 %v2760_v55, 0.0 }
 0x4bb   : > { %v3286_v0 = vmax.f32 %v3285_v63, %v3132_v7  ;;  %v5271_v63 = vld [vmem:[%s7893_s7 + $0x1] ss:$0 sm:$0xff] }
 0x4bc   : > { %v3359_v60 = vmax.f32 %v3358_v5, %v3149_v8  ;;  %v3427_v58 = vmax.f32 %v3426_v25, %v3146_v40  ;;  %2801 = vmatmul.bf16.gmra.mxu3 %v7207_v19  ;;  %v2009_v35 = vadd.f32 %v5271_v63, %v6737_v4  ;;  %v2007_v11 = vadd.f32 %v5271_v63, %v6730_v52 }
 0x4bd   : > { %v2921_v20 = vpop.f32.mrf.mxu0 }
 0x4be   : > { %v2922_v29 = vadd.f32 %v2921_v20, %v6848_v62  ;;  %v2416_v34 = vpop.f32.mrf.mxu1  ;;  %v2080_v53 = vmax.f32 %v2009_v35, 0.0  ;;  %v2079_v4 = vmax.f32 %v2007_v11, 0.0 }
 0x4bf   : > { %v2417_v26 = vadd.f32 %v2416_v34, %v6831_v12  ;;  %v2595_v48 = vpop.f32.mrf.mxu2  ;;  %v2762_v41 = vpop.f32.mrf.mxu3 }
 0x4c0   : > { %v3135_v30 = vmax.f32 %v2922_v29, 0.0  ;;  %v2596_v24 = vadd.f32 %v2595_v48, %v6785_v15  ;;  %v2763_v51 = vadd.f32 %v2762_v41, %v6801_v33  ;;  %2960 = vmatmul.bf16.gmra.mxu0 %v7165_v9  ;;  %v7255_v8 = vpack.c.bf16 %v2080_v53, %v2079_v4  ;;  %v7944_v48 = vld [vmem:[#allocation18_spill] sm:$0xff] }
 0x4c1   : > { %v3136_v42 = vmax.f32 %v2417_v26, 0.0  ;;  %v2014_v41 = vadd.f32 %v5271_v63, %v7944_v48 }
 0x4c2   : > { %v3493_v45 = vmax.f32 %v3492_v49, %v3135_v30  ;;  %v3153_v36 = vmax.f32 %v2596_v24, 0.0  ;;  %v3150_v27 = vmax.f32 %v2763_v51, 0.0 }
 0x4c3   : > { %v3287_v14 = vmax.f32 %v3286_v0, %v3136_v42 }
 0x4c4   : > { %v3360_v59 = vmax.f32 %v3359_v60, %v3153_v36  ;;  %v3428_v61 = vmax.f32 %v3427_v58, %v3150_v27  ;;  %2637 = vmatmul.bf16.gmra.mxu2 %v7237_v47 }
 0x4c5   : > { %v2923_v57 = vpop.f32.mrf.mxu0 }
 0x4c6   : > { %v2924_v56 = vadd.f32 %v2923_v57, %v6848_v62  ;;  %v2419_v6 = vpop.f32.mrf.mxu1 }
 0x4c7   : > { %v2420_v39 = vadd.f32 %v2419_v6, %v6831_v12  ;;  %v2598_v50 = vpop.f32.mrf.mxu2  ;;  %v2764_v1 = vpop.f32.mrf.mxu3 }
 0x4c8   : > { %v3139_v9 = vmax.f32 %v2924_v56, 0.0  ;;  %v2599_v28 = vadd.f32 %v2598_v50, %v6785_v15  ;;  %v2765_v22 = vadd.f32 %v2764_v1, %v6801_v33 }
 0x4c9   : > { %v3140_v46 = vmax.f32 %v2420_v39, 0.0  ;;  %2458 = vmatmul.bf16.gmra.mxu1 %v7183_v3 }
 0x4ca   : > { %v3494_v37 = vmax.f32 %v3493_v45, %v3139_v9  ;;  %v3157_v5 = vmax.f32 %v2599_v28, 0.0  ;;  %v3154_v25 = vmax.f32 %v2765_v22, 0.0  ;;  %v7945_v45 = vld [vmem:[#allocation7_spill] sm:$0xff] }
 0x4cb   : > { %v3288_v17 = vmax.f32 %v3287_v14, %v3140_v46  ;;  %v2012_v36 = vadd.f32 %v5271_v63, %v7945_v45  ;;  %v7946_v45 = vld [vmem:[#allocation8_spill] sm:$0xff] }
 0x4cc   : > { %v3361_v31 = vmax.f32 %v3360_v59, %v3157_v5  ;;  %v3429_v43 = vmax.f32 %v3428_v61, %v3154_v25  ;;  %2806 = vmatmul.bf16.gmra.mxu3 %v7237_v47  ;;  %v2082_v59 = vmax.f32 %v2014_v41, 0.0 }
 0x4cd   : > { %v2926_v54 = vpop.f32.mrf.mxu0  ;;  %v2081_v39 = vmax.f32 %v2012_v36, 0.0 }
 0x4ce   : > { %v2927_v16 = vadd.f32 %v2926_v54, %v6848_v62  ;;  %v2421_v23 = vpop.f32.mrf.mxu1 }
 0x4cf   : > { %v2422_v13 = vadd.f32 %v2421_v23, %v6831_v12  ;;  %v2600_v55 = vpop.f32.mrf.mxu2  ;;  %v2767_v7 = vpop.f32.mrf.mxu3  ;;  %v7271_v46 = vpack.c.bf16 %v2082_v59, %v2081_v39 }
 0x4d0   : > { %v3143_v21 = vmax.f32 %v2927_v16, 0.0  ;;  %v2768_v49 = vadd.f32 %v2767_v7, %v6801_v33  ;;  %2965 = vmatmul.bf16.gmra.mxu0 %v7183_v3  ;;  %v2601_v0 = vadd.f32 %v2600_v55, %v6785_v15 }
 0x4d1   : > { %v3144_v52 = vmax.f32 %v2422_v13, 0.0 }
 0x4d2   : > { %v3495_v40 = vmax.f32 %v3494_v37, %v3143_v21  ;;  %v3158_v44 = vmax.f32 %v2768_v49, 0.0  ;;  %v3161_v58 = vmax.f32 %v2601_v0, 0.0 }
 0x4d3   : > { %v3289_v38 = vmax.f32 %v3288_v17, %v3144_v52 }
 0x4d4   : > { %v3430_v18 = vmax.f32 %v3429_v43, %v3158_v44  ;;  %2642 = vmatmul.bf16.gmra.mxu2 %v7255_v8  ;;  %v3362_v30 = vmax.f32 %v3361_v31, %v3161_v58  ;;  %v4664_v44 = vld [vmem:[%s7890_s4 + $0xa0] sm:$0xf] }
 0x4d5   : > { %v2928_v60 = vpop.f32.mrf.mxu0 }
 0x4d6   : > { %v2929_v2 = vadd.f32 %v2928_v60, %v6848_v62  ;;  %v2424_v20 = vpop.f32.mrf.mxu1 }
 0x4d7   : > { %v2425_v32 = vadd.f32 %v2424_v20, %v6831_v12  ;;  %v2603_v29 = vpop.f32.mrf.mxu2  ;;  %v2769_v3 = vpop.f32.mrf.mxu3 }
 0x4d8   : > { %v3147_v34 = vmax.f32 %v2929_v2, 0.0  ;;  %v2604_v26 = vadd.f32 %v2603_v29, %v6785_v15  ;;  %v2770_v42 = vadd.f32 %v2769_v3, %v6801_v33 }
 0x4d9   : > { %v3148_v10 = vmax.f32 %v2425_v32, 0.0  ;;  %2463 = vmatmul.bf16.gmra.mxu1 %v7207_v19 }
 0x4da   : > { %v3496_v24 = vmax.f32 %v3495_v40, %v3147_v34  ;;  %v3165_v51 = vmax.f32 %v2604_v26, 0.0  ;;  %v3162_v57 = vmax.f32 %v2770_v42, 0.0 }
 0x4db   : > { %v3290_v27 = vmax.f32 %v3289_v38, %v3148_v10  ;;  %v4994_v38 = vld [vmem:[%s7890_s4 + $0xa4] sm:$0xf0] }
 0x4dc   : > { %v3363_v14 = vmax.f32 %v3362_v30, %v3165_v51  ;;  %2811 = vmatmul.bf16.gmra.mxu3 %v7255_v8  ;;  %v3431_v35 = vmax.f32 %v3430_v18, %v3162_v57  ;;  %v4665_v60 = vor.u32 %v4994_v38, %v4664_v44  ;;  %v4978_v51 = vld [vmem:[%s7890_s4 + $0x24] sm:$0xf0] }
 0x4dd   : > { %v2931_v61 = vpop.f32.mrf.mxu0 }
 0x4de   : > { %v2932_v56 = vadd.f32 %v2931_v61, %v6848_v62  ;;  %v2426_v6 = vpop.f32.mrf.mxu1  ;;  %3975 = vmatpush.bf16.msra.mxu2 %v4665_v60 }
 0x4df   : > { %v2427_v50 = vadd.f32 %v2426_v6, %v6831_v12  ;;  %v2605_v1 = vpop.f32.mrf.mxu2  ;;  %v2772_v9 = vpop.f32.mrf.mxu3 }
 0x4e0   : > { %v3151_v28 = vmax.f32 %v2932_v56, 0.0  ;;  %v2773_v22 = vadd.f32 %v2772_v9, %v6801_v33  ;;  %2970 = vmatmul.bf16.gmra.mxu0 %v7207_v19  ;;  %v2606_v5 = vadd.f32 %v2605_v1, %v6785_v15 }
 0x4e1   : > { %v3152_v63 = vmax.f32 %v2427_v50, 0.0 }
 0x4e2   : > { %v3497_v37 = vmax.f32 %v3496_v24, %v3151_v28  ;;  %v3166_v25 = vmax.f32 %v2773_v22, 0.0  ;;  %v3169_v43 = vmax.f32 %v2606_v5, 0.0  ;;  %v4600_v24 = vld [vmem:[%s7890_s4 + $0x20] sm:$0xf] }
 0x4e3   : > { %v3291_v17 = vmax.f32 %v3290_v27, %v3152_v63  ;;  %v4601_v36 = vor.u32 %v4978_v51, %v4600_v24  ;;  %v4728_v5 = vld [vmem:[%s7890_s4 + $0x120] sm:$0xf] }
 0x4e4   : > { %v3432_v11 = vmax.f32 %v3431_v35, %v3166_v25  ;;  %2647 = vmatmul.bf16.gmra.mxu2 %v7271_v46  ;;  %v3364_v4 = vmax.f32 %v3363_v14, %v3169_v43  ;;  %v5010_v25 = vld [vmem:[%s7890_s4 + $0x124] sm:$0xf0] }
 0x4e5   : > { %v2933_v31 = vpop.f32.mrf.mxu0  ;;  %3962 = vmatpush.bf16.msra.mxu1 %v4601_v36 }
 0x4e6   : > { %v2934_v54 = vadd.f32 %v2933_v31, %v6848_v62  ;;  %v2429_v53 = vpop.f32.mrf.mxu1 }
 0x4e7   : > { %v2430_v16 = vadd.f32 %v2429_v53, %v6831_v12  ;;  %v2608_v19 = vpop.f32.mrf.mxu2  ;;  %v2774_v23 = vpop.f32.mrf.mxu3 }
 0x4e8   : > { %v3155_v13 = vmax.f32 %v2934_v54, 0.0  ;;  %v2609_v55 = vadd.f32 %v2608_v19, %v6785_v15  ;;  %v2775_v52 = vadd.f32 %v2774_v23, %v6801_v33 }
 0x4e9   : > { %v3156_v7 = vmax.f32 %v2430_v16, 0.0  ;;  %2468 = vmatmul.bf16.gmra.mxu1 %v7237_v47 }
 0x4ea   : > { %v3498_v21 = vmax.f32 %v3497_v37, %v3155_v13  ;;  %v3173_v49 = vmax.f32 %v2609_v55, 0.0  ;;  %v3170_v58 = vmax.f32 %v2775_v52, 0.0 }
 0x4eb   : > { %v3292_v40 = vmax.f32 %v3291_v17, %v3156_v7 }
 0x4ec   : > { %v3365_v0 = vmax.f32 %v3364_v4, %v3173_v49  ;;  %2816 = vmatmul.bf16.gmra.mxu3 %v7271_v46  ;;  %v3433_v48 = vmax.f32 %v3432_v11, %v3170_v58  ;;  %v4729_v11 = vor.u32 %v5010_v25, %v4728_v5 }
 0x4ed   : > { %v2936_v18 = vpop.f32.mrf.mxu0 }
 0x4ee   : > { %v2937_v2 = vadd.f32 %v2936_v18, %v6848_v62  ;;  %v2431_v20 = vpop.f32.mrf.mxu1  ;;  %3988 = vmatpush.bf16.msra.mxu3 %v4729_v11 }
 0x4ef   : > { %v2610_v32 = vpop.f32.mrf.mxu2  ;;  %v2777_v29 = vpop.f32.mrf.mxu3  ;;  %v2432_v26 = vadd.f32 %v2431_v20, %v6831_v12 }
 0x4f0   : > { %v3159_v3 = vmax.f32 %v2937_v2, 0.0  ;;  %v2778_v34 = vadd.f32 %v2777_v29, %v6801_v33  ;;  %2975 = vmatmul.bf16.gmra.mxu0 %v7237_v47  ;;  %v2611_v10 = vadd.f32 %v2610_v32, %v6785_v15 }
 0x4f1   : > { %v3160_v47 = vmax.f32 %v2432_v26, 0.0 }
 0x4f2   : > { %v3499_v41 = vmax.f32 %v3498_v21, %v3159_v3  ;;  %v3174_v30 = vmax.f32 %v2778_v34, 0.0  ;;  %v3177_v14 = vmax.f32 %v2611_v10, 0.0 }
 0x4f3   : > { %v3293_v1 = vmax.f32 %v3292_v40, %v3160_v47 }
 0x4f4   : > { %v3434_v42 = vmax.f32 %v3433_v48, %v3174_v30  ;;  %2652 = vmatmul.bf16.gmra.mxu2 %v7946_v45  ;;  %v3366_v28 = vmax.f32 %v3365_v0, %v3177_v14 }
 0x4f5   : > { %v2938_v27 = vpop.f32.mrf.mxu0 }
 0x4f6   : > { %v2939_v59 = vadd.f32 %v2938_v27, %v6848_v62  ;;  %v2434_v61 = vpop.f32.mrf.mxu1 }
 0x4f7   : > { %v2435_v57 = vadd.f32 %v2434_v61, %v6831_v12  ;;  %v2613_v56 = vpop.f32.mrf.mxu2  ;;  %v2779_v6 = vpop.f32.mrf.mxu3 }
 0x4f8   : > { %v3163_v39 = vmax.f32 %v2939_v59, 0.0  ;;  %v2614_v50 = vadd.f32 %v2613_v56, %v6785_v15  ;;  %v2780_v35 = vadd.f32 %v2779_v6, %v6801_v33 }
 0x4f9   : > { %v3164_v9 = vmax.f32 %v2435_v57, 0.0  ;;  %2473 = vmatmul.bf16.gmra.mxu1 %v7255_v8 }
 0x4fa   : > { %v3500_v22 = vmax.f32 %v3499_v41, %v3163_v39  ;;  %v3181_v63 = vmax.f32 %v2614_v50, 0.0  ;;  %v3178_v43 = vmax.f32 %v2780_v35, 0.0 }
 0x4fb   : > { %v3294_v37 = vmax.f32 %v3293_v1, %v3164_v9 }
 0x4fc   : > { %v3367_v17 = vmax.f32 %v3366_v28, %v3181_v63  ;;  %2821 = vmatmul.bf16.gmra.mxu3 %v7946_v45  ;;  %v3435_v7 = vmax.f32 %v3434_v42, %v3178_v43 }
 0x4fd   : > { %v2941_v31 = vpop.f32.mrf.mxu0 }
 0x4fe   : > { %v2942_v54 = vadd.f32 %v2941_v31, %v6848_v62  ;;  %v2436_v53 = vpop.f32.mrf.mxu1 }
 0x4ff   : > { %v2615_v16 = vpop.f32.mrf.mxu2  ;;  %v2782_v19 = vpop.f32.mrf.mxu3  ;;  %v2437_v55 = vadd.f32 %v2436_v53, %v6831_v12 }
 0x500   : > { %v3167_v23 = vmax.f32 %v2942_v54, 0.0  ;;  %v2783_v13 = vadd.f32 %v2782_v19, %v6801_v33  ;;  %2980 = vmatmul.bf16.gmra.mxu0 %v7255_v8  ;;  %v2616_v21 = vadd.f32 %v2615_v16, %v6785_v15 }
 0x501   : > { %v3168_v40 = vmax.f32 %v2437_v55, 0.0 }
 0x502   : > { %v3501_v4 = vmax.f32 %v3500_v22, %v3167_v23  ;;  %v3182_v49 = vmax.f32 %v2783_v13, 0.0  ;;  %v3185_v44 = vmax.f32 %v2616_v21, 0.0 }
 0x503   : > { %v3295_v29 = vmax.f32 %v3294_v37, %v3168_v40 }
 0x504   : > { %v3436_v52 = vmax.f32 %v3435_v7, %v3182_v49  ;;  %v3368_v34 = vmax.f32 %v3367_v17, %v3185_v44 }
 0x505   : > { %v2943_v0 = vpop.f32.mrf.mxu0 }
 0x506   : > { %v2944_v38 = vadd.f32 %v2943_v0, %v6848_v62  ;;  %v2439_v18 = vpop.f32.mrf.mxu1 }
 0x507   : > { %v2440_v60 = vadd.f32 %v2439_v18, %v6831_v12  ;;  %v2618_v58 = vpop.f32.mrf.mxu2  ;;  %v2784_v2 = vpop.f32.mrf.mxu3 }
 0x508   : > { %v3171_v20 = vmax.f32 %v2944_v38, 0.0  ;;  %v2619_v8 = vadd.f32 %v2618_v58, %v6785_v15  ;;  %v2785_v32 = vadd.f32 %v2784_v2, %v6801_v33 }
 0x509   : > { %v3172_v3 = vmax.f32 %v2440_v60, 0.0  ;;  %2478 = vmatmul.bf16.gmra.mxu1 %v7271_v46 }
 0x50a   : > { %v3502_v26 = vmax.f32 %v3501_v4, %v3171_v20  ;;  %v3189_v48 = vmax.f32 %v2619_v8, 0.0  ;;  %v3186_v41 = vmax.f32 %v2785_v32, 0.0 }
 0x50b   : > { %v3296_v10 = vmax.f32 %v3295_v29, %v3172_v3 }
 0x50c   : > { %v3369_v30 = vmax.f32 %v3368_v34, %v3189_v48  ;;  %v3437_v24 = vmax.f32 %v3436_v52, %v3186_v41 }
 0x50d   : > { %v2946_v51 = vpop.f32.mrf.mxu0 }
 0x50e   : > { %v2947_v42 = vadd.f32 %v2946_v51, %v6848_v62  ;;  %v2441_v36 = vpop.f32.mrf.mxu1 }
 0x50f   : > { %v2620_v47 = vpop.f32.mrf.mxu2  ;;  %v2787_v27 = vpop.f32.mrf.mxu3  ;;  %v2442_v57 = vadd.f32 %v2441_v36, %v6831_v12 }
 0x510   : > { %v3175_v14 = vmax.f32 %v2947_v42, 0.0  ;;  %v2621_v59 = vadd.f32 %v2620_v47, %v6785_v15  ;;  %v2788_v61 = vadd.f32 %v2787_v27, %v6801_v33  ;;  %2985 = vmatmul.bf16.gmra.mxu0 %v7271_v46  ;;  %v4656_v27 = vld [vmem:[%s7890_s4 + $0x90] sm:$0xf] }
 0x511   : > { %v3176_v9 = vmax.f32 %v2442_v57, 0.0 }
 0x512   : > { %v3503_v56 = vmax.f32 %v3502_v26, %v3175_v14  ;;  %v3193_v6 = vmax.f32 %v2621_v59, 0.0  ;;  %v3190_v39 = vmax.f32 %v2788_v61, 0.0  ;;  %v4992_v14 = vld [vmem:[%s7890_s4 + $0x94] sm:$0xf0] }
 0x513   : > { %v3297_v11 = vmax.f32 %v3296_v10, %v3176_v9  ;;  %v4657_v61 = vor.u32 %v4992_v14, %v4656_v27 }
 0x514   : > { %v3370_v50 = vmax.f32 %v3369_v30, %v3193_v6  ;;  %v3438_v1 = vmax.f32 %v3437_v24, %v3190_v39 }
 0x515   : > { %v2948_v28 = vpop.f32.mrf.mxu0  ;;  %3976 = vmatpush.bf16.msra.mxu2 %v4657_v61 }
 0x516   : > { %v2949_v22 = vadd.f32 %v2948_v28, %v6848_v62  ;;  %v2444_v63 = vpop.f32.mrf.mxu1 }
 0x517   : > { %v2445_v35 = vadd.f32 %v2444_v63, %v6831_v12  ;;  %v2623_v37 = vpop.f32.mrf.mxu2  ;;  %v2789_v5 = vpop.f32.mrf.mxu3 }
 0x518   : > { %v3179_v25 = vmax.f32 %v2949_v22, 0.0  ;;  %v2624_v17 = vadd.f32 %v2623_v37, %v6785_v15  ;;  %v2790_v46 = vadd.f32 %v2789_v5, %v6801_v33  ;;  %v4592_v37 = vld [vmem:[%s7890_s4 + $0x10] sm:$0xf]  ;;  %v4976_v5 = vld [vmem:[%s7890_s4 + $0x14] sm:$0xf0] }
 0x519   : > { %v3180_v31 = vmax.f32 %v2445_v35, 0.0  ;;  %2483 = vmatmul.bf16.gmra.mxu1 %v7946_v45 }
 0x51a   : > { %v3504_v43 = vmax.f32 %v3503_v56, %v3179_v25  ;;  %v3197_v54 = vmax.f32 %v2624_v17, 0.0  ;;  %v3194_v53 = vmax.f32 %v2790_v46, 0.0  ;;  %v4593_v17 = vor.u32 %v4976_v5, %v4592_v37 }
 0x51b   : > { %v3298_v16 = vmax.f32 %v3297_v11, %v3180_v31 }
 0x51c   : > { %v3371_v19 = vmax.f32 %v3370_v50, %v3197_v54  ;;  %v3439_v23 = vmax.f32 %v3438_v1, %v3194_v53  ;;  %3963 = vmatpush.bf16.msra.mxu1 %v4593_v17 }
 0x51d   : > { %v2951_v13 = vpop.f32.mrf.mxu0 }
 0x51e   : > { %v2952_v55 = vadd.f32 %v2951_v13, %v6848_v62  ;;  %v2446_v7 = vpop.f32.mrf.mxu1 }
 0x51f   : > { %v2625_v4 = vpop.f32.mrf.mxu2  ;;  %v2792_v21 = vpop.f32.mrf.mxu3  ;;  %v2447_v0 = vadd.f32 %v2446_v7, %v6831_v12  ;;  %v5008_v7 = vld [vmem:[%s7890_s4 + $0x114] sm:$0xf0] }
 0x520   : > { %v3183_v49 = vmax.f32 %v2952_v55, 0.0  ;;  %v2626_v52 = vadd.f32 %v2625_v4, %v6785_v15  ;;  %v2793_v40 = vadd.f32 %v2792_v21, %v6801_v33  ;;  %2990 = vmatmul.bf16.gmra.mxu0 %v7946_v45  ;;  %v4720_v55 = vld [vmem:[%s7890_s4 + $0x110] sm:$0xf] }
 0x521   : > { %v3184_v2 = vmax.f32 %v2447_v0, 0.0  ;;  %v4721_v4 = vor.u32 %v5008_v7, %v4720_v55 }
 0x522   : > { %v3505_v44 = vmax.f32 %v3504_v43, %v3183_v49  ;;  %v3201_v38 = vmax.f32 %v2626_v52, 0.0  ;;  %v3198_v18 = vmax.f32 %v2793_v40, 0.0 }
 0x523   : > { %v3299_v41 = vmax.f32 %v3298_v16, %v3184_v2  ;;  %3989 = vmatpush.bf16.msra.mxu3 %v4721_v4 }
 0x524   : > { %v3372_v60 = vmax.f32 %v3371_v19, %v3201_v38  ;;  %v3440_v58 = vmax.f32 %v3439_v23, %v3198_v18 }
 0x525   : > { %v2953_v20 = vpop.f32.mrf.mxu0 }
 0x526   : > { %v2954_v8 = vadd.f32 %v2953_v20, %v6848_v62  ;;  %v2449_v32 = vpop.f32.mrf.mxu1 }
 0x527   : > { %v2450_v29 = vadd.f32 %v2449_v32, %v6831_v12  ;;  %v2628_v3 = vpop.f32.mrf.mxu2  ;;  %v2794_v34 = vpop.f32.mrf.mxu3 }
 0x528   : > { %v3187_v26 = vmax.f32 %v2954_v8, 0.0  ;;  %v2629_v48 = vadd.f32 %v2628_v3, %v6785_v15  ;;  %v2795_v45 = vadd.f32 %v2794_v34, %v6801_v33 }
 0x529   : > { %v3188_v10 = vmax.f32 %v2450_v29, 0.0 }
 0x52a   : > { %v3506_v30 = vmax.f32 %v3505_v44, %v3187_v26  ;;  %v3205_v24 = vmax.f32 %v2629_v48, 0.0  ;;  %v3202_v51 = vmax.f32 %v2795_v45, 0.0 }
 0x52b   : > { %v3300_v42 = vmax.f32 %v3299_v41, %v3188_v10 }
 0x52c   : > { %v7340_v36 = vmax.f32 %v3372_v60, %v3205_v24  ;;  %v3441_v47 = vmax.f32 %v3440_v58, %v3202_v51 }
 0x52d   : > { %v2956_v59 = vpop.f32.mrf.mxu0 }
 0x52e   : > { %v2957_v57 = vadd.f32 %v2956_v59, %v6848_v62  ;;  %v2451_v56 = vpop.f32.mrf.mxu1 }
 0x52f   : > { %v2452_v6 = vadd.f32 %v2451_v56, %v6831_v12  ;;  %v7350_v39 = vpop.f32.mrf.mxu2  ;;  %v2797_v50 = vpop.f32.mrf.mxu3 }
 0x530   : > { %v3191_v1 = vmax.f32 %v2957_v57, 0.0  ;;  %v2798_v9 = vadd.f32 %v2797_v50, %v6801_v33  ;;  %v2631_v17 = vadd.f32 %v7350_v39, %v6785_v15  ;;  %v4648_v39 = vld [vmem:[%s7890_s4 + $0x80] sm:$0xf] }
 0x531   : > { %v3192_v28 = vmax.f32 %v2452_v6, 0.0 }
 0x532   : > { %v3507_v22 = vmax.f32 %v3506_v30, %v3191_v1  ;;  %v3206_v63 = vmax.f32 %v2798_v9, 0.0 }
 0x533   : > { %v3301_v35 = vmax.f32 %v3300_v42, %v3192_v28 }
 0x534   : > { %v7359_v25 = vmax.f32 %v3441_v47, %v3206_v63 }
 0x535   : > { %v2958_v46 = vpop.f32.mrf.mxu0 }
 0x536   : > { %v2959_v11 = vadd.f32 %v2958_v46, %v6848_v62  ;;  %v2454_v31 = vpop.f32.mrf.mxu1 }
 0x537   : > { %v2455_v43 = vadd.f32 %v2454_v31, %v6831_v12  ;;  %v2633_v54 = vpop.f32.mrf.mxu2  ;;  %v2799_v53 = vpop.f32.mrf.mxu3 }
 0x538   : > { %v3195_v16 = vmax.f32 %v2959_v11, 0.0  ;;  %v2634_v46 = vadd.f32 %v2633_v54, %v6785_v15  ;;  %v2800_v55 = vadd.f32 %v2799_v53, %v6801_v33  ;;  %v4990_v54 = vld [vmem:[%s7890_s4 + $0x84] sm:$0xf0]  ;;  %v4584_v53 = vld [vmem:[%s7890_s4] sm:$0xf] }
 0x539   : > { %v3196_v19 = vmax.f32 %v2455_v43, 0.0 }
 0x53a   : > { %v3508_v23 = vmax.f32 %v3507_v22, %v3195_v16  ;;  %v3209_v16 = vmax.f32 %v2631_v17, 0.0 }
 0x53b   : > { %v3302_v13 = vmax.f32 %v3301_v35, %v3196_v19  ;;  %v3213_v19 = vmax.f32 %v2634_v46, 0.0 }
 0x53d   : > { %v2961_v21 = vpop.f32.mrf.mxu0 }
 0x53e   : > { %v2962_v49 = vadd.f32 %v2961_v21, %v6848_v62  ;;  %v2456_v52 = vpop.f32.mrf.mxu1  ;;  %v3374_v21 = vmax.f32 %v7340_v36, %v3209_v16  ;;  %v5006_v36 = vld [vmem:[%s7890_s4 + $0x104] sm:$0xf0] }
 0x53f   : > { %v2457_v40 = vadd.f32 %v2456_v52, %v6831_v12  ;;  %v2635_v0 = vpop.f32.mrf.mxu2  ;;  %v2802_v44 = vpop.f32.mrf.mxu3  ;;  %v4649_v52 = vor.u32 %v4990_v54, %v4648_v39 }
 0x540   : > { %v3199_v38 = vmax.f32 %v2962_v49, 0.0  ;;  %v2636_v31 = vadd.f32 %v2635_v0, %v6785_v15  ;;  %v4712_v0 = vld [vmem:[%s7890_s4 + $0x100] sm:$0xf] }
 0x541   : > { %v3200_v18 = vmax.f32 %v2457_v40, 0.0  ;;  %v4974_v40 = vld [vmem:[%s7890_s4 + $0x4] sm:$0xf0]  ;;  %3977 = vmatpush.bf16.msra.mxu2 %v4649_v52 }
 0x542   : > { %v3509_v60 = vmax.f32 %v3508_v23, %v3199_v38  ;;  %v3217_v7 = vmax.f32 %v2636_v31, 0.0  ;;  %v2803_v38 = vadd.f32 %v2802_v44, %v6801_v33 }
 0x543   : > { %v3303_v58 = vmax.f32 %v3302_v13, %v3200_v18  ;;  %v4585_v18 = vor.u32 %v4974_v40, %v4584_v53 }
 0x545   : > { %v2963_v2 = vpop.f32.mrf.mxu0  ;;  %3964 = vmatpush.bf16.msra.mxu1 %v4585_v18 }
 0x546   : > { %v2964_v20 = vadd.f32 %v2963_v2, %v6848_v62  ;;  %v2459_v8 = vpop.f32.mrf.mxu1 }
 0x547   : > { %v2460_v32 = vadd.f32 %v2459_v8, %v6831_v12  ;;  %v2638_v29 = vpop.f32.mrf.mxu2  ;;  %v2804_v3 = vpop.f32.mrf.mxu3  ;;  %v4713_v8 = vor.u32 %v5006_v36, %v4712_v0 }
 0x548   : > { %v3203_v34 = vmax.f32 %v2964_v20, 0.0  ;;  %v2639_v23 = vadd.f32 %v2638_v29, %v6785_v15  ;;  %v2805_v29 = vadd.f32 %v2804_v3, %v6801_v33 }
 0x549   : > { %v3204_v26 = vmax.f32 %v2460_v32, 0.0  ;;  %v3210_v32 = vmax.f32 %v2800_v55, 0.0  ;;  %3990 = vmatpush.bf16.msra.mxu3 %v4713_v8 }
 0x54a   : > { %v3510_v48 = vmax.f32 %v3509_v60, %v3203_v34  ;;  %v3375_v60 = vmax.f32 %v3374_v21, %v3213_v19  ;;  %v3218_v31 = vmax.f32 %v2805_v29, 0.0 }
 0x54b   : > { %v7373_v45 = vmax.f32 %v3303_v58, %v3204_v26  ;;  %v3221_v58 = vmax.f32 %v2639_v23, 0.0  ;;  %v3443_v3 = vmax.f32 %v7359_v25, %v3210_v32 }
 0x54c   : > { %v3376_v44 = vmax.f32 %v3375_v60, %v3217_v7 }
 0x54d   : > { %v2966_v41 = vpop.f32.mrf.mxu0 }
 0x54e   : > { %v2967_v10 = vadd.f32 %v2966_v41, %v6848_v62  ;;  %v2461_v30 = vpop.f32.mrf.mxu1  ;;  %v3214_v41 = vmax.f32 %v2803_v38, 0.0 }
 0x54f   : > { %v2640_v24 = vpop.f32.mrf.mxu2  ;;  %v2807_v51 = vpop.f32.mrf.mxu3 }
 0x550   : > { %v3207_v42 = vmax.f32 %v2967_v10, 0.0  ;;  %v2641_v49 = vadd.f32 %v2640_v24, %v6785_v15  ;;  %v2462_v10 = vadd.f32 %v2461_v30, %v6831_v12  ;;  %v2808_v24 = vadd.f32 %v2807_v51, %v6801_v33 }
 0x551   : > { %v3444_v7 = vmax.f32 %v3443_v3, %v3214_v41 }
 0x552   : > { %v7376_v47 = vmax.f32 %v3510_v48, %v3207_v42  ;;  %v3225_v26 = vmax.f32 %v2641_v49, 0.0  ;;  %v3208_v51 = vmax.f32 %v2462_v10, 0.0  ;;  %v3222_v39 = vmax.f32 %v2808_v24, 0.0  ;;  %v4642_v24 = vld [vmem:[%s7890_s4 + $0x78] sm:$0xf0] }
 0x553   : > { %v3445_v52 = vmax.f32 %v3444_v7, %v3218_v31 }
 0x554   : > { %v3305_v36 = vmax.f32 %v7373_v45, %v3208_v51  ;;  %v4824_v51 = vld [vmem:[%s7890_s4 + $0x1e0] sm:$0xf] }
 0x555   : > { %v2968_v27 = vpop.f32.mrf.mxu0 }
 0x556   : > { %v2464_v14 = vpop.f32.mrf.mxu1  ;;  %v2969_v42 = vadd.f32 %v2968_v27, %v6848_v62 }
 0x557   : > { %v2643_v59 = vpop.f32.mrf.mxu2  ;;  %v2809_v61 = vpop.f32.mrf.mxu3  ;;  %v2465_v16 = vadd.f32 %v2464_v14, %v6831_v12 }
 0x558   : > { %v2644_v2 = vadd.f32 %v2643_v59, %v6785_v15  ;;  %v3377_v59 = vmax.f32 %v3376_v44, %v3221_v58  ;;  %v3211_v27 = vmax.f32 %v2969_v42, 0.0 }
 0x55a   : > { %v3229_v17 = vmax.f32 %v2644_v2, 0.0  ;;  %v3378_v19 = vmax.f32 %v3377_v59, %v3225_v26  ;;  %v3512_v60 = vmax.f32 %v7376_v47, %v3211_v27 }
 0x55c   : > { %v3379_v21 = vmax.f32 %v3378_v19, %v3229_v17 }
 0x55d   : > { %v7378_v57 = vpop.f32.mrf.mxu0 }
 0x55e   : > { %v7380_v56 = vpop.f32.mrf.mxu1  ;;  %v2972_v58 = vadd.f32 %v7378_v57, %v6848_v62  ;;  %v4832_v57 = vld [vmem:[%s7890_s4 + $0x1f0] sm:$0xf] }
 0x55f   : > { %v2645_v6 = vpop.f32.mrf.mxu2  ;;  %v7382_v50 = vpop.f32.mrf.mxu3 }
 0x560   : > { %v2646_v48 = vadd.f32 %v2645_v6, %v6785_v15  ;;  %v2810_v6 = vadd.f32 %v2809_v61, %v6801_v33  ;;  %v3212_v61 = vmax.f32 %v2465_v16, 0.0  ;;  %v3215_v42 = vmax.f32 %v2972_v58, 0.0 }
 0x562   : > { %v3233_v23 = vmax.f32 %v2646_v48, 0.0  ;;  %v3226_v0 = vmax.f32 %v2810_v6, 0.0  ;;  %v5036_v48 = vld [vmem:[%s7890_s4 + $0x1f4] sm:$0xf0] }
 0x563   : > { %v4833_v10 = vor.u32 %v5036_v48, %v4832_v57 }
 0x564   : > { %v3380_v38 = vmax.f32 %v3379_v21, %v3233_v23  ;;  %v4985_v21 = vld [vmem:[%s7890_s4 + $0x64] sm:$0xf] }
 0x565   : > { %v7384_v1 = vpop.f32.mrf.mxu0  ;;  %3996 = vmatpush.bf16.msrb.mxu1 %v4833_v10 }
 0x566   : > { %v7386_v9 = vpop.f32.mrf.mxu1  ;;  %v7462_v29 = vadd.f32 %v7384_v1, %v6848_v62  ;;  %v4987_v1 = vld [vmem:[%s7890_s4 + $0x74] sm:$0xf] }
 0x567   : > { %v2648_v28 = vpop.f32.mrf.mxu2  ;;  %v7388_v22 = vpop.f32.mrf.mxu3  ;;  %v2470_v47 = vadd.f32 %v7386_v9, %v6831_v12  ;;  %v4645_v3 = vor.u32 %v4987_v1, %v4642_v24 }
 0x568   : > { %v2649_v46 = vadd.f32 %v2648_v28, %v6785_v15  ;;  %v2813_v28 = vadd.f32 %v7382_v50, %v6801_v33  ;;  %v3446_v50 = vmax.f32 %v3445_v52, %v3222_v39  ;;  %v3219_v31 = vmax.f32 %v7462_v29, 0.0 }
 0x569   : > { %4009 = vmatpush.bf16.msrb.mxu2 %v4645_v3 }
 0x56a   : > { %v3237_v25 = vmax.f32 %v2649_v46, 0.0  ;;  %v3230_v2 = vmax.f32 %v2813_v28, 0.0  ;;  %v3447_v45 = vmax.f32 %v3446_v50, %v3226_v0  ;;  %v4634_v28 = vld [vmem:[%s7890_s4 + $0x68] sm:$0xf0]  ;;  %v5032_v50 = vld [vmem:[%s7890_s4 + $0x1d4] sm:$0xf0] }
 0x56b   : > { %v4637_v52 = vor.u32 %v4985_v21, %v4634_v28  ;;  %v4610_v21 = vld [vmem:[%s7890_s4 + $0x38] sm:$0xf0]  ;;  %v5001_v28 = vld [vmem:[%s7890_s4 + $0xe4] sm:$0xf] }
 0x56c   : > { %v3448_v59 = vmax.f32 %v3447_v45, %v3230_v2  ;;  %v5355_v2 = vmov -inf  }
 0x56d   : > { %v7390_v63 = vpop.f32.mrf.mxu0  ;;  %4010 = vmatpush.bf16.msrb.mxu2 %v4637_v52 }
 0x56e   : > { %v7392_v35 = vpop.f32.mrf.mxu1  ;;  %v7479_v9 = vadd.f32 %v7390_v63, %v6848_v62 }
 0x56f   : > { %v2650_v37 = vpop.f32.mrf.mxu2  ;;  %v7394_v5 = vpop.f32.mrf.mxu3  ;;  %v2472_v63 = vadd.f32 %v7392_v35, %v6831_v12  ;;  %v5034_v35 = vld [vmem:[%s7890_s4 + $0x1e4] sm:$0xf0] }
 0x570   : > { %v2651_v55 = vadd.f32 %v2650_v37, %v6785_v15  ;;  %v2467_v37 = vadd.f32 %v7380_v56, %v6831_v12  ;;  %v3381_v56 = vmax.f32 %v3380_v38, %v3237_v25 }
 0x572   : > { %v3241_v18 = vmax.f32 %v2651_v55, 0.0  ;;  %v3216_v32 = vmax.f32 %v2467_v37, 0.0  ;;  %v3220_v55 = vmax.f32 %v2470_v47, 0.0 }
 0x574   : > { %v3382_v26 = vmax.f32 %v3381_v56, %v3241_v18 }
 0x575   : > { %v7399_v11 = vpop.f32.mrf.mxu0 }
 0x576   : > { %v7402_v43 = vpop.f32.mrf.mxu1 }
 0x577   : > { %v2653_v13 = vpop.f32.mrf.mxu2  ;;  %v7406_v4 = vpop.f32.mrf.mxu3  ;;  %v2475_v16 = vadd.f32 %v7402_v43, %v6831_v12  ;;  %v3223_v43 = vmax.f32 %v7479_v9, 0.0 }
 0x578   : > { %v2654_v49 = vadd.f32 %v2653_v13, %v6785_v15  ;;  %v2815_v13 = vadd.f32 %v7388_v22, %v6801_v33  ;;  %v2818_v22 = vadd.f32 %v7394_v5, %v6801_v33  ;;  %v2820_v5 = vadd.f32 %v7406_v4, %v6801_v33 }
 0x579   : > { %v3228_v37 = vmax.f32 %v2475_v16, 0.0 }
 0x57a   : > { %v3245_v8 = vmax.f32 %v2654_v49, 0.0  ;;  %v3234_v41 = vmax.f32 %v2815_v13, 0.0  ;;  %v3242_v27 = vmax.f32 %v2820_v5, 0.0  ;;  %v336_v49 = vlaneseq }
 0x57b   : > { %v3513_v13 = vmax.f32 %v3512_v60, %v3215_v42  ;;  %v4618_v42 = vld [vmem:[%s7890_s4 + $0x48] sm:$0xf0] }
 0x57c   : > { %v3383_v17 = vmax.f32 %v3382_v26, %v3245_v8  ;;  %v3449_v39 = vmax.f32 %v3448_v59, %v3234_v41  ;;  %vm7510_vm1 = vcmp.lt.s32.totalorder %v336_v49, 512  ;;  %v4983_v8 = vld [vmem:[%s7890_s4 + $0x54] sm:$0xf] }
 0x57d   : > { %v7430_v20 = vpop.f32.mrf.mxu0  ;;  %340 = vst.msk [vmem:[#allocation2] sm:$0xf] %vm7510_vm1, %v5355_v2  ;;  %v3514_v9 = vmax.f32 %v3513_v13, %v3219_v31  ;;  %v5003_v59 = vld [vmem:[%s7890_s4 + $0xf4] sm:$0xf]  ;;  %v4706_v31 = vld [vmem:[%s7890_s4 + $0xf8] sm:$0xf0] }
 0x57e   : > { %v7433_v34 = vpop.f32.mrf.mxu1  ;;  %v2982_v47 = vadd.f32 %v7430_v20, %v6848_v62  ;;  %v5030_v20 = vld [vmem:[%s7890_s4 + $0x1c4] sm:$0xf0] }
 0x57f   : > { %v2655_v30 = vpop.f32.mrf.mxu2  ;;  %v2822_v54 = vpop.f32.mrf.mxu3 }
 0x580   : > { %v2656_v53 = vadd.f32 %v2655_v30, %v6785_v15  ;;  %v3306_v15 = vmax.f32 %v3305_v36, %v3212_v61  ;;  %v2823_v4 = vadd.f32 %v2822_v54, %v6801_v33  ;;  %v3238_v30 = vmax.f32 %v2818_v22, 0.0 }
 0x581   : > { %v4825_v54 = vor.u32 %v5034_v35, %v4824_v51  ;;  %v3224_v61 = vmax.f32 %v2472_v63, 0.0  ;;  %v4800_v51 = vld [vmem:[%s7890_s4 + $0x1b0] sm:$0xf]  ;;  %v5028_v35 = vld [vmem:[%s7890_s4 + $0x1b4] sm:$0xf0] }
 0x582   : > { %v3249_v44 = vmax.f32 %v2656_v53, 0.0  ;;  %v3307_v23 = vmax.f32 %v3306_v15, %v3216_v32  ;;  %v2477_v53 = vadd.f32 %v7433_v34, %v6831_v12  ;;  %v3246_v0 = vmax.f32 %v2823_v4, 0.0  ;;  %v4626_v15 = vld [vmem:[%s7890_s4 + $0x58] sm:$0xf0] }
 0x583   : > { %3997 = vmatpush.bf16.msrb.mxu1 %v4825_v54  ;;  %v3450_v38 = vmax.f32 %v3449_v39, %v3238_v30  ;;  %v2979_v34 = vadd.f32 %v7399_v11, %v6848_v62  ;;  %v4629_v11 = vor.u32 %v4983_v8, %v4626_v15  ;;  %v3515_v4 = vmax.f32 %v3514_v9, %v3223_v43  ;;  %v4979_v54 = vld [vmem:[%s7890_s4 + $0x34] sm:$0xf]  ;;  %v4690_v15 = vld [vmem:[%s7890_s4 + $0xd8] sm:$0xf0] }
 0x584   : > { %v3384_v7 = vmax.f32 %v3383_v17, %v3249_v44  ;;  %v3308_v58 = vmax.f32 %v3307_v23, %v3220_v55  ;;  %v3232_v26 = vmax.f32 %v2477_v53, 0.0  ;;  %v4709_v23 = vor.u32 %v5003_v59, %v4706_v31  ;;  %v4999_v8 = vld [vmem:[%s7890_s4 + $0xd4] sm:$0xf] }
 0x585   : > { %v7447_v14 = vpop.f32.mrf.mxu0  ;;  %v3451_v32 = vmax.f32 %v3450_v38, %v3242_v27  ;;  %4011 = vmatpush.bf16.msrb.mxu2 %v4629_v11  ;;  %v3227_v5 = vmax.f32 %v2979_v34, 0.0  ;;  %v4801_v27 = vor.u32 %v5028_v35, %v4800_v51  ;;  %v5024_v11 = vld [vmem:[%s7890_s4 + $0x194] sm:$0xf0]  ;;  %v4586_v51 = vld [vmem:[%s7890_s4 + $0x8] sm:$0xf0] }
 0x586   : > { %v7452_v40 = vpop.f32.mrf.mxu1  ;;  %v3385_v18 = vrot.slane %v3384_v7, 4  ;;  %v3309_v45 = vmax.f32 %v3308_v58, %v3224_v61  ;;  %v7536_v22 = vadd.f32 %v7447_v14, %v6848_v62  ;;  %v4981_v14 = vld [vmem:[%s7890_s4 + $0x44] sm:$0xf]  ;;  %4022 = vmatpush.bf16.msrb.mxu3 %v4709_v23 }
 0x587   : > { %v2824_v19 = vpop.f32.mrf.mxu3  ;;  %v2480_v60 = vadd.f32 %v7452_v40, %v6831_v12  ;;  %v3452_v1 = vmax.f32 %v3451_v32, %v3246_v0  ;;  %v4808_v40 = vld [vmem:[%s7890_s4 + $0x1c0] sm:$0xf]  ;;  %v4621_v16 = vor.u32 %v4981_v14, %v4618_v42  ;;  %v3516_v39 = vmax.f32 %v3515_v4, %v3227_v5 }
 0x588   : > { %v2825_v25 = vadd.f32 %v2824_v19, %v6801_v33  ;;  %v4816_v33 = vld [vmem:[%s7890_s4 + $0x1d0] sm:$0xf]  ;;  %v7538_v48 = vmax.f32 %v3384_v7, %v3385_v18  ;;  %v3310_v10 = vmax.f32 %v3309_v45, %v3228_v37  ;;  %v4809_v24 = vor.u32 %v5030_v20, %v4808_v40  ;;  %v4698_v37 = vld [vmem:[%s7890_s4 + $0xe8] sm:$0xf0]  ;;  %v4792_v18 = vld [vmem:[%s7890_s4 + $0x1a0] sm:$0xf] }
 0x589   : > { %v4817_v56 = vor.u32 %v5032_v50, %v4816_v33  ;;  %v3236_v17 = vmax.f32 %v2480_v60, 0.0  ;;  %v3231_v19 = vmax.f32 %v2982_v47, 0.0  ;;  %4012 = vmatpush.bf16.msrb.mxu2 %v4621_v16  ;;  %v4701_v38 = vor.u32 %v5001_v28, %v4698_v37  ;;  %v5026_v33 = vld [vmem:[%s7890_s4 + $0x1a4] sm:$0xf0]  ;;  %v4977_v50 = vld [vmem:[%s7890_s4 + $0x24] sm:$0xf] }
 0x58a   : > { %v3250_v29 = vmax.f32 %v2825_v25, 0.0  ;;  %v3311_v55 = vmax.f32 %v3310_v10, %v3232_v26  ;;  %v3387_v30 = vrot.slane %v7538_v48, 2  ;;  %v4793_v2 = vor.u32 %v5026_v33, %v4792_v18  ;;  %v4975_v26 = vld [vmem:[%s7890_s4 + $0x14] sm:$0xf]  ;;  %v4997_v40 = vld [vmem:[%s7890_s4 + $0xc4] sm:$0xf] }
 0x58b   : > { %3998 = vmatpush.bf16.msrb.mxu1 %v4817_v56  ;;  %v3517_v13 = vmax.f32 %v3516_v39, %v3231_v19  ;;  %v4602_v56 = vld [vmem:[%s7890_s4 + $0x28] sm:$0xf0]  ;;  %4023 = vmatpush.bf16.msrb.mxu3 %v4701_v38 }
 0x58c   : > { %v7556_v3 = vmax.f32 %v3452_v1, %v3250_v29  ;;  %v3312_v25 = vmax.f32 %v3311_v55, %v3236_v17  ;;  %v4605_v29 = vor.u32 %v4977_v50, %v4602_v56  ;;  %v4682_v20 = vld [vmem:[%s7890_s4 + $0xc8] sm:$0xf0]  ;;  %v3388_v14 = vmax.f32 %v7538_v48, %v3387_v30  ;;  %v5022_v55 = vld [vmem:[%s7890_s4 + $0x184] sm:$0xf0]  ;;  %v4991_v50 = vld [vmem:[%s7890_s4 + $0x94] sm:$0xf] }
 0x58d   : > { %v7486_v46 = vpop.f32.mrf.mxu0  ;;  %v4685_v59 = vor.u32 %v4997_v40, %v4682_v20  ;;  %v4834_v40 = vld [vmem:[%s7890_s4 + $0x1f8] sm:$0xf0] }
 0x58e   : > { %v2481_v6 = vpop.f32.mrf.mxu1  ;;  %v2987_v43 = vadd.f32 %v7486_v46, %v6848_v62  ;;  %v3454_v49 = vrot.slane %v7556_v3, 4  ;;  %v4613_v46 = vor.u32 %v4979_v54, %v4610_v21  ;;  %v3389_v4 = vrot.slane %v3388_v14, 1 }
 0x58f   : > { %v2482_v41 = vadd.f32 %v2481_v6, %v6831_v12  ;;  %v3235_v6 = vmax.f32 %v7536_v22, 0.0  ;;  %3999 = vmatpush.bf16.msrb.mxu1 %v4809_v24  ;;  %v4594_v22 = vld [vmem:[%s7890_s4 + $0x18] sm:$0xf0] }
 0x590   : > { %4013 = vmatpush.bf16.msrb.mxu2 %v4613_v46  ;;  %v3239_v32 = vmax.f32 %v2987_v43, 0.0  ;;  %v4597_v5 = vor.u32 %v4975_v26, %v4594_v22  ;;  %v3455_v10 = vmax.f32 %v7556_v3, %v3454_v49  ;;  %v4776_v3 = vld [vmem:[%s7890_s4 + $0x180] sm:$0xf]  ;;  %v4995_v43 = vld [vmem:[%s7890_s4 + $0xb4] sm:$0xf]  ;;  %v3390_v54 = vmax.f32 %v3388_v14, %v3389_v4  ;;  %v5044_v4 = vld [vmem:[%s7891_s5 + $0x38] sm:$0xff] }
 0x591   : > { %v3240_v7 = vmax.f32 %v2482_v41, 0.0  ;;  %v5019_v22 = vld [vmem:[%s7890_s4 + $0x174] sm:$0xf] }
 0x593   : > { %4000 = vmatpush.bf16.msrb.mxu1 %v4801_v27  ;;  %v3313_v58 = vmax.f32 %v3312_v25, %v3240_v7  ;;  %v4777_v7 = vor.u32 %v5022_v55, %v4776_v3  ;;  %v4674_v27 = vld [vmem:[%s7890_s4 + $0xb8] sm:$0xf0]  ;;  %v5043_v55 = vld [vmem:[%s7891_s5 + $0x30] sm:$0xff] }
 0x594   : > { %4014 = vmatpush.bf16.msrb.mxu2 %v4605_v29  ;;  %v4677_v28 = vor.u32 %v4995_v43, %v4674_v27  ;;  %v4818_v3 = vld [vmem:[%s7890_s4 + $0x1d8] sm:$0xf0] }
 0x595   : > { %v2988_v44 = vpop.f32.mrf.mxu0 }
 0x596   : > { %v2484_v57 = vpop.f32.mrf.mxu1  ;;  %v2989_v53 = vadd.f32 %v2988_v44, %v6848_v62  ;;  %v4784_v44 = vld [vmem:[%s7890_s4 + $0x190] sm:$0xf] }
 0x597   : > { %v2485_v63 = vadd.f32 %v2484_v57, %v6831_v12  ;;  %v3518_v57 = vmax.f32 %v3517_v13, %v3235_v6  ;;  %4001 = vmatpush.bf16.msrb.mxu1 %v4793_v2  ;;  %v4785_v41 = vor.u32 %v5024_v11, %v4784_v44  ;;  %v3456_v6 = vrot.slane %v3455_v10, 2  ;;  %v4658_v13 = vld [vmem:[%s7890_s4 + $0x98] sm:$0xf0]  ;;  %v3252_v11 = vld [vmem:[#allocation2] sm:$0xf] }
 0x598   : > { %v3243_v1 = vmax.f32 %v2989_v53, 0.0  ;;  %4015 = vmatpush.bf16.msrb.mxu2 %v4597_v5 }
 0x599   : > { %v3244_v52 = vmax.f32 %v2485_v63, 0.0  ;;  %v3519_v24 = vmax.f32 %v3518_v57, %v3239_v32  ;;  %v3457_v25 = vmax.f32 %v3455_v10, %v3456_v6  ;;  %v4650_v32 = vld [vmem:[%s7890_s4 + $0x88] sm:$0xf0]  ;;  %v4770_v57 = vld [vmem:[%s7890_s4 + $0x178] sm:$0xf0] }
 0x59a   : > { %v5015_v6 = vld [vmem:[%s7890_s4 + $0x154] sm:$0xf] }
 0x59b   : > { %v3314_v45 = vmax.f32 %v3313_v58, %v3244_v52  ;;  %v3520_v16 = vmax.f32 %v3519_v24, %v3243_v1  ;;  %4002 = vmatpush.bf16.msrb.mxu1 %v4785_v41  ;;  %v4993_v52 = vld [vmem:[%s7890_s4 + $0xa4] sm:$0xf]  ;;  %v3458_v18 = vrot.slane %v3457_v25, 1  ;;  %v5035_v41 = vld [vmem:[%s7890_s4 + $0x1f4] sm:$0xf] }
 0x59d   : > { %v2991_v61 = vpop.f32.mrf.mxu0  ;;  %v3459_v56 = vmax.f32 %v3457_v25, %v3458_v18  ;;  %v5027_v25 = vld [vmem:[%s7890_s4 + $0x1b4] sm:$0xf] }
 0x59e   : > { %v2486_v0 = vpop.f32.mrf.mxu1  ;;  %v2992_v60 = vadd.f32 %v2991_v61, %v6848_v62  ;;  %v4666_v61 = vld [vmem:[%s7890_s4 + $0xa8] sm:$0xf0] }
 0x59f   : > { %v2487_v34 = vadd.f32 %v2486_v0, %v6831_v12  ;;  %v4693_v12 = vor.u32 %v4999_v8, %v4690_v15  ;;  %4003 = vmatpush.bf16.msrb.mxu1 %v4777_v7  ;;  %v4669_v37 = vor.u32 %v4993_v52, %v4666_v61  ;;  %v3533_v0 = vrot.slane %v3390_v54, 7  ;;  %v4989_v15 = vld [vmem:[%s7890_s4 + $0x84] sm:$0xf] }
 0x5a0   : > { %v3247_v42 = vmax.f32 %v2992_v60, 0.0  ;;  %v4653_v60 = vor.u32 %v4989_v15, %v4650_v32  ;;  %v4714_v15 = vld [vmem:[%s7890_s4 + $0x108] sm:$0xf0]  ;;  %v5021_v32 = vld [vmem:[%s7890_s4 + $0x184] sm:$0xf] }
 0x5a1   : > { %v3248_v47 = vmax.f32 %v2487_v34, 0.0  ;;  %4024 = vmatpush.bf16.msrb.mxu3 %v4693_v12  ;;  %v4661_v34 = vor.u32 %v4991_v50, %v4658_v13  ;;  %v3534_v12 = vrot.slane %v3459_v56, 6  ;;  %v5007_v50 = vld [vmem:[%s7890_s4 + $0x114] sm:$0xf]  ;;  %v4722_v13 = vld [vmem:[%s7890_s4 + $0x118] sm:$0xf0] }
 0x5a2   : > { %v3521_v48 = vmax.f32 %v3520_v16, %v3247_v42  ;;  %v4837_v42 = vor.u32 %v5035_v41, %v4834_v40  ;;  %v4826_v16 = vld [vmem:[%s7890_s4 + $0x1e8] sm:$0xf0]  ;;  %v5049_v40 = vld [vmem:[%s7891_s5 + $0x60] sm:$0xff] }
 0x5a3   : > { %v3315_v9 = vmax.f32 %v3314_v45, %v3248_v47  ;;  %v5050_v41 = vld [vmem:[%s7891_s5 + $0x68] sm:$0xff] }
 0x5a5   : > { %v3316_v17 = vrot.slane %v3315_v9, 4  ;;  %v2993_v63 = vpop.f32.mrf.mxu0  ;;  %4025 = vmatpush.bf16.msrb.mxu3 %v4685_v59  ;;  %v5017_v59 = vld [vmem:[%s7890_s4 + $0x164] sm:$0xf] }
 0x5a6   : > { %v2994_v31 = vadd.f32 %v2993_v63, %v6848_v62  ;;  %v4973_v62 = vld [vmem:[%s7890_s4 + $0x4] sm:$0xf] }
 0x5a7   : > { %v3317_v19 = vmax.f32 %v3315_v9, %v3316_v17  ;;  %v4589_v39 = vor.u32 %v4973_v62, %v4586_v51  ;;  %v4773_v9 = vor.u32 %v5019_v22, %v4770_v57  ;;  %v4762_v17 = vld [vmem:[%s7890_s4 + $0x168] sm:$0xf0]  ;;  %v5033_v63 = vld [vmem:[%s7890_s4 + $0x1e4] sm:$0xf]  ;;  %v5051_v57 = vld [vmem:[%s7891_s5 + $0x70] sm:$0xff] }
 0x5a8   : > { %v3251_v23 = vmax.f32 %v2994_v31, 0.0  ;;  %v4765_v31 = vor.u32 %v5017_v59, %v4762_v17  ;;  %v5013_v62 = vld [vmem:[%s7890_s4 + $0x144] sm:$0xf]  ;;  %v4746_v51 = vld [vmem:[%s7890_s4 + $0x148] sm:$0xf0] }
 0x5a9   : > { %v3318_v30 = vrot.slane %v3317_v19, 2  ;;  %4016 = vmatpush.bf16.msrb.mxu2 %v4589_v39  ;;  %4026 = vmatpush.bf16.msrb.mxu3 %v4677_v28  ;;  %v4810_v39 = vld [vmem:[%s7890_s4 + $0x1c8] sm:$0xf0]  ;;  %v4749_v43 = vor.u32 %v5013_v62, %v4746_v51  ;;  %v4738_v28 = vld [vmem:[%s7890_s4 + $0x138] sm:$0xf0] }
 0x5aa   : > { %v3522_v35 = vmax.f32 %v3521_v48, %v3251_v23  ;;  %v4754_v48 = vld [vmem:[%s7890_s4 + $0x158] sm:$0xf0]  ;;  %v5031_v23 = vld [vmem:[%s7890_s4 + $0x1d4] sm:$0xf]  ;;  %v5038_v22 = vld [vmem:[%s7891_s5 + $0x8] sm:$0xff] }
 0x5ab   : > { %v3319_v21 = vmax.f32 %v3317_v19, %v3318_v30  ;;  %v4829_v19 = vor.u32 %v5033_v63, %v4826_v16  ;;  %v4757_v30 = vor.u32 %v5015_v6, %v4754_v48  ;;  %v4821_v7 = vor.u32 %v5031_v23, %v4818_v3  ;;  %v5045_v63 = vld [vmem:[%s7891_s5 + $0x40] sm:$0xff]  ;;  %v5060_v6 = vld [vmem:[%s7892_s6 + $0x38] sm:$0xff]  ;;  %v5059_v3 = vld [vmem:[%s7892_s6 + $0x30] sm:$0xff] }
 0x5ac   : > { %v3523_v49 = vrot.slane %v3522_v35, 4 }
 0x5ad   : > { %v3320_v46 = vrot.slane %v3319_v21, 1  ;;  %4027 = vmatpush.bf16.msrb.mxu3 %v4669_v37  ;;  %v5009_v37 = vld [vmem:[%s7890_s4 + $0x124] sm:$0xf] }
 0x5ae   : > { %v3524_v53 = vmax.f32 %v3522_v35, %v3523_v49  ;;  %v5029_v35 = vld [vmem:[%s7890_s4 + $0x1c4] sm:$0xf]  ;;  %v4802_v49 = vld [vmem:[%s7890_s4 + $0x1b8] sm:$0xf0] }
 0x5af   : > { %v3321_v38 = vmax.f32 %v3319_v21, %v3320_v46  ;;  %v4813_v27 = vor.u32 %v5029_v35, %v4810_v39  ;;  %v5011_v21 = vld [vmem:[%s7890_s4 + $0x134] sm:$0xf]  ;;  %v4805_v46 = vor.u32 %v5027_v25, %v4802_v49 }
 0x5b0   : > { %v3525_v33 = vrot.slane %v3524_v53, 2  ;;  %v4741_v52 = vor.u32 %v5011_v21, %v4738_v28 }
 0x5b1   : > { %v3537_v58 = vsel %vm3536_vm2, %v3321_v38, %v3533_v0  ;;  %4028 = vmatpush.bf16.msrb.mxu3 %v4661_v34  ;;  %v5025_v0 = vld [vmem:[%s7890_s4 + $0x1a4] sm:$0xf]  ;;  %v4794_v38 = vld [vmem:[%s7890_s4 + $0x1a8] sm:$0xf0]  ;;  %v4786_v34 = vld [vmem:[%s7890_s4 + $0x198] sm:$0xf0] }
 0x5b2   : > { %v3526_v2 = vmax.f32 %v3524_v53, %v3525_v33  ;;  %v4730_v53 = vld [vmem:[%s7890_s4 + $0x128] sm:$0xf0]  ;;  %v4797_v33 = vor.u32 %v5025_v0, %v4794_v38  ;;  %v5057_v0 = vld [vmem:[%s7892_s6 + $0x20] sm:$0xff]  ;;  %v5056_v38 = vld [vmem:[%s7892_s6 + $0x18] sm:$0xff] }
 0x5b3   : > { %v4733_v18 = vor.u32 %v5009_v37, %v4730_v53  ;;  %v5058_v53 = vld [vmem:[%s7892_s6 + $0x28] sm:$0xff] }
 0x5b4   : > { %v3527_v8 = vrot.slane %v3526_v2, 1 }
 0x5b5   : > { %4029 = vmatpush.bf16.msrb.mxu3 %v4653_v60  ;;  %v4778_v60 = vld [vmem:[%s7890_s4 + $0x188] sm:$0xf0] }
 0x5b6   : > { %v3528_v29 = vmax.f32 %v3526_v2, %v3527_v8  ;;  %v4725_v2 = vor.u32 %v5007_v50, %v4722_v13  ;;  %v5005_v8 = vld [vmem:[%s7890_s4 + $0x104] sm:$0xf] }
 0x5b7   : > { %v5053_v50 = vld [vmem:[%s7892_s6] sm:$0xff] }
 0x5b8   : > { %v3535_v44 = vrot.slane %v3528_v29, 5  ;;  %v4717_v29 = vor.u32 %v5005_v8, %v4714_v15 }
 0x5ba   : > { %v3539_v45 = vsel %vm3538_vm3, %v3534_v12, %v3535_v44  ;;  %v4781_v12 = vor.u32 %v5021_v32, %v4778_v60  ;;  %v5042_v44 = vld [vmem:[%s7891_s5 + $0x28] sm:$0xff] }
 0x5bb   : > { %v3541_v47 = vsel %vm3540_vm4, %v3537_v58, %v3539_v45  ;;  %v5023_v58 = vld [vmem:[%s7890_s4 + $0x194] sm:$0xf]  ;;  %v5040_v45 = vld [vmem:[%s7891_s5 + $0x18] sm:$0xff] }
 0x5bc   : > { %v3543_v26 = vmax.f32 %v3252_v11, %v3541_v47  ;;  %v4789_v56 = vor.u32 %v5023_v58, %v4786_v34  ;;  %v5041_v11 = vld [vmem:[%s7891_s5 + $0x20] sm:$0xff]  ;;  %v5039_v47 = vld [vmem:[%s7891_s5 + $0x10] sm:$0xff] }
 0x5bd   : > { %v4097_v34 = vld [vmem:[%s7893_s7 + $0x4] ss:$0 sm:$0xff] }
 0x5be   : > { %3548 = vst.msk [vmem:[#allocation2] sm:$0xf] %vm7510_vm1, %v3543_v26  ;;  %v5052_v26 = vld [vmem:[%s7891_s5 + $0x78] sm:$0xff] }
 0x5c5   : > { %v3552_v1 = vld [vmem:[#allocation2] sm:$0xf] }
 0x5c6   : > { %v3554_v20 = vperm.slane %v3552_v1, 0  ;;  %v3555_v36 = vperm.slane %v3552_v1, 1  ;;  %v3556_v14 = vperm.slane %v3552_v1, 2  ;;  %v3557_v54 = vperm.slane %v3552_v1, 3  ;;  %v5037_v1 = vld [vmem:[%s7891_s5] sm:$0xff] }
 0x5c8   : > { %v3562_v5 = vpack.c.bf16 %v3554_v20, %v3554_v20  ;;  %v3563_v10 = vpack.c.bf16 %v3555_v36, %v3555_v36  ;;  %v7677_v24 = vpack.c.bf16 %v3556_v14, %v3556_v14  ;;  %v3565_v61 = vpack.c.bf16 %v3557_v54, %v3557_v54  ;;  %v5048_v20 = vld [vmem:[%s7891_s5 + $0x58] sm:$0xff]  ;;  %v5047_v14 = vld [vmem:[%s7891_s5 + $0x50] sm:$0xff] }
 0x5ca   : > { %3965 = vmatmul.bf16.vlgmr.msra.gmra.mxu1 %v3562_v5  ;;  %3978 = vmatmul.bf16.vlgmr.msra.gmra.mxu2 %v3563_v10 }
 0x5cb   : > { %3991 = vmatmul.bf16.vlgmr.msra.gmra.mxu3 %v7677_v24  ;;  %4035 = vmatpush.bf16.msra.mxu1 %v4773_v9  ;;  %v4581_v9 = vld [vmem:[%s7893_s7 + $0x3] ss:$8 sm:$0x3] }
 0x5cc   : > { %4048 = vmatpush.bf16.msra.mxu2 %v4837_v42  ;;  %4194 = vmatpush.bf16.msra.mxu3 %v5044_v4  ;;  %v3954_v35 = vperm.slane %v4581_v9, 1 }
 0x5cf   : > { %4036 = vmatpush.bf16.msra.mxu1 %v4765_v31 }
 0x5d0   : > { %4049 = vmatpush.bf16.msra.mxu2 %v4829_v19  ;;  %4195 = vmatpush.bf16.msra.mxu3 %v5043_v55 }
 0x5d3   : > { %4037 = vmatpush.bf16.msra.mxu1 %v4757_v30 }
 0x5d4   : > { %4050 = vmatpush.bf16.msra.mxu2 %v4821_v7  ;;  %4196 = vmatpush.bf16.msra.mxu3 %v5042_v44 }
 0x5d7   : > { %4038 = vmatpush.bf16.msra.mxu1 %v4749_v43 }
 0x5d8   : > { %4051 = vmatpush.bf16.msra.mxu2 %v4813_v27  ;;  %4197 = vmatpush.bf16.msra.mxu3 %v5041_v11 }
 0x5da   : > { %4004 = vmatmul.bf16.vlgmr.msrb.gmra.mxu1 %v3565_v61  ;;  %4017 = vmatmul.bf16.vlgmr.msrb.gmra.mxu2 %v3562_v5  ;;  %v3953_v5 = vperm.slane %v4581_v9, 0 }
 0x5db   : > { %4030 = vmatmul.bf16.vlgmr.msrb.gmra.mxu3 %v3563_v10  ;;  %4039 = vmatpush.bf16.msra.mxu1 %v4741_v52  ;;  %v5046_v10 = vld [vmem:[%s7891_s5 + $0x48] sm:$0xff] }
 0x5dc   : > { %4052 = vmatpush.bf16.msra.mxu2 %v4805_v46  ;;  %4198 = vmatpush.bf16.msra.mxu3 %v5040_v45 }
 0x5df   : > { %4040 = vmatpush.bf16.msra.mxu1 %v4733_v18  ;;  %v5055_v18 = vld [vmem:[%s7892_s6 + $0x10] sm:$0xff] }
 0x5e0   : > { %4053 = vmatpush.bf16.msra.mxu2 %v4797_v33  ;;  %4199 = vmatpush.bf16.msra.mxu3 %v5039_v47  ;;  %v5054_v33 = vld [vmem:[%s7892_s6 + $0x8] sm:$0xff] }
 0x5e3   : > { %4041 = vmatpush.bf16.msra.mxu1 %v4725_v2 }
 0x5e4   : > { %4054 = vmatpush.bf16.msra.mxu2 %v4789_v56  ;;  %4200 = vmatpush.bf16.msra.mxu3 %v5038_v22 }
 0x5e7   : > { %4042 = vmatpush.bf16.msra.mxu1 %v4717_v29  ;;  %v4238_v29 = vld [vmem:[%s7893_s7 + $0x5] ss:$0 sm:$0xff] }
 0x5e8   : > { %4055 = vmatpush.bf16.msra.mxu2 %v4781_v12  ;;  %4201 = vmatpush.bf16.msra.mxu3 %v5037_v1 }
 0x5ea   : > { %4043 = vmatmul.bf16.vlgmr.msra.gmra.mxu1 %v7677_v24 }
 0x5eb   : > { %4056 = vmatmul.bf16.vlgmr.msra.gmra.mxu2 %v3565_v61  ;;  %4207 = vmatpush.bf16.msrb.mxu1 %v5052_v26 }
 0x5ec   : > { %4287 = vmatpush.bf16.msrb.mxu2 %v5060_v6 }
 0x5ef   : > { %4208 = vmatpush.bf16.msrb.mxu1 %v5051_v57 }
 0x5f0   : > { %4288 = vmatpush.bf16.msrb.mxu2 %v5059_v3 }
 0x5f3   : > { %4209 = vmatpush.bf16.msrb.mxu1 %v5050_v41 }
 0x5f4   : > { %4289 = vmatpush.bf16.msrb.mxu2 %v5058_v53 }
 0x5f7   : > { %4210 = vmatpush.bf16.msrb.mxu1 %v5049_v40 }
 0x5f8   : > { %4290 = vmatpush.bf16.msrb.mxu2 %v5057_v0 }
 0x5fb   : > { %4211 = vmatpush.bf16.msrb.mxu1 %v5048_v20 }
 0x5fc   : > { %4291 = vmatpush.bf16.msrb.mxu2 %v5056_v38 }
 0x5ff   : > { %4212 = vmatpush.bf16.msrb.mxu1 %v5047_v14 }
 0x600   : > { %4292 = vmatpush.bf16.msrb.mxu2 %v5055_v18 }
 0x603   : > { %4213 = vmatpush.bf16.msrb.mxu1 %v5046_v10 }
 0x604   : > { %4293 = vmatpush.bf16.msrb.mxu2 %v5054_v33 }
 0x607   : > { %4214 = vmatpush.bf16.msrb.mxu1 %v5045_v63 }
 0x608   : > { %4294 = vmatpush.bf16.msrb.mxu2 %v5053_v50 }
 0x647   : > { %v3966_v36 = vpop.f32.mrf.mxu1 }
 0x648   : > { %v3967_v17 = vadd.f32 %v3966_v36, %v3953_v5 }
 0x64d   : > { %v3979_v24 = vpop.f32.mrf.mxu2 }
 0x64e   : > { %v3992_v42 = vpop.f32.mrf.mxu3  ;;  %v3980_v16 = vadd.f32 %v3979_v24, %v3967_v17 }
 0x64f   : > { %v3968_v59 = vpop.f32.mrf.mxu1 }
 0x650   : > { %v3993_v4 = vadd.f32 %v3992_v42, %v3980_v16 }
 0x655   : > { %v3981_v31 = vpop.f32.mrf.mxu2 }
 0x656   : > { %v3994_v19 = vpop.f32.mrf.mxu3 }
 0x657   : > { %v4005_v48 = vpop.f32.mrf.mxu1 }
 0x658   : > { %v4006_v23 = vadd.f32 %v4005_v48, %v3993_v4 }
 0x65a   : > { %v4061_v55 = vmax.f32 %v4006_v23, 0.0 }
 0x65c   : > { %v4063_v30 = vpack.c.bf16 %v4061_v55, %v4061_v55 }
 0x65d   : > { %v4018_v7 = vpop.f32.mrf.mxu2 }
 0x65e   : > { %v4031_v62 = vpop.f32.mrf.mxu3  ;;  %4202 = vmatmul.bf16.vlgmr.msra.gmra.mxu3 %v4063_v30  ;;  %v4019_v27 = vadd.f32 %v4018_v7, %v3954_v35 }
 0x65f   : > { %v4007_v51 = vpop.f32.mrf.mxu1 }
 0x660   : > { %v4032_v21 = vadd.f32 %v4031_v62, %v4019_v27 }
 0x665   : > { %v4020_v39 = vpop.f32.mrf.mxu2 }
 0x666   : > { %v4033_v43 = vpop.f32.mrf.mxu3 }
 0x667   : > { %v4044_v54 = vpop.f32.mrf.mxu1 }
 0x668   : > { %v4045_v28 = vadd.f32 %v4044_v54, %v4032_v21 }
 0x66e   : > { %v4057_v25 = vpop.f32.mrf.mxu2 }
 0x66f   : > { %v4058_v49 = vadd.f32 %v4057_v25, %v4045_v28  ;;  %v4046_v52 = vpop.f32.mrf.mxu1 }
 0x671   : > { %v4062_v61 = vmax.f32 %v4058_v49, 0.0 }
 0x673   : > { %v4064_v46 = vpack.c.bf16 %v4062_v61, %v4062_v61 }
 0x675   : > { %4215 = vmatmul.bf16.vlgmr.msrb.gmra.mxu1 %v4064_v46 }
 0x676   : > { %v4059_v37 = vpop.f32.mrf.mxu2 }
 0x6e1   : > { %v4203_v13 = vpop.f32.mrf.mxu3 }
 0x6e2   : > { %v4204_v2 = vadd.f32 %v4203_v13, %v4097_v34 }
 0x6e9   : > { %v4205_v58 = vpop.f32.mrf.mxu3 }
 0x6f2   : > { %v4216_v56 = vpop.f32.mrf.mxu1 }
 0x6f3   : > { %v4217_v8 = vadd.f32 %v4216_v56, %v4204_v2 }
 0x6f5   : > { %v4220_v15 = vmax.f32 %v4217_v8, 0.0 }
 0x6f7   : > { %v4221_v32 = vpack.c.bf16 %v4220_v15, %v4220_v15 }
 0x6f9   : > { %4295 = vmatmul.bf16.vlgmr.msrb.gmra.mxu2 %v4221_v32 }
 0x6fa   : > { %v4218_v60 = vpop.f32.mrf.mxu1 }
 0x77c   : > { %v4296_v12 = vpop.f32.mrf.mxu2 }
 0x77d   : > { %v4297_v44 = vadd.f32 %v4296_v12, %v4238_v29 }
 0x77f   : > { %v4301_v11 = vsel %vm4300_vm5, %v4297_v44, -inf }
 0x780   : > { %4302 = vmax.xlane.f32.xlu1 %v4301_v11 }
 0x784   : > { %v4298_v45 = vpop.f32.mrf.mxu2 }
 0x7f3   : > { %v4303_v47 = vpop.xlane.xlu1 %4302 }
 0x7f4   : > { %v4304_v26 = vsub.f32 %v4297_v44, %v4303_v47 }
 0x7f6   : > { %v4305_v22 = vmul.f32 1.442695, %v4304_v26 }
 0x7f8   : > { %5257 = vpow2.f32 %v4305_v22 }
 0x7fe   : > { %v5258_v57 = vpop.eup %5257 }
 0x7ff   : > { %v4307_v1 = vsel %vm4300_vm5, %v5258_v57, 0.0 }
 0x800   : > { %4308 = vadd.xlane.f32.xlu2 %v4307_v1 }
 0x873   : > { %v4309_v41 = vpop.xlane.xlu2 %4308 }
 0x874   : > { %5259 = vlog2.f32 %v4309_v41 }
 0x87a   : > { %v5260_v40 = vpop.eup %5259 }
 0x87b   : > { %v4311_v20 = vmul.f32 0.6931472, %v5260_v40 }
 0x87d   : > { %v4312_v36 = vadd.f32 %v4311_v20, %v4303_v47 }
 0x87f   : > { %v4313_v14 = vsub.f32 %v4297_v44, %v4312_v36 }
 0x881   : > { %4314 = vst.msk [vmem:[%s320_s23] sm:$0x1] %vm4300_vm5, %v4313_v14 }
 0x882   : > { %5299 = shalt.err (!%p5296_p5)
}
 0x883   : > { %5073 = dma.vmem_to_hbm [thread:$0]  (%p5441_p4), %s4327_s25, 16, %s4329_s26, %s4316_s11  }
 0x884 PF: > { %p5079_p6 = scmp.ge.s32.totalorder %s5350_s10, 2  ;;  %s4340_s20 = sand.u32 1, %s5330_s27  }
 0x885   : > { %s4341_s24 = scalar_lea.sflag [#allocation4], %s4340_s20 }
 0x886   : > { %p5076_p7 = pnand %p5079_p6, %p5448_p8 }
 0x888   : > { %p5077_p9 = pneg %p5076_p7 }
 0x88a   : > { %5325 = dma.done.wait (%p5077_p9), %s4341_s24, 16  }
 0x88b   : > { %5327 = vsyncadd (%p5077_p9), %s4341_s24, 4294967280  ;;  %s21_s10 = sadd.s32 1, %s5350_s10   ;;  %s7949_s27 = smov %s5334_s28 }
 0x88c   : > { %p18_p10 = scmp.ge.s32.totalorder %s21_s10, 4   ;;  %s7950_s28 = smov %s5338_s29 }
 0x88d   : > { %s7951_s29 = smov %s5454_s18  ;;  %s7952_s30 = smov %s5346_s9 }
 0x88e   : > { %s7953_s9 = smov %s7955_s13  ;;  %20 = sbr.rel (!%p18_p10) target bundleno = 4 (0x4), region = 97 }
 0x893   :  { %4346 = vsyncpa [#allocation4], 1 }
 0x894   :  { %4348 = vsyncpa [#allocation4 + $0x1], 1 }

</bundles_post_ra>
